<compile_context>
chip_gen: v5e
topology: v5e:2x2
jax: 0.10.0
libtpu: 0.0.40
codegen_flags: <defaults>
</compile_context>

<pallas_src>
import math
import numpy as np
import jax
import jax.numpy as jnp
from jax.experimental import pallas as pl
from jax.experimental.pallas import tpu as pltpu

SQRT2 = math.sqrt(2.0)
CONV_CLAMP = 256.0
LRELU_SLOPE = 0.2

# setup_filter([1,3,3,1]): normalized outer product; every resample() call in
# this decoder multiplies it by gain ** (ndim/2) = 4.
_f1 = np.asarray([1.0, 3.0, 3.0, 1.0], np.float64)
_f2 = np.outer(_f1, _f1)
_f2 = _f2 / _f2.sum()
FVALS_X4 = (_f2 * 4.0).reshape(-1)          # 16 blur taps, row-major (fy, fx)


# ----------------------------------------------------------------------------
# trace-time constants (numpy, depend only on static shapes)
# ----------------------------------------------------------------------------
def _tap_maps(h, w, k, pads, up=1, trailing=False):
    """Per-tap index maps (flat input index, -1 = zero/padding) after optional
    zero-insertion upsample and padding. pads = (top, bottom, left, right)."""
    idx = np.arange(h * w).reshape(h, w)
    if up == 2:
        hh, ww = (2 * h, 2 * w) if trailing else (2 * h - 1, 2 * w - 1)
        v = np.full((hh, ww), -1, np.int64)
        v[::2, ::2] = idx
    else:
        v = idx
    pt, pb, plf, prt = pads
    vp = np.full((v.shape[0] + pt + pb, v.shape[1] + plf + prt), -1, np.int64)
    vp[pt:pt + v.shape[0], plf:plf + v.shape[1]] = v
    oh, ow = vp.shape[0] - (k - 1), vp.shape[1] - (k - 1)
    return [vp[dy:dy + oh, dx:dx + ow] for dy in range(k) for dx in range(k)]


def _sel(m, p_in):
    """index map [oh, ow] -> 0/1 selection matrix [oh*ow, p_in] (f32)."""
    flat = m.reshape(-1)
    s = np.zeros((flat.size, p_in), np.float32)
    ok = flat >= 0
    s[np.nonzero(ok)[0], flat[ok]] = 1.0
    return s


def _up2_blur_consts(B, H):
    """(transposed 3x3 stride-2 conv) composed with (pad-1 4x4 blur, gain 4):
    BS_t = Blur[(2H)^2 x (2H+1)^2] @ S_t[(2H+1)^2 x H^2], batch folded.
    Entries are 0 or {1,3,9}/16 -> exact in bf16."""
    P = H * H
    Ht = 2 * H + 1
    conv_maps = _tap_maps(H, H, 3, (2, 2, 2, 2), up=2, trailing=False)  # -> Ht x Ht
    blur_maps = _tap_maps(Ht, Ht, 4, (1, 1, 1, 1))                      # -> 2H x 2H
    blur = np.zeros((4 * H * H, Ht * Ht), np.float64)
    for t, m in enumerate(blur_maps):
        blur += FVALS_X4[t] * _sel(m, Ht * Ht)
    eye_b = np.eye(B, dtype=np.float32)
    return np.stack([np.kron(eye_b, (blur @ _sel(m, P)).astype(np.float32))
                     for m in conv_maps])


def _rgb_up_const(B, H):
    """resample(rgb, f, upscale=2, padding=[2,1,2,1], gain=4) as one matrix
    [B*(2H)^2, B*H^2]."""
    P = H * H
    maps = _tap_maps(H, H, 4, (2, 1, 2, 1), up=2, trailing=True)        # -> 2H x 2H
    mat = np.zeros((4 * H * H, P), np.float64)
    for t, m in enumerate(maps):
        mat += FVALS_X4[t] * _sel(m, P)
    return np.kron(np.eye(B, dtype=np.float32), mat.astype(np.float32))


def _conv3x3_mask(B, H, C):
    """Destination-validity mask for a 3x3 / pad-1 conv on an HxH grid with
    batch folded into rows: [B*H*H, 9*C] 0/1, lane layout (tap-major,
    cin-minor) matching the in-kernel im2col built with pltpu.roll.  It also
    zeroes every row where the roll would wrap across a batch boundary."""
    ys, xs = np.meshgrid(np.arange(H), np.arange(H), indexing="ij")
    cols = []
    for dy in range(3):
        for dx in range(3):
            valid = ((ys + dy - 1 >= 0) & (ys + dy - 1 < H) &
                     (xs + dx - 1 >= 0) & (xs + dx - 1 < H))
            cols.append(valid.reshape(-1).astype(np.float32))
    m9 = np.stack(cols, axis=1)                     # [H*H, 9]
    m9 = np.tile(m9, (B, 1))                        # [B*H*H, 9]
    return np.repeat(m9, C, axis=1)                 # [B*H*H, 9*C]


# ----------------------------------------------------------------------------
# parameter preprocessing (tiny, trace-time XLA on weights only)
# ----------------------------------------------------------------------------
def _w9_and_g(w):
    """w [O, I, 3, 3] -> (W9 [9*I, O] im2col weights, rows (tap-major,
    cin-minor); G [I, O] = sum_t W_t**2 for demodulation)."""
    O, I, kh, kw = w.shape
    wt = jnp.transpose(w, (2, 3, 1, 0))             # [kh, kw, I, O]
    return wt.reshape(kh * kw * I, O), jnp.sum(wt * wt, axis=(0, 1))


def _wcat_and_g(w, flip=False):
    """w [O, I, 3, 3] -> (Wcat [I, 9*O] with Wcat[:, t*O:(t+1)*O] = W_t,
    G [I, O]).  flip=True for the transposed (up-2) conv weights."""
    if flip:
        w = w[:, :, ::-1, ::-1]
    O, I, kh, kw = w.shape
    wt = jnp.transpose(w, (2, 3, 1, 0)).reshape(kh * kw, I, O)
    wcat = jnp.transpose(wt, (1, 0, 2)).reshape(I, kh * kw * O)
    return wcat, jnp.sum(wt * wt, axis=0)


def _noise_bias(noise_const, strength, bias, B, cout):
    """(noise_const * noise_strength + bias) pre-broadcast to [B*P, Cout]."""
    n = noise_const.reshape(-1, 1) * strength + bias.reshape(1, cout)
    return jnp.tile(n, (B, 1))


def _pack_rows(named, dtype):
    """Concatenate same-lane-width 2-D arrays along rows (each padded to a
    multiple of 8 rows) -> (slab, {name: (row_start, rows)}).  Collapses many
    tiny HBM->VMEM DMAs into one."""
    offs, chunks, r = {}, [], 0
    for name, a in named:
        rows = a.shape[0]
        pad = (-rows) % 8
        chunks.append(jnp.pad(a, ((0, pad), (0, 0))))
        offs[name] = (r, rows)
        r += rows + pad
    return jnp.concatenate(chunks, axis=0).astype(dtype), offs


# ----------------------------------------------------------------------------
# forward wrapper: builds constants, defines the single fused kernel, runs it
# ----------------------------------------------------------------------------
def style_decoder2_forward(z, params, L):
    B = z.shape[0]
    C4 = params['b4_conv1']['conv_w'].shape[0]
    C8 = params['b8_conv1']['conv_w'].shape[0]
    f32 = jnp.float32
    wg = 1.0 / math.sqrt(L)

    # _z2ws repeats z for every layer, so every affine sees the same z.
    aff_layers = ['b4_conv1', 'b4_torgb', 'b8_conv0', 'b8_conv1', 'b8_torgb']
    affw = jnp.concatenate([(params[k]['affine_w'] * wg).T for k in aff_layers],
                           axis=1)                                   # [L, 3C4+2C8]
    affb = jnp.concatenate([params[k]['affine_b'] for k in aff_layers]).reshape(1, -1)
    aff = jnp.concatenate([affw, affb], axis=0).astype(f32)          # [L+1, Ltot]

    # const [1, C4, 4, 4] -> rows = spatial (row-major), lanes = channels, batch folded
    x0 = jnp.tile(jnp.transpose(params['const'][0], (1, 2, 0)).reshape(16, C4), (B, 1))

    w9_1, g1 = _w9_and_g(params['b4_conv1']['conv_w'])
    wcat3, g3 = _wcat_and_g(params['b8_conv0']['conv_w'], flip=True)  # transposed conv
    w9_4, g4 = _w9_and_g(params['b8_conv1']['conv_w'])

    nb1 = _noise_bias(params['b4_conv1']['noise_const'],
                      params['b4_conv1']['noise_strength'],
                      params['b4_conv1']['bias'], B, C4)              # [B*16, C4]
    nb3 = _noise_bias(params['b8_conv0']['noise_const'],
                      params['b8_conv0']['noise_strength'],
                      params['b8_conv0']['bias'], B, C8)              # [B*64, C8]
    nb4 = _noise_bias(params['b8_conv1']['noise_const'],
                      params['b8_conv1']['noise_strength'],
                      params['b8_conv1']['bias'], B, C8)              # [B*64, C8]

    # ToRGB weight_gain (1/sqrt(Cin*k^2), k=1) folded in; stored pre-transposed
    # so the rgb path is computed lane-dense as [3, rows].
    wrgb4t = params['b4_torgb']['conv_w'].reshape(3, C4) * (1.0 / math.sqrt(C4))
    wrgb8t = params['b8_torgb']['conv_w'].reshape(3, C8) * (1.0 / math.sqrt(C8))
    rgbb = jnp.zeros((3, C4), f32)
    rgbb = rgbb.at[:, 0].set(params['b4_torgb']['bias'])
    rgbb = rgbb.at[:, 1].set(params['b8_torgb']['bias'])

    # packed operand slabs (23 DMAs -> 9)
    p16, o16 = _pack_rows([('x0', x0), ('nb1', nb1), ('g1', g1),
                           ('wrgb4t', wrgb4t), ('w9_1', w9_1), ('rgbb', rgbb)], f32)
    p8, o8 = _pack_rows([('g3', g3), ('g4', g4), ('nb3', nb3), ('nb4', nb4),
                         ('w9_4', w9_4), ('wrgb8t', wrgb8t)], f32)

    # bf16-stored constants (0/1 and {1,3,9}/16 values -> exact in bf16);
    # cast back to f32 in-kernel, so numerics match an all-f32 build.
    bf16 = jnp.bfloat16
    m4 = jnp.asarray(_conv3x3_mask(B, 4, C4), bf16)      # [B*16, 9*C4]
    m8 = jnp.asarray(_conv3x3_mask(B, 8, C8), bf16)      # [B*64, 9*C8]
    s3 = jnp.asarray(_up2_blur_consts(B, 4), bf16)       # [9, B*64, B*16]
    rupT = jnp.asarray(_rgb_up_const(B, 4).T, bf16)      # [B*16, B*64]

    Ltot = 3 * C4 + 2 * C8
    seg = dict(c1_4=(0, C4), rgb4=(C4, 2 * C4), c0_8=(2 * C4, 3 * C4),
               c1_8=(3 * C4, 3 * C4 + C8), rgb8=(3 * C4 + C8, Ltot))

    # ------------------------------------------------------------------ kernel
    def kernel(z_ref, aff_ref, p16_ref, p8_ref, wc3_ref, s3_ref, rupT_ref,
               m4_ref, m8_ref, out_ref):
        dot = lambda a, b: jnp.dot(a, b, preferred_element_type=f32)

        def v16(name):
            r, n = o16[name]
            return p16_ref[r:r + n, :]

        def v8(name):
            r, n = o8[name]
            return p8_ref[r:r + n, :]

        def bcast(v, p):
            # [B, C] -> [B*p, C]: repeat each batch's row p times (rows are
            # (batch, pixel), pixel minor).  Pure sublane broadcasts, no MXU.
            return jnp.concatenate(
                [jnp.broadcast_to(v[b:b + 1, :], (p, v.shape[1])) for b in range(B)],
                axis=0)

        def taps3x3(xm, h, mask):
            # im2col for a 3x3 / pad-1 conv via sublane rotations: output lanes
            # are (tap-major, cin-minor); invalid taps (padding / cross-batch
            # wrap of the roll) are zeroed by the precomputed 0/1 mask.
            n = xm.shape[0]
            pieces = []
            for dy in range(3):
                for dx in range(3):
                    off = (dy - 1) * h + (dx - 1)
                    # pltpu.roll == np.roll: result[i] = x[i - shift], so
                    # shift = -off gives result[p_out] = x[p_out + off].
                    pieces.append(xm if off == 0 else pltpu.roll(xm, (-off) % n, 0))
            return jnp.concatenate(pieces, axis=1) * mask

        def act(a):
            a = jnp.where(a >= 0.0, a, LRELU_SLOPE * a)      # leaky_relu_0.2
            return jnp.clip(a, -CONV_CLAMP, CONV_CLAMP)

        # all five style affines (FullyConnected, 1/sqrt(L) folded) in one matmul
        styles = dot(z_ref[...], aff_ref[0:L, :]) + aff_ref[L:L + 1, :]   # [B, Ltot]
        st = {k: styles[:, a:b] for k, (a, b) in seg.items()}

        # ---- block @4: const -> conv1 (3x3, demodulated) ----
        s = st['c1_4']
        xm = v16('x0') * bcast(s, 16)
        y = dot(taps3x3(xm, 4, m4_ref[...].astype(f32)), v16('w9_1'))     # [B*16, C4]
        d = jax.lax.rsqrt(dot(s * s, v16('g1')) + 1e-8)                   # [B, C4]
        net4 = act((y * bcast(d, 16) + v16('nb1')) * SQRT2)

        # ---- block @4: to_rgb (1x1 mod conv, no demod), computed transposed ----
        rgb_bias = v16('rgbb')
        xmr = (net4 * bcast(st['rgb4'], 16)).T                            # [C4, B*16]
        rgb4t = jnp.clip(dot(v16('wrgb4t'), xmr) + rgb_bias[:, 0:1],
                         -CONV_CLAMP, CONV_CLAMP)                         # [3, B*16]

        # ---- block @8: conv0 (up-2 transposed conv + [1,3,3,1] blur, demod) ----
        # blur-folded gather kept as constant matmuls (review opt #2); constant
        # is bf16 in HBM.  TODO(synk): batch-independent layout for large B.
        s = st['c0_8']
        zc = dot(net4 * bcast(s, 16), wc3_ref[...])                       # [B*16, 9*C8]
        acc = dot(s3_ref[0].astype(f32), zc[:, 0:C8])
        for t in range(1, 9):                                             # static unroll
            acc = acc + dot(s3_ref[t].astype(f32), zc[:, t * C8:(t + 1) * C8])
        d = jax.lax.rsqrt(dot(s * s, v8('g3')) + 1e-8)                    # [B, C8]
        net8 = act((acc * bcast(d, 64) + v8('nb3')) * SQRT2)              # [B*64, C8]

        # ---- block @8: conv1 (3x3, demodulated) ----
        s = st['c1_8']
        xm = net8 * bcast(s, 64)
        y = dot(taps3x3(xm, 8, m8_ref[...].astype(f32)), v8('w9_4'))      # [B*64, C8]
        d = jax.lax.rsqrt(dot(s * s, v8('g4')) + 1e-8)
        net8 = act((y * bcast(d, 64) + v8('nb4')) * SQRT2)

        # ---- block @8: to_rgb + upsampled skip (transposed, lane-dense out) ----
        xmr = (net8 * bcast(st['rgb8'], 64)).T                            # [C8, B*64]
        rgb8t = jnp.clip(dot(v8('wrgb8t'), xmr) + rgb_bias[:, 1:2],
                         -CONV_CLAMP, CONV_CLAMP)                         # [3, B*64]
        out_ref[...] = rgb8t + dot(rgb4t, rupT_ref[...].astype(f32))

    operands = (z.astype(f32), aff, p16, p8, wcat3.astype(f32), s3, rupT, m4, m8)

    flops = int(
        2 * B * L * Ltot
        + 2 * (B * 16) * (9 * C4) * C4            # b4.conv1
        + 2 * (B * 16) * C4 * (9 * C8)            # conv0 weight matmul
        + 2 * 9 * (B * 64) * (B * 16) * C8        # conv0 gather + blur
        + 2 * (B * 64) * (9 * C8) * C8            # b8.conv1
        + 2 * 3 * C4 * (B * 16) + 2 * 3 * C8 * (B * 64)   # to_rgb
        + 2 * 3 * (B * 16) * (B * 64))            # rgb skip upsample
    bytes_accessed = int(sum(int(a.size) * a.dtype.itemsize for a in operands)
                         + 3 * B * 64 * 4)

    out = pl.pallas_call(
        kernel,
        out_shape=jax.ShapeDtypeStruct((3, B * 64), f32),
        compiler_params=pltpu.CompilerParams(vmem_limit_bytes=8 * 1024 * 1024),
        cost_estimate=pl.CostEstimate(flops=flops,
                                      transcendentals=int(B * (C4 + 2 * C8)),
                                      bytes_accessed=bytes_accessed),
    )(*operands)

    # [3, B*64] (lane-dense) -> NCHW [B, 3, 8, 8] (tiny, once per call)
    return out.reshape(3, B, 8, 8).transpose(1, 0, 2, 3)


# ----------------------------------------------------------------------------
# parameter init (same structure / shapes as the PyTorch module at this size)
# ----------------------------------------------------------------------------
def init_params(key, L, C4, C8):
    ks = iter(jax.random.split(key, 16))
    nrm = lambda shape: jax.random.normal(next(ks), shape, jnp.float32)

    def conv_block(cin, cout, res):
        return dict(affine_w=nrm((cin, L)), affine_b=jnp.ones((cin,), jnp.float32),
                    conv_w=nrm((cout, cin, 3, 3)),
                    noise_const=nrm((res, res)), noise_strength=jnp.float32(0.0),
                    bias=jnp.zeros((cout,), jnp.float32))

    def torgb_block(cin):
        return dict(affine_w=nrm((cin, L)), affine_b=jnp.ones((cin,), jnp.float32),
                    conv_w=nrm((3, cin, 1, 1)), bias=jnp.zeros((3,), jnp.float32))

    return dict(const=nrm((1, C4, 4, 4)),
                b4_conv1=conv_block(C4, C4, 4),
                b4_torgb=torgb_block(C4),
                b8_conv0=conv_block(C4, C8, 8),
                b8_conv1=conv_block(C8, C8, 8),
                b8_torgb=torgb_block(C8))


if __name__ == "__main__":
    B, L, IMG = 2, 32, 8
    C4, C8 = 16, 8            # small analogue of channels_dict (channel_base=64, max=16)
    key = jax.random.PRNGKey(0)
    kz, kp = jax.random.split(key)
    z = jax.random.normal(kz, (B, L), jnp.float32)     # batch[INPUT_KEY]
    params = init_params(kp, L, C4, C8)

    fwd = jax.jit(lambda zz, pp: style_decoder2_forward(zz, pp, L))
    out = fwd(z, params)
    jax.block_until_ready(out)
    assert out.shape == (B, 3, IMG, IMG), out.shape
    assert bool(jnp.all(jnp.isfinite(out)))
    print("KERNEL_OK")
</pallas_src>

<mosaic_0001>
module attributes {stable_mosaic.version = 11 : i64} {
  func.func @kernel(%arg0: memref<2x32xf32, #tpu.memory_space<vmem>>, %arg1: memref<33x64xf32, #tpu.memory_space<vmem>>, %arg2: memref<240x16xf32, #tpu.memory_space<vmem>>, %arg3: memref<360x8xf32, #tpu.memory_space<vmem>>, %arg4: memref<16x72xf32, #tpu.memory_space<vmem>>, %arg5: memref<9x128x32xbf16, #tpu.memory_space<vmem>>, %arg6: memref<32x128xbf16, #tpu.memory_space<vmem>>, %arg7: memref<32x144xbf16, #tpu.memory_space<vmem>>, %arg8: memref<128x72xbf16, #tpu.memory_space<vmem>>, %arg9: memref<3x128xf32, #tpu.memory_space<vmem>>) attributes {dimension_semantics = [], scalar_prefetch = 0 : i64, scratch_operands = 0 : i64, tpu.core_type = #tpu.core_type<tc>} {
    %c0 = arith.constant 0 : index
    %c0_0 = arith.constant 0 : index
    %0 = vector.load %arg0[%c0, %c0_0] : memref<2x32xf32, #tpu.memory_space<vmem>>, vector<2x32xf32>
    %c0_1 = arith.constant 0 : index
    %c0_2 = arith.constant 0 : index
    %1 = vector.load %arg1[%c0_1, %c0_2] : memref<33x64xf32, #tpu.memory_space<vmem>>, vector<32x64xf32>
    %cst = arith.constant dense<0.000000e+00> : vector<2x64xf32>
    %2 = tpu.matmul %0, %1, %cst {dimension_numbers = #tpu.dot_dimension_numbers<[1], [0], [0], [1], [0, 0, 1, 1], [], []>} : vector<2x32xf32>, vector<32x64xf32>, vector<2x64xf32> -> vector<2x64xf32>
    %c32 = arith.constant 32 : index
    %c0_3 = arith.constant 0 : index
    %3 = vector.load %arg1[%c32, %c0_3] : memref<33x64xf32, #tpu.memory_space<vmem>>, vector<1x64xf32>
    %4 = vector.broadcast %3 : vector<1x64xf32> to vector<2x64xf32>
    %5 = arith.addf %2, %4 : vector<2x64xf32>
    %6 = vector.extract_strided_slice %5 {offsets = [0, 0], sizes = [2, 16], strides = [1, 1]} : vector<2x64xf32> to vector<2x16xf32>
    %7 = vector.extract_strided_slice %5 {offsets = [0, 16], sizes = [2, 16], strides = [1, 1]} : vector<2x64xf32> to vector<2x16xf32>
    %8 = vector.extract_strided_slice %5 {offsets = [0, 32], sizes = [2, 16], strides = [1, 1]} : vector<2x64xf32> to vector<2x16xf32>
    %9 = vector.extract_strided_slice %5 {offsets = [0, 48], sizes = [2, 8], strides = [1, 1]} : vector<2x64xf32> to vector<2x8xf32>
    %10 = vector.extract_strided_slice %5 {offsets = [0, 56], sizes = [2, 8], strides = [1, 1]} : vector<2x64xf32> to vector<2x8xf32>
    %c0_4 = arith.constant 0 : index
    %c0_5 = arith.constant 0 : index
    %11 = vector.load %arg2[%c0_4, %c0_5] : memref<240x16xf32, #tpu.memory_space<vmem>>, vector<32x16xf32>
    %12 = vector.extract_strided_slice %6 {offsets = [0, 0], sizes = [1, 16], strides = [1, 1]} : vector<2x16xf32> to vector<1x16xf32>
    %13 = vector.shape_cast %12 : vector<1x16xf32> to vector<1x16xf32>
    %14 = vector.broadcast %13 : vector<1x16xf32> to vector<16x16xf32>
    %15 = vector.extract_strided_slice %6 {offsets = [1, 0], sizes = [1, 16], strides = [1, 1]} : vector<2x16xf32> to vector<1x16xf32>
    %16 = vector.shape_cast %15 : vector<1x16xf32> to vector<1x16xf32>
    %17 = vector.broadcast %16 : vector<1x16xf32> to vector<16x16xf32>
    %18 = tpu.concatenate %14, %17 in 0 : vector<16x16xf32>, vector<16x16xf32> -> vector<32x16xf32>
    %19 = arith.mulf %11, %18 : vector<32x16xf32>
    %c0_6 = arith.constant 0 : index
    %c0_7 = arith.constant 0 : index
    %20 = vector.load %arg7[%c0_6, %c0_7] : memref<32x144xbf16, #tpu.memory_space<vmem>>, vector<32x144xbf16>
    %21 = arith.extf %20 : vector<32x144xbf16> to vector<32x144xf32>
    %c5_i32 = arith.constant 5 : i32
    %22 = tpu.dynamic_rotate %19 by %c5_i32 dim 0 : vector<32x16xf32>, i32 -> vector<32x16xf32>
    %c4_i32 = arith.constant 4 : i32
    %23 = tpu.dynamic_rotate %19 by %c4_i32 dim 0 : vector<32x16xf32>, i32 -> vector<32x16xf32>
    %c3_i32 = arith.constant 3 : i32
    %24 = tpu.dynamic_rotate %19 by %c3_i32 dim 0 : vector<32x16xf32>, i32 -> vector<32x16xf32>
    %c1_i32 = arith.constant 1 : i32
    %25 = tpu.dynamic_rotate %19 by %c1_i32 dim 0 : vector<32x16xf32>, i32 -> vector<32x16xf32>
    %c31_i32 = arith.constant 31 : i32
    %26 = tpu.dynamic_rotate %19 by %c31_i32 dim 0 : vector<32x16xf32>, i32 -> vector<32x16xf32>
    %c29_i32 = arith.constant 29 : i32
    %27 = tpu.dynamic_rotate %19 by %c29_i32 dim 0 : vector<32x16xf32>, i32 -> vector<32x16xf32>
    %c28_i32 = arith.constant 28 : i32
    %28 = tpu.dynamic_rotate %19 by %c28_i32 dim 0 : vector<32x16xf32>, i32 -> vector<32x16xf32>
    %c27_i32 = arith.constant 27 : i32
    %29 = tpu.dynamic_rotate %19 by %c27_i32 dim 0 : vector<32x16xf32>, i32 -> vector<32x16xf32>
    %30 = tpu.concatenate %22, %23, %24, %25, %19, %26, %27, %28, %29 in 1 : vector<32x16xf32>, vector<32x16xf32>, vector<32x16xf32>, vector<32x16xf32>, vector<32x16xf32>, vector<32x16xf32>, vector<32x16xf32>, vector<32x16xf32>, vector<32x16xf32> -> vector<32x144xf32>
    %31 = arith.mulf %30, %21 : vector<32x144xf32>
    %c88 = arith.constant 88 : index
    %c0_8 = arith.constant 0 : index
    %32 = vector.load %arg2[%c88, %c0_8] : memref<240x16xf32, #tpu.memory_space<vmem>>, vector<144x16xf32>
    %cst_9 = arith.constant dense<0.000000e+00> : vector<32x16xf32>
    %33 = tpu.matmul %31, %32, %cst_9 {dimension_numbers = #tpu.dot_dimension_numbers<[1], [0], [0], [1], [0, 0, 1, 1], [], []>} : vector<32x144xf32>, vector<144x16xf32>, vector<32x16xf32> -> vector<32x16xf32>
    %34 = arith.mulf %6, %6 : vector<2x16xf32>
    %c64 = arith.constant 64 : index
    %c0_10 = arith.constant 0 : index
    %35 = vector.load %arg2[%c64, %c0_10] : memref<240x16xf32, #tpu.memory_space<vmem>>, vector<16x16xf32>
    %cst_11 = arith.constant dense<0.000000e+00> : vector<2x16xf32>
    %36 = tpu.matmul %34, %35, %cst_11 {dimension_numbers = #tpu.dot_dimension_numbers<[1], [0], [0], [1], [0, 0, 1, 1], [], []>} : vector<2x16xf32>, vector<16x16xf32>, vector<2x16xf32> -> vector<2x16xf32>
    %cst_12 = arith.constant 9.99999993E-9 : f32
    %37 = vector.broadcast %cst_12 : f32 to vector<2x16xf32>
    %38 = arith.addf %36, %37 : vector<2x16xf32>
    %39 = math.rsqrt %38 : vector<2x16xf32>
    %40 = vector.extract_strided_slice %39 {offsets = [0, 0], sizes = [1, 16], strides = [1, 1]} : vector<2x16xf32> to vector<1x16xf32>
    %41 = vector.shape_cast %40 : vector<1x16xf32> to vector<1x16xf32>
    %42 = vector.broadcast %41 : vector<1x16xf32> to vector<16x16xf32>
    %43 = vector.extract_strided_slice %39 {offsets = [1, 0], sizes = [1, 16], strides = [1, 1]} : vector<2x16xf32> to vector<1x16xf32>
    %44 = vector.shape_cast %43 : vector<1x16xf32> to vector<1x16xf32>
    %45 = vector.broadcast %44 : vector<1x16xf32> to vector<16x16xf32>
    %46 = tpu.concatenate %42, %45 in 0 : vector<16x16xf32>, vector<16x16xf32> -> vector<32x16xf32>
    %47 = arith.mulf %33, %46 : vector<32x16xf32>
    %c32_13 = arith.constant 32 : index
    %c0_14 = arith.constant 0 : index
    %48 = vector.load %arg2[%c32_13, %c0_14] : memref<240x16xf32, #tpu.memory_space<vmem>>, vector<32x16xf32>
    %49 = arith.addf %47, %48 : vector<32x16xf32>
    %cst_15 = arith.constant 1.41421354 : f32
    %50 = vector.broadcast %cst_15 : f32 to vector<32x16xf32>
    %51 = arith.mulf %49, %50 : vector<32x16xf32>
    %cst_16 = arith.constant 0.000000e+00 : f32
    %52 = vector.broadcast %cst_16 : f32 to vector<32x16xf32>
    %53 = arith.cmpf oge, %51, %52 : vector<32x16xf32>
    %cst_17 = arith.constant 2.000000e-01 : f32
    %54 = vector.broadcast %cst_17 : f32 to vector<32x16xf32>
    %55 = arith.mulf %54, %51 : vector<32x16xf32>
    %56 = arith.select %53, %51, %55 : vector<32x16xi1>, vector<32x16xf32>
    %cst_18 = arith.constant -2.560000e+02 : f32
    %cst_19 = arith.constant 2.560000e+02 : f32
    %57 = vector.broadcast %cst_18 : f32 to vector<32x16xf32>
    %58 = arith.maximumf %57, %56 : vector<32x16xf32>
    %59 = vector.broadcast %cst_19 : f32 to vector<32x16xf32>
    %60 = arith.minimumf %59, %58 : vector<32x16xf32>
    %c232 = arith.constant 232 : index
    %c0_20 = arith.constant 0 : index
    %61 = vector.load %arg2[%c232, %c0_20] : memref<240x16xf32, #tpu.memory_space<vmem>>, vector<3x16xf32>
    %62 = vector.extract_strided_slice %7 {offsets = [0, 0], sizes = [1, 16], strides = [1, 1]} : vector<2x16xf32> to vector<1x16xf32>
    %63 = vector.shape_cast %62 : vector<1x16xf32> to vector<1x16xf32>
    %64 = vector.broadcast %63 : vector<1x16xf32> to vector<16x16xf32>
    %65 = vector.extract_strided_slice %7 {offsets = [1, 0], sizes = [1, 16], strides = [1, 1]} : vector<2x16xf32> to vector<1x16xf32>
    %66 = vector.shape_cast %65 : vector<1x16xf32> to vector<1x16xf32>
    %67 = vector.broadcast %66 : vector<1x16xf32> to vector<16x16xf32>
    %68 = tpu.concatenate %64, %67 in 0 : vector<16x16xf32>, vector<16x16xf32> -> vector<32x16xf32>
    %69 = arith.mulf %60, %68 : vector<32x16xf32>
    %70 = tpu.transpose %69, [1, 0] : vector<32x16xf32> -> vector<16x32xf32>
    %c80 = arith.constant 80 : index
    %c0_21 = arith.constant 0 : index
    %71 = vector.load %arg2[%c80, %c0_21] : memref<240x16xf32, #tpu.memory_space<vmem>>, vector<3x16xf32>
    %cst_22 = arith.constant dense<0.000000e+00> : vector<3x32xf32>
    %72 = tpu.matmul %71, %70, %cst_22 {dimension_numbers = #tpu.dot_dimension_numbers<[1], [0], [0], [1], [0, 0, 1, 1], [], []>} : vector<3x16xf32>, vector<16x32xf32>, vector<3x32xf32> -> vector<3x32xf32>
    %73 = vector.extract_strided_slice %61 {offsets = [0, 0], sizes = [3, 1], strides = [1, 1]} : vector<3x16xf32> to vector<3x1xf32>
    %74 = vector.broadcast %73 : vector<3x1xf32> to vector<3x32xf32>
    %75 = arith.addf %72, %74 : vector<3x32xf32>
    %cst_23 = arith.constant -2.560000e+02 : f32
    %cst_24 = arith.constant 2.560000e+02 : f32
    %76 = vector.broadcast %cst_23 : f32 to vector<3x32xf32>
    %77 = arith.maximumf %76, %75 : vector<3x32xf32>
    %78 = vector.broadcast %cst_24 : f32 to vector<3x32xf32>
    %79 = arith.minimumf %78, %77 : vector<3x32xf32>
    %80 = vector.extract_strided_slice %8 {offsets = [0, 0], sizes = [1, 16], strides = [1, 1]} : vector<2x16xf32> to vector<1x16xf32>
    %81 = vector.shape_cast %80 : vector<1x16xf32> to vector<1x16xf32>
    %82 = vector.broadcast %81 : vector<1x16xf32> to vector<16x16xf32>
    %83 = vector.extract_strided_slice %8 {offsets = [1, 0], sizes = [1, 16], strides = [1, 1]} : vector<2x16xf32> to vector<1x16xf32>
    %84 = vector.shape_cast %83 : vector<1x16xf32> to vector<1x16xf32>
    %85 = vector.broadcast %84 : vector<1x16xf32> to vector<16x16xf32>
    %86 = tpu.concatenate %82, %85 in 0 : vector<16x16xf32>, vector<16x16xf32> -> vector<32x16xf32>
    %87 = arith.mulf %60, %86 : vector<32x16xf32>
    %c0_25 = arith.constant 0 : index
    %c0_26 = arith.constant 0 : index
    %88 = vector.load %arg4[%c0_25, %c0_26] : memref<16x72xf32, #tpu.memory_space<vmem>>, vector<16x72xf32>
    %cst_27 = arith.constant dense<0.000000e+00> : vector<32x72xf32>
    %89 = tpu.matmul %87, %88, %cst_27 {dimension_numbers = #tpu.dot_dimension_numbers<[1], [0], [0], [1], [0, 0, 1, 1], [], []>} : vector<32x16xf32>, vector<16x72xf32>, vector<32x72xf32> -> vector<32x72xf32>
    %c0_28 = arith.constant 0 : index
    %c0_29 = arith.constant 0 : index
    %c0_30 = arith.constant 0 : index
    %90 = vector.load %arg5[%c0_28, %c0_29, %c0_30] : memref<9x128x32xbf16, #tpu.memory_space<vmem>>, vector<1x128x32xbf16>
    %91 = vector.shape_cast %90 : vector<1x128x32xbf16> to vector<128x32xbf16>
    %92 = arith.extf %91 : vector<128x32xbf16> to vector<128x32xf32>
    %93 = vector.extract_strided_slice %89 {offsets = [0, 0], sizes = [32, 8], strides = [1, 1]} : vector<32x72xf32> to vector<32x8xf32>
    %cst_31 = arith.constant dense<0.000000e+00> : vector<128x8xf32>
    %94 = tpu.matmul %92, %93, %cst_31 {dimension_numbers = #tpu.dot_dimension_numbers<[1], [0], [0], [1], [0, 0, 1, 1], [], []>} : vector<128x32xf32>, vector<32x8xf32>, vector<128x8xf32> -> vector<128x8xf32>
    %c1 = arith.constant 1 : index
    %c0_32 = arith.constant 0 : index
    %c0_33 = arith.constant 0 : index
    %95 = vector.load %arg5[%c1, %c0_32, %c0_33] : memref<9x128x32xbf16, #tpu.memory_space<vmem>>, vector<1x128x32xbf16>
    %96 = vector.shape_cast %95 : vector<1x128x32xbf16> to vector<128x32xbf16>
    %97 = arith.extf %96 : vector<128x32xbf16> to vector<128x32xf32>
    %98 = vector.extract_strided_slice %89 {offsets = [0, 8], sizes = [32, 8], strides = [1, 1]} : vector<32x72xf32> to vector<32x8xf32>
    %cst_34 = arith.constant dense<0.000000e+00> : vector<128x8xf32>
    %99 = tpu.matmul %97, %98, %cst_34 {dimension_numbers = #tpu.dot_dimension_numbers<[1], [0], [0], [1], [0, 0, 1, 1], [], []>} : vector<128x32xf32>, vector<32x8xf32>, vector<128x8xf32> -> vector<128x8xf32>
    %100 = arith.addf %94, %99 : vector<128x8xf32>
    %c2 = arith.constant 2 : index
    %c0_35 = arith.constant 0 : index
    %c0_36 = arith.constant 0 : index
    %101 = vector.load %arg5[%c2, %c0_35, %c0_36] : memref<9x128x32xbf16, #tpu.memory_space<vmem>>, vector<1x128x32xbf16>
    %102 = vector.shape_cast %101 : vector<1x128x32xbf16> to vector<128x32xbf16>
    %103 = arith.extf %102 : vector<128x32xbf16> to vector<128x32xf32>
    %104 = vector.extract_strided_slice %89 {offsets = [0, 16], sizes = [32, 8], strides = [1, 1]} : vector<32x72xf32> to vector<32x8xf32>
    %cst_37 = arith.constant dense<0.000000e+00> : vector<128x8xf32>
    %105 = tpu.matmul %103, %104, %cst_37 {dimension_numbers = #tpu.dot_dimension_numbers<[1], [0], [0], [1], [0, 0, 1, 1], [], []>} : vector<128x32xf32>, vector<32x8xf32>, vector<128x8xf32> -> vector<128x8xf32>
    %106 = arith.addf %100, %105 : vector<128x8xf32>
    %c3 = arith.constant 3 : index
    %c0_38 = arith.constant 0 : index
    %c0_39 = arith.constant 0 : index
    %107 = vector.load %arg5[%c3, %c0_38, %c0_39] : memref<9x128x32xbf16, #tpu.memory_space<vmem>>, vector<1x128x32xbf16>
    %108 = vector.shape_cast %107 : vector<1x128x32xbf16> to vector<128x32xbf16>
    %109 = arith.extf %108 : vector<128x32xbf16> to vector<128x32xf32>
    %110 = vector.extract_strided_slice %89 {offsets = [0, 24], sizes = [32, 8], strides = [1, 1]} : vector<32x72xf32> to vector<32x8xf32>
    %cst_40 = arith.constant dense<0.000000e+00> : vector<128x8xf32>
    %111 = tpu.matmul %109, %110, %cst_40 {dimension_numbers = #tpu.dot_dimension_numbers<[1], [0], [0], [1], [0, 0, 1, 1], [], []>} : vector<128x32xf32>, vector<32x8xf32>, vector<128x8xf32> -> vector<128x8xf32>
    %112 = arith.addf %106, %111 : vector<128x8xf32>
    %c4 = arith.constant 4 : index
    %c0_41 = arith.constant 0 : index
    %c0_42 = arith.constant 0 : index
    %113 = vector.load %arg5[%c4, %c0_41, %c0_42] : memref<9x128x32xbf16, #tpu.memory_space<vmem>>, vector<1x128x32xbf16>
    %114 = vector.shape_cast %113 : vector<1x128x32xbf16> to vector<128x32xbf16>
    %115 = arith.extf %114 : vector<128x32xbf16> to vector<128x32xf32>
    %116 = vector.extract_strided_slice %89 {offsets = [0, 32], sizes = [32, 8], strides = [1, 1]} : vector<32x72xf32> to vector<32x8xf32>
    %cst_43 = arith.constant dense<0.000000e+00> : vector<128x8xf32>
    %117 = tpu.matmul %115, %116, %cst_43 {dimension_numbers = #tpu.dot_dimension_numbers<[1], [0], [0], [1], [0, 0, 1, 1], [], []>} : vector<128x32xf32>, vector<32x8xf32>, vector<128x8xf32> -> vector<128x8xf32>
    %118 = arith.addf %112, %117 : vector<128x8xf32>
    %c5 = arith.constant 5 : index
    %c0_44 = arith.constant 0 : index
    %c0_45 = arith.constant 0 : index
    %119 = vector.load %arg5[%c5, %c0_44, %c0_45] : memref<9x128x32xbf16, #tpu.memory_space<vmem>>, vector<1x128x32xbf16>
    %120 = vector.shape_cast %119 : vector<1x128x32xbf16> to vector<128x32xbf16>
    %121 = arith.extf %120 : vector<128x32xbf16> to vector<128x32xf32>
    %122 = vector.extract_strided_slice %89 {offsets = [0, 40], sizes = [32, 8], strides = [1, 1]} : vector<32x72xf32> to vector<32x8xf32>
    %cst_46 = arith.constant dense<0.000000e+00> : vector<128x8xf32>
    %123 = tpu.matmul %121, %122, %cst_46 {dimension_numbers = #tpu.dot_dimension_numbers<[1], [0], [0], [1], [0, 0, 1, 1], [], []>} : vector<128x32xf32>, vector<32x8xf32>, vector<128x8xf32> -> vector<128x8xf32>
    %124 = arith.addf %118, %123 : vector<128x8xf32>
    %c6 = arith.constant 6 : index
    %c0_47 = arith.constant 0 : index
    %c0_48 = arith.constant 0 : index
    %125 = vector.load %arg5[%c6, %c0_47, %c0_48] : memref<9x128x32xbf16, #tpu.memory_space<vmem>>, vector<1x128x32xbf16>
    %126 = vector.shape_cast %125 : vector<1x128x32xbf16> to vector<128x32xbf16>
    %127 = arith.extf %126 : vector<128x32xbf16> to vector<128x32xf32>
    %128 = vector.extract_strided_slice %89 {offsets = [0, 48], sizes = [32, 8], strides = [1, 1]} : vector<32x72xf32> to vector<32x8xf32>
    %cst_49 = arith.constant dense<0.000000e+00> : vector<128x8xf32>
    %129 = tpu.matmul %127, %128, %cst_49 {dimension_numbers = #tpu.dot_dimension_numbers<[1], [0], [0], [1], [0, 0, 1, 1], [], []>} : vector<128x32xf32>, vector<32x8xf32>, vector<128x8xf32> -> vector<128x8xf32>
    %130 = arith.addf %124, %129 : vector<128x8xf32>
    %c7 = arith.constant 7 : index
    %c0_50 = arith.constant 0 : index
    %c0_51 = arith.constant 0 : index
    %131 = vector.load %arg5[%c7, %c0_50, %c0_51] : memref<9x128x32xbf16, #tpu.memory_space<vmem>>, vector<1x128x32xbf16>
    %132 = vector.shape_cast %131 : vector<1x128x32xbf16> to vector<128x32xbf16>
    %133 = arith.extf %132 : vector<128x32xbf16> to vector<128x32xf32>
    %134 = vector.extract_strided_slice %89 {offsets = [0, 56], sizes = [32, 8], strides = [1, 1]} : vector<32x72xf32> to vector<32x8xf32>
    %cst_52 = arith.constant dense<0.000000e+00> : vector<128x8xf32>
    %135 = tpu.matmul %133, %134, %cst_52 {dimension_numbers = #tpu.dot_dimension_numbers<[1], [0], [0], [1], [0, 0, 1, 1], [], []>} : vector<128x32xf32>, vector<32x8xf32>, vector<128x8xf32> -> vector<128x8xf32>
    %136 = arith.addf %130, %135 : vector<128x8xf32>
    %c8 = arith.constant 8 : index
    %c0_53 = arith.constant 0 : index
    %c0_54 = arith.constant 0 : index
    %137 = vector.load %arg5[%c8, %c0_53, %c0_54] : memref<9x128x32xbf16, #tpu.memory_space<vmem>>, vector<1x128x32xbf16>
    %138 = vector.shape_cast %137 : vector<1x128x32xbf16> to vector<128x32xbf16>
    %139 = arith.extf %138 : vector<128x32xbf16> to vector<128x32xf32>
    %140 = vector.extract_strided_slice %89 {offsets = [0, 64], sizes = [32, 8], strides = [1, 1]} : vector<32x72xf32> to vector<32x8xf32>
    %cst_55 = arith.constant dense<0.000000e+00> : vector<128x8xf32>
    %141 = tpu.matmul %139, %140, %cst_55 {dimension_numbers = #tpu.dot_dimension_numbers<[1], [0], [0], [1], [0, 0, 1, 1], [], []>} : vector<128x32xf32>, vector<32x8xf32>, vector<128x8xf32> -> vector<128x8xf32>
    %142 = arith.addf %136, %141 : vector<128x8xf32>
    %143 = arith.mulf %8, %8 : vector<2x16xf32>
    %c0_56 = arith.constant 0 : index
    %c0_57 = arith.constant 0 : index
    %144 = vector.load %arg3[%c0_56, %c0_57] : memref<360x8xf32, #tpu.memory_space<vmem>>, vector<16x8xf32>
    %cst_58 = arith.constant dense<0.000000e+00> : vector<2x8xf32>
    %145 = tpu.matmul %143, %144, %cst_58 {dimension_numbers = #tpu.dot_dimension_numbers<[1], [0], [0], [1], [0, 0, 1, 1], [], []>} : vector<2x16xf32>, vector<16x8xf32>, vector<2x8xf32> -> vector<2x8xf32>
    %cst_59 = arith.constant 9.99999993E-9 : f32
    %146 = vector.broadcast %cst_59 : f32 to vector<2x8xf32>
    %147 = arith.addf %145, %146 : vector<2x8xf32>
    %148 = math.rsqrt %147 : vector<2x8xf32>
    %149 = vector.extract_strided_slice %148 {offsets = [0, 0], sizes = [1, 8], strides = [1, 1]} : vector<2x8xf32> to vector<1x8xf32>
    %150 = vector.shape_cast %149 : vector<1x8xf32> to vector<1x8xf32>
    %151 = vector.broadcast %150 : vector<1x8xf32> to vector<64x8xf32>
    %152 = vector.extract_strided_slice %148 {offsets = [1, 0], sizes = [1, 8], strides = [1, 1]} : vector<2x8xf32> to vector<1x8xf32>
    %153 = vector.shape_cast %152 : vector<1x8xf32> to vector<1x8xf32>
    %154 = vector.broadcast %153 : vector<1x8xf32> to vector<64x8xf32>
    %155 = tpu.concatenate %151, %154 in 0 : vector<64x8xf32>, vector<64x8xf32> -> vector<128x8xf32>
    %156 = arith.mulf %142, %155 : vector<128x8xf32>
    %c24 = arith.constant 24 : index
    %c0_60 = arith.constant 0 : index
    %157 = vector.load %arg3[%c24, %c0_60] : memref<360x8xf32, #tpu.memory_space<vmem>>, vector<128x8xf32>
    %158 = arith.addf %156, %157 : vector<128x8xf32>
    %cst_61 = arith.constant 1.41421354 : f32
    %159 = vector.broadcast %cst_61 : f32 to vector<128x8xf32>
    %160 = arith.mulf %158, %159 : vector<128x8xf32>
    %cst_62 = arith.constant 0.000000e+00 : f32
    %161 = vector.broadcast %cst_62 : f32 to vector<128x8xf32>
    %162 = arith.cmpf oge, %160, %161 : vector<128x8xf32>
    %cst_63 = arith.constant 2.000000e-01 : f32
    %163 = vector.broadcast %cst_63 : f32 to vector<128x8xf32>
    %164 = arith.mulf %163, %160 : vector<128x8xf32>
    %165 = arith.select %162, %160, %164 : vector<128x8xi1>, vector<128x8xf32>
    %cst_64 = arith.constant -2.560000e+02 : f32
    %cst_65 = arith.constant 2.560000e+02 : f32
    %166 = vector.broadcast %cst_64 : f32 to vector<128x8xf32>
    %167 = arith.maximumf %166, %165 : vector<128x8xf32>
    %168 = vector.broadcast %cst_65 : f32 to vector<128x8xf32>
    %169 = arith.minimumf %168, %167 : vector<128x8xf32>
    %170 = vector.extract_strided_slice %9 {offsets = [0, 0], sizes = [1, 8], strides = [1, 1]} : vector<2x8xf32> to vector<1x8xf32>
    %171 = vector.shape_cast %170 : vector<1x8xf32> to vector<1x8xf32>
    %172 = vector.broadcast %171 : vector<1x8xf32> to vector<64x8xf32>
    %173 = vector.extract_strided_slice %9 {offsets = [1, 0], sizes = [1, 8], strides = [1, 1]} : vector<2x8xf32> to vector<1x8xf32>
    %174 = vector.shape_cast %173 : vector<1x8xf32> to vector<1x8xf32>
    %175 = vector.broadcast %174 : vector<1x8xf32> to vector<64x8xf32>
    %176 = tpu.concatenate %172, %175 in 0 : vector<64x8xf32>, vector<64x8xf32> -> vector<128x8xf32>
    %177 = arith.mulf %169, %176 : vector<128x8xf32>
    %c0_66 = arith.constant 0 : index
    %c0_67 = arith.constant 0 : index
    %178 = vector.load %arg8[%c0_66, %c0_67] : memref<128x72xbf16, #tpu.memory_space<vmem>>, vector<128x72xbf16>
    %179 = arith.extf %178 : vector<128x72xbf16> to vector<128x72xf32>
    %c9_i32 = arith.constant 9 : i32
    %180 = tpu.dynamic_rotate %177 by %c9_i32 dim 0 : vector<128x8xf32>, i32 -> vector<128x8xf32>
    %c8_i32 = arith.constant 8 : i32
    %181 = tpu.dynamic_rotate %177 by %c8_i32 dim 0 : vector<128x8xf32>, i32 -> vector<128x8xf32>
    %c7_i32 = arith.constant 7 : i32
    %182 = tpu.dynamic_rotate %177 by %c7_i32 dim 0 : vector<128x8xf32>, i32 -> vector<128x8xf32>
    %c1_i32_68 = arith.constant 1 : i32
    %183 = tpu.dynamic_rotate %177 by %c1_i32_68 dim 0 : vector<128x8xf32>, i32 -> vector<128x8xf32>
    %c127_i32 = arith.constant 127 : i32
    %184 = tpu.dynamic_rotate %177 by %c127_i32 dim 0 : vector<128x8xf32>, i32 -> vector<128x8xf32>
    %c121_i32 = arith.constant 121 : i32
    %185 = tpu.dynamic_rotate %177 by %c121_i32 dim 0 : vector<128x8xf32>, i32 -> vector<128x8xf32>
    %c120_i32 = arith.constant 120 : i32
    %186 = tpu.dynamic_rotate %177 by %c120_i32 dim 0 : vector<128x8xf32>, i32 -> vector<128x8xf32>
    %c119_i32 = arith.constant 119 : i32
    %187 = tpu.dynamic_rotate %177 by %c119_i32 dim 0 : vector<128x8xf32>, i32 -> vector<128x8xf32>
    %188 = tpu.concatenate %180, %181, %182, %183, %177, %184, %185, %186, %187 in 1 : vector<128x8xf32>, vector<128x8xf32>, vector<128x8xf32>, vector<128x8xf32>, vector<128x8xf32>, vector<128x8xf32>, vector<128x8xf32>, vector<128x8xf32>, vector<128x8xf32> -> vector<128x72xf32>
    %189 = arith.mulf %188, %179 : vector<128x72xf32>
    %c280 = arith.constant 280 : index
    %c0_69 = arith.constant 0 : index
    %190 = vector.load %arg3[%c280, %c0_69] : memref<360x8xf32, #tpu.memory_space<vmem>>, vector<72x8xf32>
    %cst_70 = arith.constant dense<0.000000e+00> : vector<128x8xf32>
    %191 = tpu.matmul %189, %190, %cst_70 {dimension_numbers = #tpu.dot_dimension_numbers<[1], [0], [0], [1], [0, 0, 1, 1], [], []>} : vector<128x72xf32>, vector<72x8xf32>, vector<128x8xf32> -> vector<128x8xf32>
    %192 = arith.mulf %9, %9 : vector<2x8xf32>
    %c16 = arith.constant 16 : index
    %c0_71 = arith.constant 0 : index
    %193 = vector.load %arg3[%c16, %c0_71] : memref<360x8xf32, #tpu.memory_space<vmem>>, vector<8x8xf32>
    %cst_72 = arith.constant dense<0.000000e+00> : vector<2x8xf32>
    %194 = tpu.matmul %192, %193, %cst_72 {dimension_numbers = #tpu.dot_dimension_numbers<[1], [0], [0], [1], [0, 0, 1, 1], [], []>} : vector<2x8xf32>, vector<8x8xf32>, vector<2x8xf32> -> vector<2x8xf32>
    %cst_73 = arith.constant 9.99999993E-9 : f32
    %195 = vector.broadcast %cst_73 : f32 to vector<2x8xf32>
    %196 = arith.addf %194, %195 : vector<2x8xf32>
    %197 = math.rsqrt %196 : vector<2x8xf32>
    %198 = vector.extract_strided_slice %197 {offsets = [0, 0], sizes = [1, 8], strides = [1, 1]} : vector<2x8xf32> to vector<1x8xf32>
    %199 = vector.shape_cast %198 : vector<1x8xf32> to vector<1x8xf32>
    %200 = vector.broadcast %199 : vector<1x8xf32> to vector<64x8xf32>
    %201 = vector.extract_strided_slice %197 {offsets = [1, 0], sizes = [1, 8], strides = [1, 1]} : vector<2x8xf32> to vector<1x8xf32>
    %202 = vector.shape_cast %201 : vector<1x8xf32> to vector<1x8xf32>
    %203 = vector.broadcast %202 : vector<1x8xf32> to vector<64x8xf32>
    %204 = tpu.concatenate %200, %203 in 0 : vector<64x8xf32>, vector<64x8xf32> -> vector<128x8xf32>
    %205 = arith.mulf %191, %204 : vector<128x8xf32>
    %c152 = arith.constant 152 : index
    %c0_74 = arith.constant 0 : index
    %206 = vector.load %arg3[%c152, %c0_74] : memref<360x8xf32, #tpu.memory_space<vmem>>, vector<128x8xf32>
    %207 = arith.addf %205, %206 : vector<128x8xf32>
    %cst_75 = arith.constant 1.41421354 : f32
    %208 = vector.broadcast %cst_75 : f32 to vector<128x8xf32>
    %209 = arith.mulf %207, %208 : vector<128x8xf32>
    %cst_76 = arith.constant 0.000000e+00 : f32
    %210 = vector.broadcast %cst_76 : f32 to vector<128x8xf32>
    %211 = arith.cmpf oge, %209, %210 : vector<128x8xf32>
    %cst_77 = arith.constant 2.000000e-01 : f32
    %212 = vector.broadcast %cst_77 : f32 to vector<128x8xf32>
    %213 = arith.mulf %212, %209 : vector<128x8xf32>
    %214 = arith.select %211, %209, %213 : vector<128x8xi1>, vector<128x8xf32>
    %cst_78 = arith.constant -2.560000e+02 : f32
    %cst_79 = arith.constant 2.560000e+02 : f32
    %215 = vector.broadcast %cst_78 : f32 to vector<128x8xf32>
    %216 = arith.maximumf %215, %214 : vector<128x8xf32>
    %217 = vector.broadcast %cst_79 : f32 to vector<128x8xf32>
    %218 = arith.minimumf %217, %216 : vector<128x8xf32>
    %219 = vector.extract_strided_slice %10 {offsets = [0, 0], sizes = [1, 8], strides = [1, 1]} : vector<2x8xf32> to vector<1x8xf32>
    %220 = vector.shape_cast %219 : vector<1x8xf32> to vector<1x8xf32>
    %221 = vector.broadcast %220 : vector<1x8xf32> to vector<64x8xf32>
    %222 = vector.extract_strided_slice %10 {offsets = [1, 0], sizes = [1, 8], strides = [1, 1]} : vector<2x8xf32> to vector<1x8xf32>
    %223 = vector.shape_cast %222 : vector<1x8xf32> to vector<1x8xf32>
    %224 = vector.broadcast %223 : vector<1x8xf32> to vector<64x8xf32>
    %225 = tpu.concatenate %221, %224 in 0 : vector<64x8xf32>, vector<64x8xf32> -> vector<128x8xf32>
    %226 = arith.mulf %218, %225 : vector<128x8xf32>
    %227 = tpu.transpose %226, [1, 0] : vector<128x8xf32> -> vector<8x128xf32>
    %c352 = arith.constant 352 : index
    %c0_80 = arith.constant 0 : index
    %228 = vector.load %arg3[%c352, %c0_80] : memref<360x8xf32, #tpu.memory_space<vmem>>, vector<3x8xf32>
    %cst_81 = arith.constant dense<0.000000e+00> : vector<3x128xf32>
    %229 = tpu.matmul %228, %227, %cst_81 {dimension_numbers = #tpu.dot_dimension_numbers<[1], [0], [0], [1], [0, 0, 1, 1], [], []>} : vector<3x8xf32>, vector<8x128xf32>, vector<3x128xf32> -> vector<3x128xf32>
    %230 = vector.extract_strided_slice %61 {offsets = [0, 1], sizes = [3, 1], strides = [1, 1]} : vector<3x16xf32> to vector<3x1xf32>
    %231 = vector.broadcast %230 : vector<3x1xf32> to vector<3x128xf32>
    %232 = arith.addf %229, %231 : vector<3x128xf32>
    %cst_82 = arith.constant -2.560000e+02 : f32
    %cst_83 = arith.constant 2.560000e+02 : f32
    %233 = vector.broadcast %cst_82 : f32 to vector<3x128xf32>
    %234 = arith.maximumf %233, %232 : vector<3x128xf32>
    %235 = vector.broadcast %cst_83 : f32 to vector<3x128xf32>
    %236 = arith.minimumf %235, %234 : vector<3x128xf32>
    %c0_84 = arith.constant 0 : index
    %c0_85 = arith.constant 0 : index
    %237 = vector.load %arg6[%c0_84, %c0_85] : memref<32x128xbf16, #tpu.memory_space<vmem>>, vector<32x128xbf16>
    %238 = arith.extf %237 : vector<32x128xbf16> to vector<32x128xf32>
    %cst_86 = arith.constant dense<0.000000e+00> : vector<3x128xf32>
    %239 = tpu.matmul %79, %238, %cst_86 {dimension_numbers = #tpu.dot_dimension_numbers<[1], [0], [0], [1], [0, 0, 1, 1], [], []>} : vector<3x32xf32>, vector<32x128xf32>, vector<3x128xf32> -> vector<3x128xf32>
    %240 = arith.addf %236, %239 : vector<3x128xf32>
    %c0_87 = arith.constant 0 : index
    %c0_88 = arith.constant 0 : index
    %241 = vector.load %arg9[%c0_87, %c0_88] : memref<3x128xf32, #tpu.memory_space<vmem>>, vector<3x128xf32>
    tpu.vector_store %arg9[%c0_87, %c0_88], %240 {strides = array<i32>} : memref<3x128xf32, #tpu.memory_space<vmem>>, vector<3x128xf32>,
    return
  }
}

</mosaic_0001>

<bundles_post_ra>
// kernel: _lambda_.1
= control target key start
LH: loop header
LB: loop body
LE: loop exit
PB: predicated region body
PF: predicated region fallthrough
CT: control target
= control target key end

     0   :  { %vm39_vm0 = vcmask 261120   ;;  %v89_v10 = vlaneseq  ;;  %vm240_vm1 = vcmask 130048   ;;  %s4281_s16 = smov 64   ;;  %s4282_s19 = smov 80   ;;  %vm249_vm7 = vcmask 392192   ;;  %s6362_s1 = inlined_call_operand.vmem [shape: f32[33,64], index: 1, kind: input, shape index: {}]   ;;  %s6363_s0 = inlined_call_operand.vmem [shape: f32[2,32], index: 0, kind: input, shape index: {}]   ;;  %s6364_s2 = inlined_call_operand.vmem [shape: f32[240,16], index: 2, kind: input, shape index: {}]   ;;  %s6365_s7 = inlined_call_operand.vmem [shape: bf16[32,144], index: 7, kind: input, shape index: {}]   ;;  %s6366_s4 = inlined_call_operand.vmem [shape: f32[16,72], index: 4, kind: input, shape index: {}]   ;;  %s6367_s5 = inlined_call_operand.vmem [shape: bf16[9,128,32], index: 5, kind: input, shape index: {}]   ;;  %s6368_s3 = inlined_call_operand.vmem [shape: f32[360,8], index: 3, kind: input, shape index: {}]   ;;  %s6369_s8 = inlined_call_operand.vmem [shape: bf16[128,72], index: 8, kind: input, shape index: {}]   ;;  %s6370_s6 = inlined_call_operand.vmem [shape: bf16[32,128], index: 6, kind: input, shape index: {}]   ;;  %s6371_s9 = inlined_call_operand.vmem [shape: f32[3,128], index: 9, kind: output, shape index: {}]  }
   0x1   :  { %v36_v0 = vld [vmem:[%s6362_s1 + $0x18] sm:$0xff]  ;;  %v35_v1 = vld [vmem:[%s6362_s1 + $0x10] sm:$0xff]  ;;  %v34_v2 = vld [vmem:[%s6362_s1 + $0x8] sm:$0xff]  ;;  %s4283_s20 = smov 16   ;;  %s4284_s23 = smov 32   ;;  %vm254_vm8 = vcmask 523264  }
   0x2   :  { %55 = vmatpush.msra.mxu0 %v36_v0  ;;  %v33_v3 = vld [vmem:[%s6362_s1] sm:$0xff]  ;;  %v372_v5 = vld [vmem:[%s6364_s2 + $0x48] sm:$0xff]  ;;  %v298_v8 = vld [vmem:[%s6364_s2 + $0xd8] sm:$0xff]  ;;  %v4391_v17 = vshrl.u32 %v89_v10, 7  ;;  %s4285_s24 = smov 96   ;;  %s4286_s25 = smov 48  }
   0x3   :  { %v32_v4 = vld [vmem:[%s6363_s0] sm:$0x3]  ;;  %390 = vmatpush.msra.mxu3 %v372_v5  ;;  %v64_v13 = vld [vmem:[%s6364_s2 + $0x8] sm:$0xff]  ;;  %v66_v14 = vld [vmem:[%s6364_s2 + $0x18] sm:$0xff]  ;;  %s4287_s27 = smov 112   ;;  %vm259_vm9 = vcmask 654336  }
   0x4   :  { %56 = vmatpush.msra.mxu0 %v35_v1  ;;  %v371_v6 = vld [vmem:[%s6364_s2 + $0x40] sm:$0xff]  ;;  %v65_v15 = vld [vmem:[%s6364_s2 + $0x10] sm:$0xff]  ;;  %vm109_vm2 = vcmp.lt.s32.totalorder %v4391_v17, 3  ;;  %vm127_vm3 = vcmp.lt.s32.totalorder %v4391_v17, 7  ;;  %vm100_vm4 = vcmp.lt.s32.totalorder %v4391_v17, 4  ;;  %v4439_v35 = vld [vmem:[%s6365_s7 + $0x8] sm:$0xff] }
   0x5   :  { %391 = vmatpush.msra.mxu3 %v371_v6  ;;  %v299_v7 = vld [vmem:[%s6364_s2 + $0xe0] sm:$0xff]  ;;  %v80_v39 = vunpack.c.h.bf16 %v4439_v35  ;;  %vm91_vm5 = vcmp.lt.s32.totalorder %v4391_v17, 5  ;;  %v4470_v47 = vld [vmem:[%s6365_s7 + $0x10] sm:$0xff]  ;;  %vm118_vm6 = vcmp.lt.s32.totalorder %v4391_v17, 1  ;;  %v4493_v55 = vld [vmem:[%s6365_s7 + $0x18] sm:$0xff]  ;;  %vm264_vm10 = vcmask 785408  }
   0x6   :  { %57 = vmatpush.msra.mxu0 %v34_v2  ;;  %355 = vmatpush.msra.mxu2 %v299_v7  ;;  %v4274_v9 = vld [vmem:[%s6362_s1 + $0x20] ss:$0 sm:$0xff]  ;;  %v82_v50 = vunpack.c.h.bf16 %v4470_v47  ;;  %v84_v56 = vunpack.c.h.bf16 %v4493_v55  ;;  %vm269_vm11 = vcmask 916480   ;;  %s4288_s1 = smov 120   ;;  %s4289_s18 = smov 104  }
   0x7   :  { %v63_v16 = vld [vmem:[%s6364_s2] sm:$0xff]  ;;  %s4290_s0 = smov 88   ;;  %s4292_s28 = smov 8  }
   0x8   :  { %58 = vmatpush.msra.mxu0 %v33_v3  ;;  %356 = vmatpush.msra.mxu2 %v298_v8  ;;  %v4402_v21 = vld [vmem:[%s6365_s7] sm:$0xff]  ;;  %s4294_s10 = smov 56   ;;  %s4295_s13 = smov 24  }
   0x9   :  { %3399 = vmatmul.msk.f32.vlgmr.msra.gmra.mxu0 %vm39_vm0, %v32_v4  ;;  %v78_v26 = vunpack.c.h.bf16 %v4402_v21 }
  0x86   :  { %v60_v11 = vpop.f32.mrf.mxu0 }
  0x87   :  { %v61_v12 = vadd.f32 %v4274_v9, %v60_v11 }
  0x89   :  { %v4393_v18 = vperm.slane %v61_v12, 0  ;;  %v4395_v19 = vperm.slane %v61_v12, 1  ;;  %v4397_v20 = vmul.f32 %v61_v12, %v61_v12 }
  0x8b   :  { %v4405_v22 = vmul.f32 %v4393_v18, %v64_v13  ;;  %3404 = vmatmul.msk.f32.vlgmr.msra.gmra.mxu3 %vm240_vm1, %v4397_v20  ;;  %v4410_v23 = vmul.f32 %v4395_v19, %v66_v14  ;;  %v4413_v24 = vmul.f32 %v4395_v19, %v65_v15  ;;  %v4416_v25 = vmul.f32 %v4393_v18, %v63_v16  ;;  %v297_v13 = vld [vmem:[%s6364_s2 + $0xd0] sm:$0xff]  ;;  %v296_v14 = vld [vmem:[%s6364_s2 + $0xc8] sm:$0xff]  ;;  %v295_v15 = vld [vmem:[%s6364_s2 + $0xc0] sm:$0xff] }
  0x8c   :  { %312 = vmatpush.msra.mxu1 %v297_v13  ;;  %v294_v16 = vld [vmem:[%s6364_s2 + $0xb8] sm:$0xff] }
  0x8d   :  { %190 = vrot.lane.b32.xlu0 %v4410_v23, %s4281_s16  ;;  %188 = vrot.lane.b32.xlu2 %v4413_v24, %s4281_s16  ;;  %v105_v27 = vrot.slane %v4416_v25, 5  ;;  %v106_v28 = vrot.slane %v4405_v22, 5  ;;  %v123_v30 = vrot.slane %v4416_v25, 1  ;;  %v124_v32 = vrot.slane %v4405_v22, 1 }
  0x8e   :  { %184 = vrot.lane.b32.xlu1 %v4416_v25, %s4281_s16  ;;  %v96_v33 = vrot.slane %v4416_v25, 4  ;;  %v99_v34 = vrot.slane %v4410_v23, 4  ;;  %v107_v36 = vrot.slane %v4413_v24, 5  ;;  %v108_v42 = vrot.slane %v4410_v23, 5  ;;  %313 = vmatpush.msra.mxu1 %v296_v14 }
  0x8f   :  { %v112_v29 = vsel %vm109_vm2, %v105_v27, %v106_v28  ;;  %v130_v37 = vsel %vm127_vm3, %v123_v30, %v124_v32  ;;  %v85_v43 = vrot.slane %v4416_v25, 3  ;;  %v86_v44 = vrot.slane %v4405_v22, 3 }
  0x90   :  { %v275_v31 = vmul.f32 %v112_v29, %v78_v26  ;;  %v4451_v38 = vsel %vm100_vm4, %v99_v34, %v96_v33  ;;  %v111_v40 = vsel %vm109_vm2, %v106_v28, %v107_v36  ;;  %v114_v45 = vrot.slane %v4416_v25, 7  ;;  %314 = vmatpush.msra.mxu1 %v295_v15  ;;  %v290_v25 = vld [vmem:[%s6364_s2 + $0x98] sm:$0xff]  ;;  %v289_v26 = vld [vmem:[%s6364_s2 + $0x90] sm:$0xff] }
  0x91   :  { %v277_v41 = vmul.f32 %v111_v40, %v80_v39  ;;  %v117_v46 = vrot.slane %v4410_v23, 7  ;;  %v113_v48 = vsel %vm109_vm2, %v108_v42, %v105_v27  ;;  %v4478_v49 = vsel %vm91_vm5, %v85_v43, %v86_v44  ;;  %v288_v27 = vld [vmem:[%s6364_s2 + $0x88] sm:$0xff] }
  0x92   :  { %3400 = vmatmul.msk.f32.vlgmr.msra.gmra.mxu2 %vm240_vm1, %v275_v31  ;;  %v110_v52 = vsel %vm109_vm2, %v107_v36, %v108_v42  ;;  %v97_v54 = vrot.slane %v4405_v22, 4  ;;  %v281_v58 = vmul.f32 %v113_v48, %v84_v56  ;;  %v115_v59 = vrot.slane %v4405_v22, 7  ;;  %315 = vmatpush.msra.mxu1 %v294_v16  ;;  %v285_v31 = vld [vmem:[%s6364_s2 + $0x70] sm:$0xff] }
  0x93   :  { %v122_v51 = vsel %vm118_vm6, %v117_v46, %v114_v45  ;;  %v279_v53 = vmul.f32 %v110_v52, %v82_v50  ;;  %v125_v60 = vrot.slane %v4413_v24, 1  ;;  %v98_v61 = vrot.slane %v4413_v24, 4 }
  0x94   :  { %v103_v57 = vsel %vm100_vm4, %v96_v33, %v97_v54  ;;  %v121_v62 = vsel %vm118_vm6, %v114_v45, %v115_v59  ;;  %v87_v1 = vrot.slane %v4413_v24, 3  ;;  %v116_v2 = vrot.slane %v4413_v24, 7  ;;  %v291_v24 = vld [vmem:[%s6364_s2 + $0xa0] sm:$0xff] }
  0x95   :  { %200 = vrot.lane.b32.xlu2 %v130_v37, %s4282_s19  ;;  %136 = vrot.lane.b32.xlu0 %v4451_v38, %s4283_s20  ;;  %v129_v63 = vsel %vm127_vm3, %v124_v32, %v125_v60  ;;  %v102_v0 = vsel %vm100_vm4, %v97_v54, %v98_v61  ;;  %v88_v5 = vrot.slane %v4410_v23, 3  ;;  %v101_v6 = vsel %vm100_vm4, %v98_v61, %v99_v34  ;;  %v284_v32 = vld [vmem:[%s6364_s2 + $0x68] sm:$0xff]  ;;  %v283_v33 = vld [vmem:[%s6364_s2 + $0x60] sm:$0xff] }
  0x96   :  { %186 = vrot.lane.b32.xlu1 %v4405_v22, %s4281_s16  ;;  %v4519_v3 = vsel %vm91_vm5, %v86_v44, %v87_v1  ;;  %v120_v4 = vsel %vm118_vm6, %v115_v59, %v116_v2  ;;  %v126_v8 = vrot.slane %v4410_v23, 1  ;;  %v119_v10 = vsel %vm118_vm6, %v116_v2, %v117_v46  ;;  %v293_v22 = vld [vmem:[%s6364_s2 + $0xb0] sm:$0xff]  ;;  %v292_v23 = vld [vmem:[%s6364_s2 + $0xa8] sm:$0xff] }
  0x97   :  { %v4534_v7 = vsel %vm91_vm5, %v87_v1, %v88_v5  ;;  %v95_v11 = vsel %vm91_vm5, %v88_v5, %v85_v43  ;;  %316 = vmatpush.msra.mxu1 %v293_v22  ;;  %v79_v1 = vunpack.c.l.bf16 %v4439_v35  ;;  %v81_v22 = vunpack.c.l.bf16 %v4470_v47 }
  0x98   :  { %v128_v9 = vsel %vm127_vm3, %v125_v60, %v126_v8  ;;  %v131_v12 = vsel %vm127_vm3, %v126_v8, %v123_v30  ;;  %v286_v30 = vld [vmem:[%s6364_s2 + $0x78] sm:$0xff] }
  0x99   :  { %317 = vmatpush.msra.mxu1 %v292_v23 }
  0x9a   :  { %3401 = vmatmul.msk.f32.gmra.mxu2 %vm240_vm1, %v277_v41 }
  0x9b   :  { %318 = vmatpush.msra.mxu1 %v291_v24 }
  0x9d   :  { %152 = vrot.lane.b32.xlu0 %v113_v48, %s4284_s23  ;;  %216 = vrot.lane.b32.xlu2 %v4478_v49, %s4285_s24 }
  0x9e   :  { %168 = vrot.lane.b32.xlu1 %v122_v51, %s4286_s25  ;;  %319 = vmatpush.msra.mxu1 %v290_v25 }
  0xa0   :  { %320 = vmatpush.msra.mxu1 %v289_v26 }
  0xa2   :  { %3402 = vmatmul.msk.f32.gmra.mxu2 %vm240_vm1, %v279_v53  ;;  %321 = vmatpush.msra.mxu1 %v288_v27 }
  0xa5   :  { %228 = vrot.lane.b32.xlu0 %v103_v57, %s4287_s27  ;;  %154 = vrot.lane.b32.xlu2 %v112_v29, %s4284_s23  ;;  %v287_v29 = vld [vmem:[%s6364_s2 + $0x80] sm:$0xff] }
  0xa6   :  { %138 = vrot.lane.b32.xlu1 %v103_v57, %s4283_s20  ;;  %322 = vmatpush.msra.mxu1 %v287_v29 }
  0xa8   :  { %323 = vmatpush.msra.mxu1 %v286_v30 }
  0xaa   :  { %3403 = vmatmul.msk.f32.gmra.mxu2 %vm240_vm1, %v281_v58  ;;  %324 = vmatpush.msra.mxu1 %v285_v31 }
  0xac   :  { %325 = vmatpush.msra.mxu1 %v284_v32 }
  0xad   :  { %170 = vrot.lane.b32.xlu0 %v121_v62, %s4286_s25  ;;  %202 = vrot.lane.b32.xlu2 %v129_v63, %s4282_s19 }
  0xae   :  { %230 = vrot.lane.b32.xlu1 %v102_v0, %s4287_s27  ;;  %326 = vmatpush.msra.mxu1 %v283_v33 }
  0xb5   :  { %218 = vrot.lane.b32.xlu0 %v4519_v3, %s4285_s24  ;;  %140 = vrot.lane.b32.xlu2 %v102_v0, %s4283_s20 }
  0xb6   :  { %172 = vrot.lane.b32.xlu1 %v120_v4, %s4286_s25 }
  0xbd   :  { %156 = vrot.lane.b32.xlu0 %v111_v40, %s4284_s23  ;;  %232 = vrot.lane.b32.xlu2 %v101_v6, %s4287_s27 }
  0xbe   :  { %220 = vrot.lane.b32.xlu1 %v4534_v7, %s4285_s24 }
  0xc5   :  { %204 = vrot.lane.b32.xlu0 %v128_v9, %s4282_s19  ;;  %174 = vrot.lane.b32.xlu2 %v119_v10, %s4286_s25 }
  0xc6   :  { %158 = vrot.lane.b32.xlu1 %v110_v52, %s4284_s23  ;;  %v77_v52 = vunpack.c.l.bf16 %v4402_v21 }
  0xcd   :  { %142 = vrot.lane.b32.xlu0 %v101_v6, %s4283_s20  ;;  %222 = vrot.lane.b32.xlu2 %v95_v11, %s4285_s24 }
  0xce   :  { %206 = vrot.lane.b32.xlu1 %v131_v12, %s4282_s19 }
  0xd5   :  { %234 = vrot.lane.b32.xlu0 %v4451_v38, %s4287_s27  ;;  %502 = vrot.lane.b32.xlu2 %v4395_v19, %s4285_s24  ;;  %v282_v38 = vld [vmem:[%s6364_s2 + $0x58] sm:$0xff] }
  0xd6   :  { %500 = vrot.lane.b32.xlu1 %v4393_v18, %s4285_s24  ;;  %327 = vmatpush.msra.mxu1 %v282_v38 }
  0xdd   :  { %449 = vrot.lane.b32.xlu0 %v4395_v19, %s4287_s27 }
  0xde   :  { %447 = vrot.lane.b32.xlu1 %v4393_v18, %s4287_s27 }
  0xe7   :  { %v4597_v28 = vpop.permute.xlu2 %188 }
  0xef   :  { %v201_v36 = vpop.permute.xlu2 %200 }
  0xf7   :  { %v217_v41 = vpop.permute.xlu2 %216 }
  0xff   :  { %v4614_v34 = vpop.permute.xlu0 %190  ;;  %v155_v50 = vpop.permute.xlu2 %154 }
 0x100   :  { %v185_v37 = vpop.permute.xlu1 %184 }
 0x107   :  { %v137_v39 = vpop.permute.xlu0 %136  ;;  %v203_v60 = vpop.permute.xlu2 %202 }
 0x108   :  { %v187_v40 = vpop.permute.xlu1 %186  ;;  %v241_v42 = vsel %vm240_vm1, %v95_v11, %v137_v39 }
 0x10f   :  { %v153_v43 = vpop.permute.xlu0 %152  ;;  %v141_v5 = vpop.permute.xlu2 %140 }
 0x110   :  { %v169_v44 = vpop.permute.xlu1 %168  ;;  %v245_v45 = vsel %vm39_vm0, %v241_v42, %v153_v43  ;;  %v243_v11 = vsel %vm240_vm1, %v4519_v3, %v141_v5  ;;  %v413_v5 = vld [vmem:[%s6364_s2 + $0x28] sm:$0xff] }
 0x111   :  { %v250_v46 = vsel %vm249_vm7, %v245_v45, %v169_v44 }
 0x112   :  { %v255_v48 = vsel %vm254_vm8, %v250_v46, %v185_v37 }
 0x113   :  { %v260_v51 = vsel %vm259_vm9, %v255_v48, %v201_v36  ;;  %v83_v36 = vunpack.c.l.bf16 %v4493_v55  ;;  %v510_v55 = vld [vmem:[%s6366_s4] sm:$0xff] }
 0x114   :  { %v265_v54 = vsel %vm264_vm10, %v260_v51, %v217_v41 }
 0x117   :  { %v229_v53 = vpop.permute.xlu0 %228  ;;  %v233_v14 = vpop.permute.xlu2 %232 }
 0x118   :  { %v139_v56 = vpop.permute.xlu1 %138  ;;  %v270_v57 = vsel %vm269_vm11, %v265_v54, %v229_v53 }
 0x119   :  { %v274_v58 = vmul.f32 %v270_v57, %v77_v52  ;;  %v242_v59 = vsel %vm240_vm1, %v4478_v49, %v139_v56  ;;  %v358_v52 = vpop.f32.mrf.mxu2  ;;  %v412_v57 = vld [vmem:[%s6364_s2 + $0x20] sm:$0xff] }
 0x11a   :  { %v246_v63 = vsel %vm39_vm0, %v242_v59, %v155_v50 }
 0x11b   :  { %328 = vmatmul.f32.vlgmr.msra.gmra.mxu1 %v274_v58 }
 0x11f   :  { %v171_v61 = vpop.permute.xlu0 %170  ;;  %v175_v27 = vpop.permute.xlu2 %174 }
 0x120   :  { %v231_v62 = vpop.permute.xlu1 %230  ;;  %v251_v0 = vsel %vm249_vm7, %v246_v63, %v171_v61 }
 0x121   :  { %v256_v21 = vsel %vm254_vm8, %v251_v0, %v187_v40 }
 0x122   :  { %v261_v4 = vsel %vm259_vm9, %v256_v21, %v203_v60 }
 0x127   :  { %v219_v2 = vpop.permute.xlu0 %218  ;;  %v223_v37 = vpop.permute.xlu2 %222 }
 0x128   :  { %v173_v6 = vpop.permute.xlu1 %172  ;;  %v266_v8 = vsel %vm264_vm10, %v261_v4, %v219_v2 }
 0x129   :  { %v271_v49 = vsel %vm269_vm11, %v266_v8, %v231_v62 }
 0x12a   :  { %v276_v9 = vmul.f32 %v271_v49, %v79_v1  ;;  %v361_v1 = vpop.f32.mrf.mxu2 }
 0x12c   :  { %331 = vmatmul.f32.gmra.mxu1 %v276_v9 }
 0x12f   :  { %v157_v10 = vpop.permute.xlu0 %156 }
 0x130   :  { %v221_v12 = vpop.permute.xlu1 %220  ;;  %v247_v13 = vsel %vm39_vm0, %v243_v11, %v157_v10 }
 0x131   :  { %v252_v35 = vsel %vm249_vm7, %v247_v13, %v173_v6 }
 0x132   :  { %v257_v16 = vsel %vm254_vm8, %v252_v35, %v4597_v28  ;;  %v364_v13 = vpop.f32.mrf.mxu2 }
 0x137   :  { %v205_v15 = vpop.permute.xlu0 %204 }
 0x138   :  { %v262_v23 = vsel %vm259_vm9, %v257_v16, %v205_v15  ;;  %v159_v24 = vpop.permute.xlu1 %158  ;;  %v414_v16 = vld [vmem:[%s6364_s2 + $0x30] sm:$0xff] }
 0x139   :  { %v267_v25 = vsel %vm264_vm10, %v262_v23, %v221_v12 }
 0x13a   :  { %v272_v26 = vsel %vm269_vm11, %v267_v25, %v233_v14 }
 0x13b   :  { %v278_v3 = vmul.f32 %v272_v26, %v81_v22 }
 0x13d   :  { %334 = vmatmul.f32.gmra.mxu1 %v278_v3 }
 0x13f   :  { %v143_v29 = vpop.permute.xlu0 %142 }
 0x140   :  { %v244_v30 = vsel %vm240_vm1, %v4534_v7, %v143_v29  ;;  %v207_v32 = vpop.permute.xlu1 %206  ;;  %v393_v7 = vpop.f32.mrf.mxu3 }
 0x141   :  { %v248_v31 = vsel %vm39_vm0, %v244_v30, %v159_v24  ;;  %v394_v42 = vadd.f32 1e-08, %v393_v7  ;;  %v367_v29 = vpop.f32.mrf.mxu2 }
 0x142   :  { %v253_v28 = vsel %vm249_vm7, %v248_v31, %v175_v27  ;;  %v503_v27 = vpop.permute.xlu2 %502 }
 0x143   :  { %v258_v47 = vsel %vm254_vm8, %v253_v28, %v4614_v34  ;;  %4275 = vrsqrt.f32 %v394_v42  ;;  %v511_v34 = vld [vmem:[%s6366_s4 + $0x8] sm:$0xff]  ;;  %vm402_vm13 = vweird.f32 %v394_v42  ;;  %s4293_s4 = smov 40  }
 0x144   :  { %v263_v33 = vsel %vm259_vm9, %v258_v47, %v207_v32  ;;  %538 = vmatpush.msrb.mxu0 %v511_v34  ;;  %v415_v32 = vld [vmem:[%s6364_s2 + $0x38] sm:$0xff] }
 0x145   :  { %v268_v39 = vsel %vm264_vm10, %v263_v33, %v223_v37 }
 0x146   :  { %539 = vmatpush.msrb.mxu0 %v510_v55 }
 0x147   :  { %v235_v38 = vpop.permute.xlu0 %234 }
 0x148   :  { %v273_v40 = vsel %vm269_vm11, %v268_v39, %v235_v38  ;;  %v501_v0 = vpop.permute.xlu1 %500 }
 0x149   :  { %v280_v41 = vmul.f32 %v273_v40, %v83_v36  ;;  %v4276_v43 = vpop.eup %4275 }
 0x14a   :  { %v397_v44 = vmul.f32 %v4276_v43, %v394_v42  ;;  %vm403_vm12 = vweird.f32 %v4276_v43 }
 0x14b   :  { %337 = vmatmul.f32.gmra.mxu1 %v280_v41  ;;  %vm404_vm14 = vmor %vm402_vm13, %vm403_vm12 }
 0x14c   :  { %v398_v45 = vmul.f32 %v4276_v43, %v397_v44 }
 0x14e   :  { %v399_v46 = vmul.f32 0.5, %v398_v45 }
 0x14f   :  { %v450_v40 = vpop.permute.xlu0 %449 }
 0x150   :  { %v400_v48 = vsub.f32 1.5, %v399_v46 }
 0x152   :  { %v401_v50 = vmul.f32 %v4276_v43, %v400_v48 }
 0x154   :  { %v405_v51 = vsel %vm404_vm14, %v4276_v43, %v401_v50  ;;  %v448_v43 = vpop.permute.xlu1 %447 }
 0x155   :  { %v406_v56 = vperm.slane %v405_v51, 0  ;;  %v407_v15 = vperm.slane %v405_v51, 1 }
 0x198   :  { %v329_v53 = vpop.f32.mrf.mxu1 }
 0x199   :  { %v359_v54 = vadd.f32 %v358_v52, %v329_v53  ;;  %v3761_v52 = vld [vmem:[%s6367_s5] sm:$0xff]  }
 0x19a   :  { %v3762_v53 = vunpack.c.l.bf16 %v3761_v52 }
 0x19b   :  { %v408_v58 = vmul.f32 %v406_v56, %v359_v54  ;;  %v3763_v54 = vunpack.c.h.bf16 %v3761_v52 }
 0x19d   :  { %v416_v59 = vadd.f32 %v412_v57, %v408_v58 }
 0x19f   :  { %v420_v60 = vmul.f32 1.4142135, %v416_v59  ;;  %v4089_v59 = vld [vmem:[%s6367_s5 + $0x10] sm:$0xff]  }
 0x1a1   :  { %vm424_vm15 = vcmp.ge.f32.partialorder %v420_v60, 0.0  ;;  %v428_v61 = vmul.f32 0.2, %v420_v60 }
 0x1a3   :  { %v432_v62 = vsel %vm424_vm15, %v420_v60, %v428_v61  ;;  %v3770_v60 = vunpack.c.l.bf16 %v4089_v59  ;;  %v3771_v61 = vunpack.c.h.bf16 %v4089_v59 }
 0x1a4   :  { %v3405_v63 = vclamps-f32 %v432_v62, 256.0  ;;  %v4090_v62 = vld [vmem:[%s6367_s5 + $0x18] sm:$0xff]  }
 0x1a6   :  { %v506_v21 = vmul.f32 %v3405_v63, %v501_v0  ;;  %v453_v55 = vmul.f32 %v3405_v63, %v448_v43  ;;  %v3774_v63 = vunpack.c.l.bf16 %v4090_v62 }
 0x1a8   :  { %3415 = vmatmul.msk.f32.vlgmr.msrb.gmra.mxu0 %vm240_vm1, %v506_v21  ;;  %v457_v21 = vld [vmem:[%s6364_s2 + $0x50] sm:$0x7] }
 0x1a9   :  { %v332_v2 = vpop.f32.mrf.mxu1 }
 0x1aa   :  { %v362_v4 = vadd.f32 %v361_v1, %v332_v2  ;;  %v4091_v1 = vld [vmem:[%s6367_s5 + $0x20] sm:$0xff]  }
 0x1ab   :  { %v3778_v2 = vunpack.c.l.bf16 %v4091_v1 }
 0x1ac   :  { %v409_v6 = vmul.f32 %v406_v56, %v362_v4  ;;  %v4088_v56 = vld [vmem:[%s6367_s5 + $0x8] sm:$0xff]   ;;  %v3779_v4 = vunpack.c.h.bf16 %v4091_v1 }
 0x1ad   :  { %v3766_v57 = vunpack.c.l.bf16 %v4088_v56  ;;  %v3767_v58 = vunpack.c.h.bf16 %v4088_v56 }
 0x1ae   :  { %v417_v8 = vadd.f32 %v413_v5, %v409_v6  ;;  %v4092_v5 = vld [vmem:[%s6367_s5 + $0x28] sm:$0xff]  }
 0x1af   :  { %v3782_v6 = vunpack.c.l.bf16 %v4092_v5 }
 0x1b0   :  { %v421_v49 = vmul.f32 1.4142135, %v417_v8 }
 0x1b2   :  { %vm425_vm2 = vcmp.ge.f32.partialorder %v421_v49, 0.0  ;;  %v429_v9 = vmul.f32 0.2, %v421_v49 }
 0x1b4   :  { %v433_v10 = vsel %vm425_vm2, %v421_v49, %v429_v9  ;;  %v3783_v9 = vunpack.c.h.bf16 %v4092_v5 }
 0x1b5   :  { %v3406_v11 = vclamps-f32 %v433_v10, 256.0 }
 0x1b7   :  { %v507_v12 = vmul.f32 %v3406_v11, %v501_v0  ;;  %v454_v34 = vmul.f32 %v3406_v11, %v448_v43  ;;  %v3775_v0 = vunpack.c.h.bf16 %v4090_v62 }
 0x1b9   :  { %3416 = vmatmul.msk.f32.gmra.mxu0 %vm240_vm1, %v507_v12  ;;  %v4095_v12 = vld [vmem:[%s6367_s5 + $0x40] sm:$0xff]  }
 0x1ba   :  { %v335_v14 = vpop.f32.mrf.mxu1 }
 0x1bb   :  { %v365_v35 = vadd.f32 %v364_v13, %v335_v14  ;;  %v4737_v13 = vld [vmem:[%s6367_s5 + $0x50] sm:$0xff]  }
 0x1bd   :  { %v410_v22 = vmul.f32 %v407_v15, %v365_v35  ;;  %v4093_v35 = vld [vmem:[%s6367_s5 + $0x30] sm:$0xff]  }
 0x1bf   :  { %v418_v23 = vadd.f32 %v414_v16, %v410_v22  ;;  %v3794_v16 = vunpack.c.l.bf16 %v4095_v12  ;;  %v3803_v22 = vunpack.c.h.bf16 %v4737_v13 }
 0x1c1   :  { %v422_v24 = vmul.f32 1.4142135, %v418_v23 }
 0x1c3   :  { %vm426_vm4 = vcmp.ge.f32.partialorder %v422_v24, 0.0  ;;  %v430_v25 = vmul.f32 0.2, %v422_v24 }
 0x1c5   :  { %v434_v26 = vsel %vm426_vm4, %v422_v24, %v430_v25  ;;  %v3786_v25 = vunpack.c.l.bf16 %v4093_v35 }
 0x1c6   :  { %v3407_v3 = vclamps-f32 %v434_v26, 256.0 }
 0x1c8   :  { %v338_v30 = vpop.f32.mrf.mxu1  ;;  %v508_v31 = vmul.f32 %v3407_v3, %v503_v27  ;;  %v455_v42 = vmul.f32 %v3407_v3, %v450_v40 }
 0x1c9   :  { %v368_v28 = vadd.f32 %v367_v29, %v338_v30  ;;  %v3795_v29 = vunpack.c.h.bf16 %v4095_v12 }
 0x1ca   :  { %3417 = vmatmul.msk.f32.gmra.mxu0 %vm240_vm1, %v508_v31 }
 0x1cb   :  { %v411_v47 = vmul.f32 %v407_v15, %v368_v28 }
 0x1cd   :  { %v419_v33 = vadd.f32 %v415_v32, %v411_v47  ;;  %v3787_v32 = vunpack.c.h.bf16 %v4093_v35 }
 0x1cf   :  { %v423_v36 = vmul.f32 1.4142135, %v419_v33 }
 0x1d1   :  { %vm427_vm5 = vcmp.ge.f32.partialorder %v423_v36, 0.0  ;;  %v431_v37 = vmul.f32 0.2, %v423_v36 }
 0x1d3   :  { %v435_v38 = vsel %vm427_vm5, %v423_v36, %v431_v37  ;;  %v4096_v36 = vld [vmem:[%s6367_s5 + $0x48] sm:$0xff]   ;;  %v4103_v37 = vld [vmem:[%s6367_s5 + $0x80] sm:$0xff]  }
 0x1d4   :  { %v3408_v39 = vclamps-f32 %v435_v38, 256.0  ;;  %v3826_v43 = vunpack.c.l.bf16 %v4103_v37  ;;  %v3827_v56 = vunpack.c.h.bf16 %v4103_v37 }
 0x1d6   :  { %v456_v41 = vmul.f32 %v3408_v39, %v450_v40  ;;  %v509_v7 = vmul.f32 %v3408_v39, %v503_v27  ;;  %v4098_v27 = vld [vmem:[%s6367_s5 + $0x58] sm:$0xff]   ;;  %v3798_v40 = vunpack.c.l.bf16 %v4096_v36 }
 0x1d7   :  { %v3806_v30 = vunpack.c.l.bf16 %v4098_v27  ;;  %v4094_v39 = vld [vmem:[%s6367_s5 + $0x38] sm:$0xff]  }
 0x1d8   :  { %3409 = vmatpush.xpose.msk.msrb.mxu3 %vm240_vm1, %v456_v41  ;;  %3418 = vmatmul.msk.f32.gmra.mxu0 %vm240_vm1, %v509_v7  ;;  %v3807_v41 = vunpack.c.h.bf16 %v4098_v27  ;;  %v3791_v59 = vunpack.c.h.bf16 %v4094_v39 }
 0x1dc   :  { %3410 = vmatpush.xpose.msk.msrb.mxu3 %vm240_vm1, %v455_v42 }
 0x1e0   :  { %3411 = vmatpush.xpose.msk.msrb.mxu3 %vm240_vm1, %v454_v34 }
 0x1e4   :  { %3412 = vmatpush.xpose.msk.msrb.mxu3 %vm240_vm1, %v453_v55 }
 0x1e7   :  { %3413 = vmatmul.msk.f32.vlgmr.msrb.gmra.mxu3 %vm240_vm1, %v457_v21 }
 0x225   :  { %v541_v44 = vpop.f32.mrf.mxu0 }
 0x236   :  { %v544_v45 = vpop.f32.mrf.mxu0 }
 0x237   :  { %v4197_v46 = vpack.i.bf16 %v541_v44, %v544_v45 }
 0x239   :  { %4198 = vrot.lane.b32.xlu0 %v4197_v46, %s4288_s1 }
 0x241   :  { %4213 = vrot.lane.b32.xlu0 %v4197_v46, %s4285_s24 }
 0x247   :  { %v547_v48 = vpop.f32.mrf.mxu0 }
 0x249   :  { %4228 = vrot.lane.b32.xlu0 %v4197_v46, %s4287_s27 }
 0x255   :  { %v550_v50 = vpop.f32.mrf.mxu0 }
 0x256   :  { %807 = vmatpush.msrb.mxu2 %v550_v50  ;;  %v4242_v51 = vpack.i.bf16 %v547_v48, %v550_v50 }
 0x258   :  { %4243 = vrot.lane.b32.xlu0 %v4242_v51, %s4281_s16  ;;  %4203 = vrot.lane.b32.xlu1 %v4242_v51, %s4285_s24 }
 0x259   :  { %4193 = vrot.lane.b32.xlu2 %v4242_v51, %s4288_s1  ;;  %808 = vmatpush.msrb.mxu2 %v547_v48  ;;  %v4099_v48 = vld [vmem:[%s6367_s5 + $0x60] sm:$0xff]  }
 0x25a   :  { %v3810_v52 = vunpack.c.l.bf16 %v4099_v48  ;;  %v3811_v5 = vunpack.c.h.bf16 %v4099_v48  ;;  %v4106_v48 = vld [vmem:[%s6367_s5 + $0x98] sm:$0xff]  }
 0x25b   :  { %809 = vmatpush.msrb.mxu2 %v544_v45  ;;  %v3790_v45 = vunpack.c.l.bf16 %v4094_v39 }
 0x25d   :  { %810 = vmatpush.msrb.mxu2 %v541_v44 }
 0x25e   :  { %3451 = vmatmul.msk.f32.vlgmr.msrb.gmra.mxu2 %vm39_vm0, %v3762_v53 }
 0x260   :  { %4248 = vrot.lane.b32.xlu0 %v4197_v46, %s4281_s16  ;;  %4218 = vrot.lane.b32.xlu1 %v4197_v46, %s4289_s18 }
 0x261   :  { %4208 = vrot.lane.b32.xlu2 %v4242_v51, %s4289_s18 }
 0x266   :  { %3452 = vmatmul.msk.f32.gmra.mxu2 %vm39_vm0, %v3763_v54 }
 0x268   :  { %2080 = vrot.lane.b32.xlu0 %v4397_v20, %s4285_s24  ;;  %4233 = vrot.lane.b32.xlu1 %v4242_v51, %s4290_s0  ;;  %s4291_s24 = smov 72  }
 0x269   :  { %4223 = vrot.lane.b32.xlu2 %v4242_v51, %s4287_s27 }
 0x26e   :  { %3453 = vmatmul.msk.f32.gmra.mxu2 %vm39_vm0, %v3766_v57 }
 0x270   :  { %4253 = vrot.lane.b32.xlu1 %v4242_v51, %s4282_s19 }
 0x271   :  { %4238 = vrot.lane.b32.xlu2 %v4197_v46, %s4290_s0 }
 0x276   :  { %3454 = vmatmul.msk.f32.gmra.mxu2 %vm39_vm0, %v3767_v58 }
 0x278   :  { %4258 = vrot.lane.b32.xlu1 %v4197_v46, %s4282_s19 }
 0x279   :  { %4263 = vrot.lane.b32.xlu2 %v4242_v51, %s4291_s24  ;;  %v3799_v51 = vunpack.c.h.bf16 %v4096_v36 }
 0x27e   :  { %3455 = vmatmul.msk.f32.gmra.mxu2 %vm39_vm0, %v3770_v60 }
 0x280   :  { %2260 = vrot.lane.b32.xlu1 %v4393_v18, %s4282_s19 }
 0x281   :  { %4268 = vrot.lane.b32.xlu2 %v4197_v46, %s4291_s24 }
 0x286   :  { %3456 = vmatmul.msk.f32.gmra.mxu2 %vm39_vm0, %v3771_v61 }
 0x289   :  { %2262 = vrot.lane.b32.xlu2 %v4395_v19, %s4282_s19 }
 0x28e   :  { %3457 = vmatmul.msk.f32.gmra.mxu2 %vm39_vm0, %v3774_v63 }
 0x296   :  { %3458 = vmatmul.msk.f32.gmra.mxu2 %vm39_vm0, %v3775_v0  ;;  %v4104_v0 = vld [vmem:[%s6367_s5 + $0x88] sm:$0xff]  }
 0x29e   :  { %3459 = vmatmul.msk.f32.gmra.mxu2 %vm39_vm0, %v3778_v2  ;;  %v4785_v2 = vld [vmem:[%s6367_s5 + $0xa0] sm:$0xff]  }
 0x29f   :  { %v3843_v12 = vunpack.c.h.bf16 %v4785_v2 }
 0x2a6   :  { %3460 = vmatmul.msk.f32.gmra.mxu2 %vm39_vm0, %v3779_v4  ;;  %v3802_v4 = vunpack.c.l.bf16 %v4737_v13  ;;  %v4100_v13 = vld [vmem:[%s6367_s5 + $0x68] sm:$0xff]  }
 0x2ab   :  { %v4199_v8 = vpop.permute.xlu0 %4198 }
 0x2ac   :  { %v4200_v14 = vunpack.i.l.bf16 %v4199_v8  ;;  %v4201_v23 = vunpack.i.h.bf16 %v4199_v8 }
 0x2ae   :  { %3461 = vmatmul.msk.f32.gmra.mxu2 %vm39_vm0, %v3782_v6 }
 0x2b3   :  { %v4194_v49 = vpop.permute.xlu2 %4193  ;;  %v4743_v15 = vpop.permute.xlu0 %4213 }
 0x2b4   :  { %v4195_v10 = vunpack.i.l.bf16 %v4194_v49  ;;  %v4196_v11 = vunpack.i.h.bf16 %v4194_v49  ;;  %v4215_v50 = vunpack.i.l.bf16 %v4743_v15  ;;  %v4216_v53 = vunpack.i.h.bf16 %v4743_v15  ;;  %v4111_v15 = vld [vmem:[%s6367_s5 + $0xc0] sm:$0xff]  }
 0x2b5   :  { %v3859_v36 = vunpack.c.h.bf16 %v4111_v15 }
 0x2b6   :  { %694 = vmatpush.msrb.mxu1 %v4195_v10  ;;  %4167 = vmatpush.msra.mxu3 %v4195_v10 }
 0x2b7   :  { %3462 = vmatmul.msk.f32.gmra.mxu2 %vm39_vm0, %v3783_v9  ;;  %v3830_v9 = vunpack.c.l.bf16 %v4104_v0 }
 0x2b8   :  { %695 = vmatpush.msrb.mxu1 %v4196_v11  ;;  %4168 = vmatpush.msra.mxu3 %v4196_v11 }
 0x2ba   :  { %696 = vmatpush.msrb.mxu1 %v4200_v14  ;;  %4169 = vmatpush.msra.mxu3 %v4200_v14 }
 0x2bb   :  { %v4209_v24 = vpop.permute.xlu2 %4208  ;;  %v4229_v31 = vpop.permute.xlu0 %4228 }
 0x2bc   :  { %v4210_v26 = vunpack.i.l.bf16 %v4209_v24  ;;  %697 = vmatpush.msrb.mxu1 %v4201_v23  ;;  %4170 = vmatpush.msra.mxu3 %v4201_v23  ;;  %v4211_v3 = vunpack.i.h.bf16 %v4209_v24  ;;  %v4230_v38 = vunpack.i.l.bf16 %v4229_v31  ;;  %v4231_v7 = vunpack.i.h.bf16 %v4229_v31  ;;  %v4108_v23 = vld [vmem:[%s6367_s5 + $0xa8] sm:$0xff]  }
 0x2bd   :  { %3435 = vmatmul.msk.f32.vlgmr.msrb.gmra.mxu1 %vm39_vm0, %v3794_v16  ;;  %3440 = vmatmul.msk.f32.vlgmr.msra.gmra.mxu3 %vm39_vm0, %v3803_v22  ;;  %v3846_v31 = vunpack.c.l.bf16 %v4108_v23 }
 0x2be   :  { %1139 = vmatpush.msra.mxu1 %v4210_v26  ;;  %v3858_v26 = vunpack.c.l.bf16 %v4111_v15 }
 0x2bf   :  { %3463 = vmatmul.msk.f32.gmra.mxu2 %vm39_vm0, %v3786_v25  ;;  %v3814_v25 = vunpack.c.l.bf16 %v4100_v13 }
 0x2c0   :  { %1140 = vmatpush.msra.mxu1 %v4211_v3 }
 0x2c3   :  { %v4224_v28 = vpop.permute.xlu2 %4223 }
 0x2c4   :  { %v4225_v47 = vunpack.i.l.bf16 %v4224_v28  ;;  %v4226_v33 = vunpack.i.h.bf16 %v4224_v28 }
 0x2c5   :  { %3436 = vmatmul.msk.f32.gmra.mxu1 %vm39_vm0, %v3795_v29  ;;  %3441 = vmatmul.msk.f32.gmra.mxu3 %vm39_vm0, %v3806_v30  ;;  %v3831_v29 = vunpack.c.h.bf16 %v4104_v0 }
 0x2c6   :  { %965 = vmatpush.msra.mxu0 %v4225_v47  ;;  %4171 = vmatpush.msra.mxu2 %v4225_v47 }
 0x2c7   :  { %3464 = vmatmul.msk.f32.gmra.mxu2 %vm39_vm0, %v3787_v32  ;;  %v4105_v32 = vld [vmem:[%s6367_s5 + $0x90] sm:$0xff]  }
 0x2c8   :  { %966 = vmatpush.msra.mxu0 %v4226_v33  ;;  %4172 = vmatpush.msra.mxu2 %v4226_v33  ;;  %v3815_v33 = vunpack.c.h.bf16 %v4100_v13 }
 0x2ca   :  { %967 = vmatpush.msra.mxu0 %v4230_v38  ;;  %4173 = vmatpush.msra.mxu2 %v4230_v38  ;;  %v4204_v42 = vpop.permute.xlu1 %4203  ;;  %v4244_v34 = vpop.permute.xlu0 %4243  ;;  %v3834_v38 = vunpack.c.l.bf16 %v4105_v32 }
 0x2cb   :  { %v4205_v55 = vunpack.i.l.bf16 %v4204_v42  ;;  %v4764_v44 = vpop.permute.xlu2 %4238  ;;  %v4206_v46 = vunpack.i.h.bf16 %v4204_v42  ;;  %v4245_v60 = vunpack.i.l.bf16 %v4244_v34  ;;  %v4246_v62 = vunpack.i.h.bf16 %v4244_v34 }
 0x2cc   :  { %968 = vmatpush.msra.mxu0 %v4231_v7  ;;  %4174 = vmatpush.msra.mxu2 %v4231_v7  ;;  %v4240_v22 = vunpack.i.l.bf16 %v4764_v44  ;;  %v4241_v3 = vunpack.i.h.bf16 %v4764_v44  ;;  %v4112_v7 = vld [vmem:[%s6367_s5 + $0xc8] sm:$0xff]  }
 0x2cd   :  { %3437 = vmatmul.msk.f32.gmra.mxu1 %vm39_vm0, %v3798_v40  ;;  %3442 = vmatmul.msk.f32.gmra.mxu3 %vm39_vm0, %v3807_v41  ;;  %v3847_v40 = vunpack.c.h.bf16 %v4108_v23  ;;  %v4101_v41 = vld [vmem:[%s6367_s5 + $0x70] sm:$0xff]   ;;  %v3862_v44 = vunpack.c.l.bf16 %v4112_v7  ;;  %v4115_v23 = vld [vmem:[%s6367_s5 + $0xe0] sm:$0xff]  }
 0x2ce   :  { %3483 = vmatmul.msk.f32.vlgmr.msra.gmra.mxu0 %vm39_vm0, %v3826_v43  ;;  %1313 = vmatpush.msrb.mxu3 %v4205_v55  ;;  %v4109_v43 = vld [vmem:[%s6367_s5 + $0xb0] sm:$0xff]   ;;  %v3818_v55 = vunpack.c.l.bf16 %v4101_v41 }
 0x2cf   :  { %3465 = vmatmul.msk.f32.gmra.mxu2 %vm39_vm0, %v3790_v45  ;;  %v3835_v45 = vunpack.c.h.bf16 %v4105_v32 }
 0x2d0   :  { %1314 = vmatpush.msrb.mxu3 %v4206_v46  ;;  %v3850_v46 = vunpack.c.l.bf16 %v4109_v43 }
 0x2d2   :  { %1315 = vmatpush.msrb.mxu3 %v4215_v50  ;;  %v4219_v54 = vpop.permute.xlu1 %4218  ;;  %v4249_v61 = vpop.permute.xlu0 %4248 }
 0x2d3   :  { %v4220_v57 = vunpack.i.l.bf16 %v4219_v54  ;;  %v4264_v58 = vpop.permute.xlu2 %4263  ;;  %v4221_v63 = vunpack.i.h.bf16 %v4219_v54  ;;  %v4250_v21 = vunpack.i.l.bf16 %v4249_v61  ;;  %v4251_v6 = vunpack.i.h.bf16 %v4249_v61 }
 0x2d4   :  { %1316 = vmatpush.msrb.mxu3 %v4216_v53  ;;  %v4265_v1 = vunpack.i.l.bf16 %v4264_v58  ;;  %v4266_v8 = vunpack.i.h.bf16 %v4264_v58  ;;  %v3838_v53 = vunpack.c.l.bf16 %v4106_v48  ;;  %v3851_v54 = vunpack.c.h.bf16 %v4109_v43  ;;  %v4110_v58 = vld [vmem:[%s6367_s5 + $0xb8] sm:$0xff]  }
 0x2d5   :  { %3438 = vmatmul.msk.f32.gmra.mxu1 %vm39_vm0, %v3799_v51  ;;  %3443 = vmatmul.msk.f32.gmra.mxu3 %vm39_vm0, %v3810_v52  ;;  %v3819_v51 = vunpack.c.h.bf16 %v4101_v41  ;;  %v3863_v52 = vunpack.c.h.bf16 %v4112_v7  ;;  %v4137_v41 = vld [vmem:[%s6367_s5 + $0x190] sm:$0xff]  }
 0x2d6   :  { %3484 = vmatmul.msk.f32.gmra.mxu0 %vm39_vm0, %v3827_v56  ;;  %2009 = vmatpush.msra.mxu3 %v4245_v60  ;;  %v4102_v56 = vld [vmem:[%s6367_s5 + $0x78] sm:$0xff]   ;;  %v4129_v7 = vld [vmem:[%s6367_s5 + $0x150] sm:$0xff]  }
 0x2d7   :  { %3466 = vmatmul.msk.f32.gmra.mxu2 %vm39_vm0, %v3791_v59  ;;  %1141 = vmatpush.msra.mxu1 %v4220_v57  ;;  %v4113_v57 = vld [vmem:[%s6367_s5 + $0xd0] sm:$0xff]   ;;  %v3822_v60 = vunpack.c.l.bf16 %v4102_v56 }
 0x2d8   :  { %2010 = vmatpush.msra.mxu3 %v4246_v62  ;;  %v3866_v61 = vunpack.c.l.bf16 %v4113_v57  ;;  %v3839_v62 = vunpack.c.h.bf16 %v4106_v48 }
 0x2d9   :  { %1142 = vmatpush.msra.mxu1 %v4221_v63  ;;  %v3854_v63 = vunpack.c.l.bf16 %v4110_v58 }
 0x2da   :  { %2011 = vmatpush.msra.mxu3 %v4250_v21  ;;  %v4234_v49 = vpop.permute.xlu1 %4233  ;;  %v3823_v21 = vunpack.c.h.bf16 %v4102_v56  ;;  %v3931_v56 = vunpack.c.h.bf16 %v4129_v7 }
 0x2db   :  { %1835 = vmatpush.msrb.mxu1 %v4265_v1  ;;  %v4235_v10 = vunpack.i.l.bf16 %v4234_v49  ;;  %v4269_v11 = vpop.permute.xlu2 %4268  ;;  %v4236_v35 = vunpack.i.h.bf16 %v4234_v49  ;;  %v3867_v1 = vunpack.c.h.bf16 %v4113_v57  ;;  %v4127_v49 = vld [vmem:[%s6367_s5 + $0x140] sm:$0xff]   ;;  %v4117_v57 = vld [vmem:[%s6367_s5 + $0xf0] sm:$0xff]  }
 0x2dc   :  { %v4270_v14 = vunpack.i.l.bf16 %v4269_v11  ;;  %2012 = vmatpush.msra.mxu3 %v4251_v6  ;;  %v4271_v16 = vunpack.i.h.bf16 %v4269_v11  ;;  %v4114_v6 = vld [vmem:[%s6367_s5 + $0xd8] sm:$0xff]  }
 0x2dd   :  { %1836 = vmatpush.msrb.mxu1 %v4266_v8  ;;  %3444 = vmatmul.msk.f32.gmra.mxu3 %vm39_vm0, %v3811_v5  ;;  %v3855_v5 = vunpack.c.h.bf16 %v4110_v58  ;;  %v4119_v8 = vld [vmem:[%s6367_s5 + $0x100] sm:$0xff]   ;;  %v3871_v13 = vunpack.c.h.bf16 %v4114_v6  ;;  %v4122_v58 = vld [vmem:[%s6367_s5 + $0x118] sm:$0xff]  }
 0x2de   :  { %3439 = vmatmul.msk.f32.gmra.mxu1 %vm39_vm0, %v3802_v4  ;;  %3485 = vmatmul.msk.f32.gmra.mxu0 %vm39_vm0, %v3830_v9  ;;  %v3842_v4 = vunpack.c.l.bf16 %v4785_v2  ;;  %v4135_v2 = vld [vmem:[%s6367_s5 + $0x180] sm:$0xff]   ;;  %v3890_v11 = vunpack.c.l.bf16 %v4119_v8  ;;  %v3891_v15 = vunpack.c.h.bf16 %v4119_v8 }
 0x2df   :  { %1487 = vmatpush.msrb.mxu2 %v4235_v10  ;;  %1837 = vmatpush.msrb.mxu1 %v4270_v14  ;;  %v3870_v10 = vunpack.c.l.bf16 %v4114_v6  ;;  %v3922_v14 = vunpack.c.l.bf16 %v4127_v49 }
 0x2e0   :  { %3492 = vmatmul.msk.f32.vlgmr.msra.gmra.mxu2 %vm39_vm0, %v3843_v12  ;;  %v3954_v12 = vunpack.c.l.bf16 %v4135_v2 }
 0x2e1   :  { %1488 = vmatpush.msrb.mxu2 %v4236_v35  ;;  %1838 = vmatpush.msrb.mxu1 %v4271_v16  ;;  %v4803_v24 = vpop.f32.mrf.mxu2  ;;  %v3955_v16 = vunpack.c.h.bf16 %v4135_v2 }
 0x2e2   :  { %v4254_v27 = vpop.permute.xlu1 %4253 }
 0x2e3   :  { %1489 = vmatpush.msrb.mxu2 %v4240_v22  ;;  %v4255_v30 = vunpack.i.l.bf16 %v4254_v27  ;;  %v4256_v28 = vunpack.i.h.bf16 %v4254_v27  ;;  %v3923_v22 = vunpack.c.h.bf16 %v4127_v49  ;;  %v3883_v49 = vunpack.c.h.bf16 %v4117_v57 }
 0x2e5   :  { %1490 = vmatpush.msrb.mxu2 %v4241_v3  ;;  %3445 = vmatmul.msk.f32.gmra.mxu3 %vm39_vm0, %v3814_v25  ;;  %v4120_v25 = vld [vmem:[%s6367_s5 + $0x108] sm:$0xff]  }
 0x2e6   :  { %3515 = vmatmul.msk.f32.vlgmr.msra.gmra.mxu1 %vm39_vm0, %v3858_v26  ;;  %3486 = vmatmul.msk.f32.gmra.mxu0 %vm39_vm0, %v3831_v29  ;;  %v4136_v26 = vld [vmem:[%s6367_s5 + $0x188] sm:$0xff]   ;;  %v3874_v29 = vunpack.c.l.bf16 %v4115_v23 }
 0x2e7   :  { %1661 = vmatpush.msrb.mxu0 %v4255_v30  ;;  %v4128_v3 = vld [vmem:[%s6367_s5 + $0x148] sm:$0xff]   ;;  %v3894_v30 = vunpack.c.l.bf16 %v4120_v25 }
 0x2e8   :  { %3493 = vmatmul.msk.f32.gmra.mxu2 %vm39_vm0, %v3846_v31  ;;  %v3958_v31 = vunpack.c.l.bf16 %v4136_v26 }
 0x2e9   :  { %1662 = vmatpush.msrb.mxu0 %v4256_v28  ;;  %v4813_v47 = vpop.f32.mrf.mxu2  ;;  %v3926_v28 = vunpack.c.l.bf16 %v4128_v3 }
 0x2ea   :  { %v4259_v37 = vpop.permute.xlu1 %4258 }
 0x2eb   :  { %v4260_v39 = vunpack.i.l.bf16 %v4259_v37  ;;  %v4261_v42 = vunpack.i.h.bf16 %v4259_v37  ;;  %v3959_v37 = vunpack.c.h.bf16 %v4136_v26 }
 0x2ed   :  { %3446 = vmatmul.msk.f32.gmra.mxu3 %vm39_vm0, %v3815_v33  ;;  %1663 = vmatpush.msrb.mxu0 %v4260_v39  ;;  %v3875_v33 = vunpack.c.h.bf16 %v4115_v23  ;;  %v4116_v39 = vld [vmem:[%s6367_s5 + $0xe8] sm:$0xff]  }
 0x2ee   :  { %3516 = vmatmul.msk.f32.gmra.mxu1 %vm39_vm0, %v3859_v36  ;;  %3487 = vmatmul.msk.f32.gmra.mxu0 %vm39_vm0, %v3834_v38  ;;  %v3895_v36 = vunpack.c.h.bf16 %v4120_v25  ;;  %v3927_v38 = vunpack.c.h.bf16 %v4128_v3  ;;  %v3878_v43 = vunpack.c.l.bf16 %v4116_v39  ;;  %v3879_v48 = vunpack.c.h.bf16 %v4116_v39  ;;  %v4131_v25 = vld [vmem:[%s6367_s5 + $0x160] sm:$0xff]  }
 0x2ef   :  { %1664 = vmatpush.msrb.mxu0 %v4261_v42 }
 0x2f0   :  { %3494 = vmatmul.msk.f32.gmra.mxu2 %vm39_vm0, %v3847_v40  ;;  %v4121_v40 = vld [vmem:[%s6367_s5 + $0x110] sm:$0xff]  }
 0x2f1   :  { %v4828_v34 = vpop.f32.mrf.mxu2 }
 0x2f5   :  { %3447 = vmatmul.msk.f32.gmra.mxu3 %vm39_vm0, %v3818_v55  ;;  %v3898_v55 = vunpack.c.l.bf16 %v4121_v40 }
 0x2f6   :  { %3517 = vmatmul.msk.f32.gmra.mxu1 %vm39_vm0, %v3862_v44  ;;  %3488 = vmatmul.msk.f32.gmra.mxu0 %vm39_vm0, %v3835_v45  ;;  %v3962_v44 = vunpack.c.l.bf16 %v4137_v41  ;;  %v3930_v45 = vunpack.c.l.bf16 %v4129_v7 }
 0x2f8   :  { %3495 = vmatmul.msk.f32.gmra.mxu2 %vm39_vm0, %v3850_v46  ;;  %v4929_v46 = vpop.f32.mrf.mxu3 }
 0x2f9   :  { %v4837_v50 = vpop.f32.mrf.mxu2 }
 0x2fd   :  { %3448 = vmatmul.msk.f32.gmra.mxu3 %vm39_vm0, %v3819_v51  ;;  %v3899_v51 = vunpack.c.h.bf16 %v4121_v40 }
 0x2fe   :  { %3518 = vmatmul.msk.f32.gmra.mxu1 %vm39_vm0, %v3863_v52  ;;  %3489 = vmatmul.msk.f32.gmra.mxu0 %vm39_vm0, %v3838_v53 }
 0x300   :  { %3496 = vmatmul.msk.f32.gmra.mxu2 %vm39_vm0, %v3851_v54  ;;  %v3963_v54 = vunpack.c.h.bf16 %v4137_v41 }
 0x301   :  { %v4852_v59 = vpop.f32.mrf.mxu2 }
 0x305   :  { %3449 = vmatmul.msk.f32.gmra.mxu3 %vm39_vm0, %v3822_v60  ;;  %v4138_v60 = vld [vmem:[%s6367_s5 + $0x198] sm:$0xff]  }
 0x306   :  { %3519 = vmatmul.msk.f32.gmra.mxu1 %vm39_vm0, %v3866_v61  ;;  %3490 = vmatmul.msk.f32.gmra.mxu0 %vm39_vm0, %v3839_v62  ;;  %v4130_v62 = vld [vmem:[%s6367_s5 + $0x158] sm:$0xff]   ;;  %v3966_v6 = vunpack.c.l.bf16 %v4138_v60 }
 0x307   :  { %v3934_v8 = vunpack.c.l.bf16 %v4130_v62 }
 0x308   :  { %3497 = vmatmul.msk.f32.gmra.mxu2 %vm39_vm0, %v3854_v63 }
 0x309   :  { %v4858_v0 = vpop.f32.mrf.mxu2 }
 0x30d   :  { %3450 = vmatmul.msk.f32.gmra.mxu3 %vm39_vm0, %v3823_v21  ;;  %v3882_v21 = vunpack.c.l.bf16 %v4117_v57 }
 0x30e   :  { %3520 = vmatmul.msk.f32.gmra.mxu1 %vm39_vm0, %v3867_v1  ;;  %3491 = vmatmul.msk.f32.gmra.mxu0 %vm39_vm0, %v3842_v4  ;;  %v3902_v1 = vunpack.c.l.bf16 %v4122_v58 }
 0x310   :  { %3498 = vmatmul.msk.f32.gmra.mxu2 %vm39_vm0, %v3855_v5 }
 0x311   :  { %v4877_v9 = vpop.f32.mrf.mxu2 }
 0x315   :  { %3547 = vmatmul.msk.f32.vlgmr.msrb.gmra.mxu3 %vm39_vm0, %v3890_v11 }
 0x316   :  { %3521 = vmatmul.msk.f32.gmra.mxu1 %vm39_vm0, %v3870_v10  ;;  %3611 = vmatmul.msk.f32.vlgmr.msrb.gmra.mxu0 %vm39_vm0, %v3954_v12  ;;  %v3903_v10 = vunpack.c.h.bf16 %v4122_v58 }
 0x318   :  { %3579 = vmatmul.msk.f32.vlgmr.msrb.gmra.mxu2 %vm39_vm0, %v3922_v14  ;;  %v3967_v14 = vunpack.c.h.bf16 %v4138_v60 }
 0x319   :  { %v4883_v35 = vpop.f32.mrf.mxu2 }
 0x31d   :  { %3548 = vmatmul.msk.f32.gmra.mxu3 %vm39_vm0, %v3891_v15  ;;  %v3935_v15 = vunpack.c.h.bf16 %v4130_v62 }
 0x31e   :  { %3522 = vmatmul.msk.f32.gmra.mxu1 %vm39_vm0, %v3871_v13  ;;  %3612 = vmatmul.msk.f32.gmra.mxu0 %vm39_vm0, %v3955_v16  ;;  %v4118_v16 = vld [vmem:[%s6367_s5 + $0xf8] sm:$0xff]  }
 0x31f   :  { %v3886_v3 = vunpack.c.l.bf16 %v4118_v16 }
 0x320   :  { %3580 = vmatmul.msk.f32.gmra.mxu2 %vm39_vm0, %v3923_v22  ;;  %v4139_v22 = vld [vmem:[%s6367_s5 + $0x1a0] sm:$0xff]  }
 0x321   :  { %v4901_v27 = vpop.f32.mrf.mxu2  ;;  %v3971_v7 = vunpack.c.h.bf16 %v4139_v22 }
 0x325   :  { %3549 = vmatmul.msk.f32.gmra.mxu3 %vm39_vm0, %v3894_v30 }
 0x326   :  { %3523 = vmatmul.msk.f32.gmra.mxu1 %vm39_vm0, %v3874_v29  ;;  %3613 = vmatmul.msk.f32.gmra.mxu0 %vm39_vm0, %v3958_v31 }
 0x328   :  { %3581 = vmatmul.msk.f32.gmra.mxu2 %vm39_vm0, %v3926_v28  ;;  %v3970_v28 = vunpack.c.l.bf16 %v4139_v22  ;;  %v4141_v22 = vld [vmem:[%s6367_s5 + $0x1b0] sm:$0xff]  }
 0x329   :  { %v4907_v32 = vpop.f32.mrf.mxu2 }
 0x32d   :  { %3550 = vmatmul.msk.f32.gmra.mxu3 %vm39_vm0, %v3895_v36  ;;  %v3938_v36 = vunpack.c.l.bf16 %v4131_v25 }
 0x32e   :  { %3524 = vmatmul.msk.f32.gmra.mxu1 %vm39_vm0, %v3875_v33  ;;  %3614 = vmatmul.msk.f32.gmra.mxu0 %vm39_vm0, %v3959_v37  ;;  %v3887_v37 = vunpack.c.h.bf16 %v4118_v16 }
 0x330   :  { %3582 = vmatmul.msk.f32.gmra.mxu2 %vm39_vm0, %v3927_v38 }
 0x331   :  { %v4925_v42 = vpop.f32.mrf.mxu2 }
 0x335   :  { %3551 = vmatmul.msk.f32.gmra.mxu3 %vm39_vm0, %v3898_v55  ;;  %v3939_v55 = vunpack.c.h.bf16 %v4131_v25  ;;  %v4133_v25 = vld [vmem:[%s6367_s5 + $0x170] sm:$0xff]  }
 0x336   :  { %3525 = vmatmul.msk.f32.gmra.mxu1 %vm39_vm0, %v3878_v43  ;;  %3615 = vmatmul.msk.f32.gmra.mxu0 %vm39_vm0, %v3962_v44  ;;  %v4124_v44 = vld [vmem:[%s6367_s5 + $0x128] sm:$0xff]  }
 0x337   :  { %v3910_v57 = vunpack.c.l.bf16 %v4124_v44 }
 0x338   :  { %3583 = vmatmul.msk.f32.gmra.mxu2 %vm39_vm0, %v3930_v45  ;;  %v4140_v45 = vld [vmem:[%s6367_s5 + $0x1a8] sm:$0xff]  }
 0x339   :  { %v3974_v62 = vunpack.c.l.bf16 %v4140_v45 }
 0x33a   :  { %v4933_v52 = vpop.f32.mrf.mxu2  ;;  %v4935_v53 = vpop.f32.mrf.mxu1 }
 0x33d   :  { %3552 = vmatmul.msk.f32.gmra.mxu3 %vm39_vm0, %v3899_v51 }
 0x33e   :  { %3526 = vmatmul.msk.f32.gmra.mxu1 %vm39_vm0, %v3879_v48  ;;  %3616 = vmatmul.msk.f32.gmra.mxu0 %vm39_vm0, %v3963_v54  ;;  %v2079_v48 = vld [vmem:[%s6368_s3 + $0x8] sm:$0xff] }
 0x33f   :  { %v4132_v54 = vld [vmem:[%s6367_s5 + $0x168] sm:$0xff]   ;;  %2098 = vmatpush.msra.mxu2 %v2079_v48 }
 0x340   :  { %3584 = vmatmul.msk.f32.gmra.mxu2 %vm39_vm0, %v3931_v56  ;;  %v714_v61 = vpop.f32.mrf.mxu3  ;;  %v3943_v16 = vunpack.c.h.bf16 %v4132_v54 }
 0x341   :  { %v4954_v63 = vadd.f32 %v4858_v0, %v714_v61 }
 0x342   :  { %v4956_v4 = vpop.f32.mrf.mxu2  ;;  %v4958_v5 = vpop.f32.mrf.mxu1 }
 0x345   :  { %3553 = vmatmul.msk.f32.gmra.mxu3 %vm39_vm0, %v3902_v1  ;;  %v3942_v1 = vunpack.c.l.bf16 %v4132_v54 }
 0x346   :  { %3527 = vmatmul.msk.f32.gmra.mxu1 %vm39_vm0, %v3882_v21  ;;  %3617 = vmatmul.msk.f32.gmra.mxu0 %vm39_vm0, %v3966_v6  ;;  %v3911_v6 = vunpack.c.h.bf16 %v4124_v44  ;;  %v2078_v44 = vld [vmem:[%s6368_s3] sm:$0xff] }
 0x347   :  { %2099 = vmatpush.msra.mxu2 %v2078_v44 }
 0x348   :  { %3585 = vmatmul.msk.f32.gmra.mxu2 %vm39_vm0, %v3934_v8  ;;  %v717_v2 = vpop.f32.mrf.mxu3 }
 0x349   :  { %v4965_v0 = vadd.f32 %v4877_v9, %v717_v2  ;;  %v4123_v9 = vld [vmem:[%s6367_s5 + $0x120] sm:$0xff]  }
 0x34a   :  { %v4967_v11 = vpop.f32.mrf.mxu2  ;;  %v4969_v12 = vpop.f32.mrf.mxu1  ;;  %v3906_v29 = vunpack.c.l.bf16 %v4123_v9  ;;  %v3907_v39 = vunpack.c.h.bf16 %v4123_v9  ;;  %v4125_v9 = vld [vmem:[%s6367_s5 + $0x130] sm:$0xff]  }
 0x34b   :  { %v4971_v13 = vpop.f32.mrf.mxu0 }
 0x34d   :  { %3554 = vmatmul.msk.f32.gmra.mxu3 %vm39_vm0, %v3903_v10 }
 0x34e   :  { %3528 = vmatmul.msk.f32.gmra.mxu1 %vm39_vm0, %v3883_v49  ;;  %3618 = vmatmul.msk.f32.gmra.mxu0 %vm39_vm0, %v3967_v14  ;;  %v3975_v14 = vunpack.c.h.bf16 %v4140_v45  ;;  %v3915_v45 = vunpack.c.h.bf16 %v4125_v9 }
 0x350   :  { %3586 = vmatmul.msk.f32.gmra.mxu2 %vm39_vm0, %v3935_v15  ;;  %v720_v23 = vpop.f32.mrf.mxu3 }
 0x351   :  { %v4990_v26 = vadd.f32 %v4883_v35, %v720_v23 }
 0x352   :  { %v4992_v30 = vpop.f32.mrf.mxu2  ;;  %v4994_v31 = vpop.f32.mrf.mxu1 }
 0x353   :  { %v4996_v33 = vpop.f32.mrf.mxu0 }
 0x355   :  { %3555 = vmatmul.msk.f32.gmra.mxu3 %vm39_vm0, %v3906_v29  ;;  %v3914_v29 = vunpack.c.l.bf16 %v4125_v9 }
 0x356   :  { %3529 = vmatmul.msk.f32.gmra.mxu1 %vm39_vm0, %v3886_v3  ;;  %3619 = vmatmul.msk.f32.gmra.mxu0 %vm39_vm0, %v3970_v28 }
 0x358   :  { %3587 = vmatmul.msk.f32.gmra.mxu2 %vm39_vm0, %v3938_v36  ;;  %v723_v35 = vpop.f32.mrf.mxu3 }
 0x359   :  { %v5003_v38 = vadd.f32 %v4901_v27, %v723_v35  ;;  %v4143_v27 = vld [vmem:[%s6367_s5 + $0x1c0] sm:$0xff]  }
 0x35a   :  { %v5005_v40 = vpop.f32.mrf.mxu2  ;;  %v3986_v58 = vunpack.c.l.bf16 %v4143_v27  ;;  %v3987_v2 = vunpack.c.h.bf16 %v4143_v27 }
 0x35b   :  { %v5007_v41 = vpop.f32.mrf.mxu1  ;;  %v5009_v43 = vpop.f32.mrf.mxu0 }
 0x35d   :  { %3556 = vmatmul.msk.f32.gmra.mxu3 %vm39_vm0, %v3907_v39 }
 0x35e   :  { %3530 = vmatmul.msk.f32.gmra.mxu1 %vm39_vm0, %v3887_v37  ;;  %3620 = vmatmul.msk.f32.gmra.mxu0 %vm39_vm0, %v3971_v7  ;;  %v3978_v37 = vunpack.c.l.bf16 %v4141_v22 }
 0x360   :  { %3588 = vmatmul.msk.f32.gmra.mxu2 %vm39_vm0, %v3939_v55  ;;  %v726_v51 = vpop.f32.mrf.mxu3  ;;  %v3946_v55 = vunpack.c.l.bf16 %v4133_v25 }
 0x361   :  { %v5031_v56 = vadd.f32 %v4907_v32, %v726_v51 }
 0x363   :  { %v5033_v60 = vpop.f32.mrf.mxu2  ;;  %v5035_v61 = vpop.f32.mrf.mxu1 }
 0x364   :  { %v5037_v21 = vpop.f32.mrf.mxu0 }
 0x365   :  { %3557 = vmatmul.msk.f32.gmra.mxu3 %vm39_vm0, %v3910_v57  ;;  %v3979_v57 = vunpack.c.h.bf16 %v4141_v22 }
 0x366   :  { %3643 = vmatmul.msk.f32.vlgmr.msrb.gmra.mxu1 %vm39_vm0, %v3986_v58  ;;  %3621 = vmatmul.msk.f32.gmra.mxu0 %vm39_vm0, %v3974_v62 }
 0x368   :  { %3589 = vmatmul.msk.f32.gmra.mxu2 %vm39_vm0, %v3942_v1  ;;  %v729_v32 = vpop.f32.mrf.mxu3  ;;  %v3947_v1 = vunpack.c.h.bf16 %v4133_v25 }
 0x369   :  { %v5044_v8 = vadd.f32 %v4925_v42, %v729_v32  ;;  %v4144_v42 = vld [vmem:[%s6367_s5 + $0x1c8] sm:$0xff]   ;;  %v4126_v32 = vld [vmem:[%s6367_s5 + $0x138] sm:$0xff]  }
 0x36a   :  { %v3990_v28 = vunpack.c.l.bf16 %v4144_v42  ;;  %v3991_v48 = vunpack.c.h.bf16 %v4144_v42  ;;  %v3918_v9 = vunpack.c.l.bf16 %v4126_v32 }
 0x36b   :  { %v5046_v49 = vpop.f32.mrf.mxu2  ;;  %v5048_v10 = vpop.f32.mrf.mxu1 }
 0x36c   :  { %v5050_v15 = vpop.f32.mrf.mxu0 }
 0x36d   :  { %3558 = vmatmul.msk.f32.gmra.mxu3 %vm39_vm0, %v3911_v6  ;;  %v4142_v6 = vld [vmem:[%s6367_s5 + $0x1b8] sm:$0xff]  }
 0x36e   :  { %3644 = vmatmul.msk.f32.gmra.mxu1 %vm39_vm0, %v3987_v2  ;;  %3622 = vmatmul.msk.f32.gmra.mxu0 %vm39_vm0, %v3975_v14  ;;  %v4134_v14 = vld [vmem:[%s6367_s5 + $0x178] sm:$0xff]   ;;  %v3982_v25 = vunpack.c.l.bf16 %v4142_v6 }
 0x370   :  { %3590 = vmatmul.msk.f32.gmra.mxu2 %vm39_vm0, %v3943_v16  ;;  %v732_v23 = vpop.f32.mrf.mxu3 }
 0x371   :  { %v846_v3 = vadd.f32 %v4933_v52, %v732_v23 }
 0x373   :  { %v1003_v36 = vpop.f32.mrf.mxu2  ;;  %v5069_v35 = vpop.f32.mrf.mxu1 }
 0x374   :  { %v5071_v39 = vadd.f32 %v1003_v36, %v846_v3  ;;  %v5073_v7 = vpop.f32.mrf.mxu0 }
 0x375   :  { %3559 = vmatmul.msk.f32.gmra.mxu3 %vm39_vm0, %v3914_v29 }
 0x376   :  { %3645 = vmatmul.msk.f32.gmra.mxu1 %vm39_vm0, %v3990_v28  ;;  %3623 = vmatmul.msk.f32.gmra.mxu0 %vm39_vm0, %v3978_v37  ;;  %v3950_v28 = vunpack.c.l.bf16 %v4134_v14  ;;  %v3919_v37 = vunpack.c.h.bf16 %v4126_v32 }
 0x378   :  { %3591 = vmatmul.msk.f32.gmra.mxu2 %vm39_vm0, %v3946_v55  ;;  %v735_v52 = vpop.f32.mrf.mxu3 }
 0x379   :  { %v849_v27 = vadd.f32 %v4956_v4, %v735_v52  ;;  %v4145_v4 = vld [vmem:[%s6367_s5 + $0x1d0] sm:$0xff]  }
 0x37a   :  { %v3994_v42 = vunpack.c.l.bf16 %v4145_v4  ;;  %v3995_v55 = vunpack.c.h.bf16 %v4145_v4 }
 0x37b   :  { %v1006_v51 = vpop.f32.mrf.mxu2  ;;  %v5083_v54 = vpop.f32.mrf.mxu1 }
 0x37c   :  { %v5085_v58 = vadd.f32 %v1006_v51, %v849_v27  ;;  %v5087_v62 = vpop.f32.mrf.mxu0  ;;  %v3983_v27 = vunpack.c.h.bf16 %v4142_v6  ;;  %v3951_v51 = vunpack.c.h.bf16 %v4134_v14 }
 0x37d   :  { %3560 = vmatmul.msk.f32.gmra.mxu3 %vm39_vm0, %v3915_v45 }
 0x37e   :  { %3646 = vmatmul.msk.f32.gmra.mxu1 %vm39_vm0, %v3991_v48  ;;  %3624 = vmatmul.msk.f32.gmra.mxu0 %vm39_vm0, %v3979_v57  ;;  %v4146_v57 = vld [vmem:[%s6367_s5 + $0x1d8] sm:$0xff]  }
 0x37f   :  { %v3998_v4 = vunpack.c.l.bf16 %v4146_v57 }
 0x380   :  { %3592 = vmatmul.msk.f32.gmra.mxu2 %vm39_vm0, %v3947_v1  ;;  %v738_v2 = vpop.f32.mrf.mxu3 }
 0x381   :  { %v852_v16 = vadd.f32 %v4967_v11, %v738_v2 }
 0x383   :  { %v1009_v22 = vpop.f32.mrf.mxu2  ;;  %v5106_v23 = vpop.f32.mrf.mxu1 }
 0x384   :  { %v5108_v3 = vadd.f32 %v1009_v22, %v852_v16  ;;  %v5110_v29 = vpop.f32.mrf.mxu0  ;;  %v813_v16 = vadd.f32 %v4803_v24, %v4935_v53 }
 0x385   :  { %3561 = vmatmul.msk.f32.gmra.mxu3 %vm39_vm0, %v3918_v9 }
 0x386   :  { %3647 = vmatmul.msk.f32.gmra.mxu1 %vm39_vm0, %v3994_v42  ;;  %3625 = vmatmul.msk.f32.gmra.mxu0 %vm39_vm0, %v3982_v25  ;;  %v1018_v22 = vadd.f32 %v4971_v13, %v813_v16  ;;  %v2081_v25 = vpop.permute.xlu0 %2080 }
 0x388   :  { %3593 = vmatmul.msk.f32.gmra.mxu2 %vm39_vm0, %v3950_v28  ;;  %v741_v11 = vpop.f32.mrf.mxu3 }
 0x389   :  { %v855_v36 = vadd.f32 %v4992_v30, %v741_v11  ;;  %v4151_v30 = vld [vmem:[%s6367_s5 + $0x200] sm:$0xff]  }
 0x38a   :  { %v4018_v6 = vunpack.c.l.bf16 %v4151_v30 }
 0x38b   :  { %v1012_v44 = vpop.f32.mrf.mxu2  ;;  %v5117_v52 = vpop.f32.mrf.mxu1 }
 0x38c   :  { %v5119_v45 = vadd.f32 %v1012_v44, %v855_v36  ;;  %v5121_v48 = vpop.f32.mrf.mxu0  ;;  %v3999_v36 = vunpack.c.h.bf16 %v4146_v57 }
 0x38d   :  { %3562 = vmatmul.msk.f32.gmra.mxu3 %vm39_vm0, %v3919_v37  ;;  %v4019_v37 = vunpack.c.h.bf16 %v4151_v30 }
 0x38e   :  { %3648 = vmatmul.msk.f32.gmra.mxu1 %vm39_vm0, %v3995_v55  ;;  %3626 = vmatmul.msk.f32.gmra.mxu0 %vm39_vm0, %v3983_v27  ;;  %v816_v55 = vadd.f32 %v4813_v47, %v4958_v5 }
 0x390   :  { %3594 = vmatmul.msk.f32.gmra.mxu2 %vm39_vm0, %v3951_v51  ;;  %v744_v1 = vpop.f32.mrf.mxu3  ;;  %v1019_v27 = vadd.f32 %v4996_v33, %v816_v55  ;;  %v4152_v51 = vld [vmem:[%s6367_s5 + $0x208] sm:$0xff]   ;;  %v1028_v55 = vadd.f32 %v5046_v49, %v5044_v8 }
 0x391   :  { %v858_v32 = vadd.f32 %v5005_v40, %v744_v1  ;;  %v1192_v40 = vadd.f32 %v5035_v61, %v1018_v22  ;;  %v4147_v61 = vld [vmem:[%s6367_s5 + $0x1e0] sm:$0xff]   ;;  %v4022_v1 = vunpack.c.l.bf16 %v4152_v51 }
 0x392   :  { %v1193_v47 = vadd.f32 %v5048_v10, %v1019_v27  ;;  %v4002_v30 = vunpack.c.l.bf16 %v4147_v61 }
 0x393   :  { %v1015_v2 = vpop.f32.mrf.mxu2  ;;  %v5134_v14 = vpop.f32.mrf.mxu1 }
 0x394   :  { %v5138_v9 = vadd.f32 %v1015_v2, %v858_v32  ;;  %v5140_v42 = vpop.f32.mrf.mxu0 }
 0x395   :  { %3675 = vmatmul.msk.f32.vlgmr.msra.gmra.mxu3 %vm39_vm0, %v4018_v6 }
 0x396   :  { %3649 = vmatmul.msk.f32.gmra.mxu1 %vm39_vm0, %v3998_v4  ;;  %v819_v4 = vadd.f32 %v4828_v34, %v4969_v12 }
 0x398   :  { %3691 = vmatmul.msk.f32.vlgmr.msra.gmra.mxu2 %vm240_vm1, %v2081_v25  ;;  %v1318_v28 = vpop.f32.mrf.mxu3  ;;  %v1020_v16 = vadd.f32 %v5009_v43, %v819_v4  ;;  %v1027_v25 = vadd.f32 %v5033_v60, %v5031_v56  ;;  %v4148_v56 = vld [vmem:[%s6367_s5 + $0x1e8] sm:$0xff]  }
 0x399   :  { %v1366_v11 = vadd.f32 %v1318_v28, %v1192_v40  ;;  %v4003_v28 = vunpack.c.h.bf16 %v4147_v61  ;;  %v4007_v4 = vunpack.c.h.bf16 %v4148_v56 }
 0x39a   :  { %v1194_v10 = vadd.f32 %v5069_v35, %v1020_v16 }
 0x39b   :  { %v1492_v24 = vpop.f32.mrf.mxu2  ;;  %v5147_v53 = vpop.f32.mrf.mxu1 }
 0x39c   :  { %v5151_v13 = vadd.f32 %v1492_v24, %v1366_v11  ;;  %v5153_v44 = vpop.f32.mrf.mxu0  ;;  %v4023_v11 = vunpack.c.h.bf16 %v4152_v51 }
 0x39d   :  { %3676 = vmatmul.msk.f32.gmra.mxu3 %vm39_vm0, %v4019_v37 }
 0x39e   :  { %3650 = vmatmul.msk.f32.gmra.mxu1 %vm39_vm0, %v3999_v36  ;;  %v822_v36 = vadd.f32 %v4837_v50, %v4994_v31  ;;  %v4153_v50 = vld [vmem:[%s6367_s5 + $0x210] sm:$0xff]  }
 0x39f   :  { %v4026_v61 = vunpack.c.l.bf16 %v4153_v50  ;;  %v4027_v16 = vunpack.c.h.bf16 %v4153_v50  ;;  %v1024_v50 = vadd.f32 %v5087_v62, %v4965_v0  ;;  %v1025_v0 = vadd.f32 %v5110_v29, %v4990_v26  ;;  %v4150_v62 = vld [vmem:[%s6367_s5 + $0x1f8] sm:$0xff]  }
 0x3a0   :  { %v1321_v5 = vpop.f32.mrf.mxu3  ;;  %v1021_v35 = vadd.f32 %v5037_v21, %v822_v36  ;;  %v4006_v21 = vunpack.c.l.bf16 %v4148_v56 }
 0x3a1   :  { %v1367_v57 = vadd.f32 %v1321_v5, %v1193_v47  ;;  %v825_v5 = vadd.f32 %v4852_v59, %v5007_v41 }
 0x3a2   :  { %v1195_v31 = vadd.f32 %v5083_v54, %v1021_v35 }
 0x3a3   :  { %v1495_v32 = vpop.f32.mrf.mxu2  ;;  %v5165_v33 = vpop.f32.mrf.mxu1  ;;  %v1022_v54 = vadd.f32 %v5050_v15, %v825_v5  ;;  %v1023_v15 = vadd.f32 %v5073_v7, %v4954_v63 }
 0x3a4   :  { %v5169_v6 = vadd.f32 %v1495_v32, %v1367_v57  ;;  %v5171_v2 = vpop.f32.mrf.mxu0 }
 0x3a5   :  { %3677 = vmatmul.msk.f32.gmra.mxu3 %vm39_vm0, %v4022_v1  ;;  %v1196_v8 = vadd.f32 %v5106_v23, %v1022_v54  ;;  %v4149_v23 = vld [vmem:[%s6367_s5 + $0x1f0] sm:$0xff]  }
 0x3a6   :  { %3651 = vmatmul.msk.f32.gmra.mxu1 %vm39_vm0, %v4002_v30 }
 0x3a8   :  { %v1324_v22 = vpop.f32.mrf.mxu3 }
 0x3a9   :  { %v1368_v40 = vadd.f32 %v1324_v22, %v1194_v10 }
 0x3ab   :  { %v1498_v34 = vpop.f32.mrf.mxu2  ;;  %v1171_v12 = vpop.f32.mrf.mxu1 }
 0x3ac   :  { %v5181_v37 = vadd.f32 %v1498_v34, %v1368_v40  ;;  %v5183_v43 = vadd.f32 %v1171_v12, %v1027_v25  ;;  %v5185_v24 = vpop.f32.mrf.mxu0  ;;  %v4154_v40 = vld [vmem:[%s6367_s5 + $0x218] sm:$0xff]   ;;  %v4010_v34 = vunpack.c.l.bf16 %v4149_v23 }
 0x3ad   :  { %3678 = vmatmul.msk.f32.gmra.mxu3 %vm39_vm0, %v4023_v11  ;;  %v4030_v12 = vunpack.c.l.bf16 %v4154_v40 }
 0x3ae   :  { %3652 = vmatmul.msk.f32.gmra.mxu1 %vm39_vm0, %v4003_v28 }
 0x3b0   :  { %v1327_v60 = vpop.f32.mrf.mxu3 }
 0x3b1   :  { %v1369_v27 = vadd.f32 %v1327_v60, %v1195_v31 }
 0x3b3   :  { %v1501_v51 = vpop.f32.mrf.mxu2  ;;  %v1174_v47 = vpop.f32.mrf.mxu1 }
 0x3b4   :  { %v5201_v57 = vadd.f32 %v1501_v51, %v1369_v27  ;;  %v5203_v30 = vadd.f32 %v1174_v47, %v1028_v55  ;;  %v5205_v1 = vpop.f32.mrf.mxu0  ;;  %v4011_v55 = vunpack.c.h.bf16 %v4149_v23  ;;  %v4031_v27 = vunpack.c.h.bf16 %v4154_v40 }
 0x3b5   :  { %3679 = vmatmul.msk.f32.gmra.mxu3 %vm39_vm0, %v4026_v61  ;;  %v4015_v23 = vunpack.c.h.bf16 %v4150_v62 }
 0x3b6   :  { %3653 = vmatmul.msk.f32.gmra.mxu1 %vm39_vm0, %v4006_v21 }
 0x3b8   :  { %v1330_v49 = vpop.f32.mrf.mxu3 }
 0x3b9   :  { %v1370_v32 = vadd.f32 %v1330_v49, %v1196_v8  ;;  %v4014_v8 = vunpack.c.l.bf16 %v4150_v62 }
 0x3bb   :  { %v1504_v10 = vpop.f32.mrf.mxu2  ;;  %v1177_v59 = vpop.f32.mrf.mxu1 }
 0x3bc   :  { %v5211_v41 = vadd.f32 %v1504_v10, %v1370_v32  ;;  %v5214_v22 = vadd.f32 %v1177_v59, %v5071_v39  ;;  %v5216_v25 = vpop.f32.mrf.mxu0  ;;  %v1197_v39 = vadd.f32 %v5117_v52, %v1023_v15  ;;  %v1198_v52 = vadd.f32 %v5134_v14, %v1024_v50  ;;  %v4155_v14 = vld [vmem:[%s6367_s5 + $0x220] sm:$0xff]  }
 0x3bd   :  { %3680 = vmatmul.msk.f32.gmra.mxu3 %vm39_vm0, %v4027_v16  ;;  %v4034_v49 = vunpack.c.l.bf16 %v4155_v14  ;;  %v1026_v10 = vadd.f32 %v5121_v48, %v5003_v38  ;;  %v4035_v40 = vunpack.c.h.bf16 %v4155_v14  ;;  %v4156_v38 = vld [vmem:[%s6367_s5 + $0x228] sm:$0xff]  }
 0x3be   :  { %3654 = vmatmul.msk.f32.gmra.mxu1 %vm39_vm0, %v4007_v4 }
 0x3c0   :  { %v1333_v28 = vpop.f32.mrf.mxu3 }
 0x3c1   :  { %v1371_v11 = vadd.f32 %v1333_v28, %v1197_v39 }
 0x3c3   :  { %v1507_v36 = vpop.f32.mrf.mxu2  ;;  %v1180_v63 = vpop.f32.mrf.mxu1 }
 0x3c4   :  { %v5229_v7 = vadd.f32 %v1507_v36, %v1371_v11  ;;  %v5232_v35 = vadd.f32 %v1180_v63, %v5085_v58  ;;  %v5234_v56 = vpop.f32.mrf.mxu0 }
 0x3c5   :  { %3681 = vmatmul.msk.f32.gmra.mxu3 %vm39_vm0, %v4030_v12  ;;  %v4038_v12 = vunpack.c.l.bf16 %v4156_v38 }
 0x3c6   :  { %3655 = vmatmul.msk.f32.gmra.mxu1 %vm39_vm0, %v4010_v34 }
 0x3c8   :  { %v1336_v31 = vpop.f32.mrf.mxu3 }
 0x3c9   :  { %v1372_v60 = vadd.f32 %v1336_v31, %v1198_v52 }
 0x3cb   :  { %v1510_v21 = vpop.f32.mrf.mxu2  ;;  %v1183_v61 = vpop.f32.mrf.mxu1 }
 0x3cc   :  { %v5241_v51 = vadd.f32 %v1510_v21, %v1372_v60  ;;  %v5244_v58 = vadd.f32 %v1183_v61, %v5108_v3  ;;  %v5246_v47 = vpop.f32.mrf.mxu0  ;;  %v1199_v3 = vadd.f32 %v5147_v53, %v1025_v0  ;;  %v1200_v53 = vadd.f32 %v5165_v33, %v1026_v10  ;;  %v4157_v61 = vld [vmem:[%s6367_s5 + $0x230] sm:$0xff]  }
 0x3cd   :  { %3682 = vmatmul.msk.f32.gmra.mxu3 %vm39_vm0, %v4031_v27  ;;  %v4039_v60 = vunpack.c.h.bf16 %v4156_v38  ;;  %v4042_v14 = vunpack.c.l.bf16 %v4157_v61 }
 0x3ce   :  { %3656 = vmatmul.msk.f32.gmra.mxu1 %vm39_vm0, %v4011_v55 }
 0x3d0   :  { %v1339_v5 = vpop.f32.mrf.mxu3 }
 0x3d1   :  { %v1373_v54 = vadd.f32 %v1339_v5, %v1199_v3 }
 0x3d3   :  { %v1513_v32 = vpop.f32.mrf.mxu2  ;;  %v1186_v26 = vpop.f32.mrf.mxu1 }
 0x3d4   :  { %v5259_v29 = vadd.f32 %v1513_v32, %v1373_v54  ;;  %v1206_v4 = vadd.f32 %v1186_v26, %v5119_v45  ;;  %v5262_v16 = vpop.f32.mrf.mxu0  ;;  %v4043_v32 = vunpack.c.h.bf16 %v4157_v61 }
 0x3d5   :  { %3683 = vmatmul.msk.f32.gmra.mxu3 %vm39_vm0, %v4034_v49 }
 0x3d6   :  { %3657 = vmatmul.msk.f32.gmra.mxu1 %vm39_vm0, %v4014_v8 }
 0x3d8   :  { %v1342_v59 = vpop.f32.mrf.mxu3 }
 0x3d9   :  { %v1374_v15 = vadd.f32 %v1342_v59, %v1200_v53 }
 0x3db   :  { %v1516_v39 = vpop.f32.mrf.mxu2  ;;  %v1189_v28 = vpop.f32.mrf.mxu1 }
 0x3dc   :  { %v5269_v11 = vadd.f32 %v1516_v39, %v1374_v15  ;;  %v1207_v45 = vadd.f32 %v1189_v28, %v5138_v9  ;;  %v5272_v34 = vpop.f32.mrf.mxu0 }
 0x3dd   :  { %3684 = vmatmul.msk.f32.gmra.mxu3 %vm39_vm0, %v4035_v40 }
 0x3de   :  { %3658 = vmatmul.msk.f32.gmra.mxu1 %vm39_vm0, %v4015_v23 }
 0x3e0   :  { %v1345_v48 = vpop.f32.mrf.mxu3 }
 0x3e1   :  { %v1375_v33 = vadd.f32 %v1345_v48, %v5183_v43 }
 0x3e3   :  { %v1519_v36 = vpop.f32.mrf.mxu2  ;;  %v5280_v63 = vpop.f32.mrf.mxu1 }
 0x3e4   :  { %v5282_v50 = vadd.f32 %v1519_v36, %v1375_v33  ;;  %v5284_v9 = vpop.f32.mrf.mxu0 }
 0x3e5   :  { %3685 = vmatmul.msk.f32.gmra.mxu3 %vm39_vm0, %v4038_v12 }
 0x3e8   :  { %v1348_v52 = vpop.f32.mrf.mxu3 }
 0x3e9   :  { %v1376_v31 = vadd.f32 %v1348_v52, %v5203_v30 }
 0x3eb   :  { %v1522_v55 = vpop.f32.mrf.mxu2  ;;  %v5288_v27 = vpop.f32.mrf.mxu1 }
 0x3ec   :  { %v5290_v21 = vadd.f32 %v1522_v55, %v1376_v31  ;;  %v5292_v43 = vpop.f32.mrf.mxu0 }
 0x3ed   :  { %3686 = vmatmul.msk.f32.gmra.mxu3 %vm39_vm0, %v4039_v60 }
 0x3f0   :  { %v1351_v0 = vpop.f32.mrf.mxu3 }
 0x3f1   :  { %v1377_v62 = vadd.f32 %v1351_v0, %v5214_v22  ;;  %v4158_v22 = vld [vmem:[%s6367_s5 + $0x238] sm:$0xff]  }
 0x3f2   :  { %v4046_v40 = vunpack.c.l.bf16 %v4158_v22  ;;  %v4047_v12 = vunpack.c.h.bf16 %v4158_v22 }
 0x3f3   :  { %v1525_v3 = vpop.f32.mrf.mxu2  ;;  %v1846_v30 = vpop.f32.mrf.mxu1 }
 0x3f4   :  { %v5299_v5 = vadd.f32 %v1525_v3, %v1377_v62  ;;  %v5302_v54 = vpop.f32.mrf.mxu0 }
 0x3f5   :  { %3687 = vmatmul.msk.f32.gmra.mxu3 %vm39_vm0, %v4042_v14 }
 0x3f8   :  { %v1354_v8 = vpop.f32.mrf.mxu3 }
 0x3f9   :  { %v1378_v49 = vadd.f32 %v1354_v8, %v5232_v35 }
 0x3fb   :  { %v1528_v26 = vpop.f32.mrf.mxu2  ;;  %v1849_v10 = vpop.f32.mrf.mxu1 }
 0x3fc   :  { %v5305_v53 = vadd.f32 %v1528_v26, %v1378_v49  ;;  %v5311_v59 = vpop.f32.mrf.mxu0 }
 0x3fd   :  { %3688 = vmatmul.msk.f32.gmra.mxu3 %vm39_vm0, %v4043_v32 }
 0x400   :  { %v1357_v15 = vpop.f32.mrf.mxu3 }
 0x401   :  { %v1379_v23 = vadd.f32 %v1357_v15, %v5244_v58 }
 0x403   :  { %v1531_v39 = vpop.f32.mrf.mxu2  ;;  %v5314_v28 = vpop.f32.mrf.mxu1 }
 0x404   :  { %v5316_v35 = vadd.f32 %v1531_v39, %v1379_v23  ;;  %v1708_v33 = vpop.f32.mrf.mxu0 }
 0x405   :  { %3689 = vmatmul.msk.f32.gmra.mxu3 %vm39_vm0, %v4046_v40 }
 0x408   :  { %v1360_v38 = vpop.f32.mrf.mxu3 }
 0x409   :  { %v1380_v48 = vadd.f32 %v1360_v38, %v1206_v4  ;;  %v1714_v38 = vadd.f32 %v5140_v42, %v5151_v13 }
 0x40b   :  { %v1534_v36 = vpop.f32.mrf.mxu2  ;;  %v5319_v52 = vpop.f32.mrf.mxu1 }
 0x40c   :  { %v1554_v31 = vadd.f32 %v1534_v36, %v1380_v48  ;;  %v1715_v48 = vadd.f32 %v5153_v44, %v5169_v6 }
 0x40d   :  { %3690 = vmatmul.msk.f32.gmra.mxu3 %vm39_vm0, %v4047_v12  ;;  %v1717_v12 = vadd.f32 %v5185_v24, %v5201_v57 }
 0x40e   :  { %v5321_v60 = vadd.f32 %v1708_v33, %v1554_v31  ;;  %v1716_v33 = vadd.f32 %v5171_v2, %v5181_v37  ;;  %v1888_v31 = vadd.f32 %v5280_v63, %v1714_v38  ;;  %v2133_v2 = vld [vmem:[%s6368_s3 + $0x20] sm:$0xff]  ;;  %v2134_v37 = vld [vmem:[%s6368_s3 + $0x28] sm:$0xff] }
 0x410   :  { %v1363_v58 = vpop.f32.mrf.mxu3 }
 0x411   :  { %v1381_v55 = vadd.f32 %v1363_v58, %v1207_v45  ;;  %v1889_v58 = vadd.f32 %v5288_v27, %v1715_v48 }
 0x413   :  { %v1537_v61 = vpop.f32.mrf.mxu2  ;;  %v5324_v0 = vpop.f32.mrf.mxu1 }
 0x414   :  { %v5326_v62 = vadd.f32 %v1537_v61, %v1381_v55  ;;  %v1890_v55 = vadd.f32 %v1846_v30, %v1716_v33  ;;  %v1891_v61 = vadd.f32 %v1849_v10, %v1717_v12  ;;  %v2132_v10 = vld [vmem:[%s6368_s3 + $0x18] sm:$0xff] }
 0x418   :  { %v2014_v14 = vpop.f32.mrf.mxu3 }
 0x419   :  { %v2062_v42 = vadd.f32 %v2014_v14, %v1888_v31  ;;  %v2135_v14 = vld [vmem:[%s6368_s3 + $0x30] sm:$0xff] }
 0x41b   :  { %v2101_v3 = vpop.f32.mrf.mxu2  ;;  %v5328_v4 = vpop.f32.mrf.mxu1 }
 0x41c   :  { %v2102_v8 = vadd.f32 1e-08, %v2101_v3 }
 0x41e   :  { %4277 = vrsqrt.f32 %v2102_v8  ;;  %vm2110_vm10 = vweird.f32 %v2102_v8 }
 0x420   :  { %v2017_v49 = vpop.f32.mrf.mxu3 }
 0x421   :  { %v2063_v44 = vadd.f32 %v2017_v49, %v1889_v58 }
 0x423   :  { %v5330_v32 = vpop.f32.mrf.mxu1 }
 0x424   :  { %v4278_v26 = vpop.eup %4277 }
 0x425   :  { %v2105_v22 = vmul.f32 %v4278_v26, %v2102_v8  ;;  %vm2111_vm9 = vweird.f32 %v4278_v26 }
 0x426   :  { %vm2112_vm11 = vmor %vm2110_vm10, %vm2111_vm9 }
 0x427   :  { %v2106_v15 = vmul.f32 %v4278_v26, %v2105_v22 }
 0x428   :  { %v2020_v40 = vpop.f32.mrf.mxu3 }
 0x429   :  { %v2107_v23 = vmul.f32 0.5, %v2106_v15  ;;  %v2064_v6 = vadd.f32 %v2020_v40, %v1890_v55  ;;  %v1718_v15 = vadd.f32 %v5205_v1, %v5211_v41 }
 0x42b   :  { %v2108_v45 = vsub.f32 1.5, %v2107_v23  ;;  %v5332_v39 = vpop.f32.mrf.mxu1  ;;  %v1892_v48 = vadd.f32 %v5314_v28, %v1718_v15  ;;  %v2136_v28 = vld [vmem:[%s6368_s3 + $0x38] sm:$0xff] }
 0x42d   :  { %v2109_v36 = vmul.f32 %v4278_v26, %v2108_v45 }
 0x42f   :  { %v5344_v3 = vsel %vm2112_vm11, %v4278_v26, %v2109_v36 }
 0x430   :  { %v5347_v13 = vperm.slane %v5344_v3, 0  ;;  %v2023_v24 = vpop.f32.mrf.mxu3 }
 0x431   :  { %v2065_v27 = vadd.f32 %v2023_v24, %v1891_v61 }
 0x432   :  { %v2117_v57 = vmul.f32 %v5347_v13, %v2063_v44  ;;  %v2118_v63 = vmul.f32 %v5347_v13, %v2064_v6  ;;  %v2116_v30 = vmul.f32 %v5347_v13, %v2062_v42 }
 0x433   :  { %v5364_v8 = vpop.f32.mrf.mxu1  ;;  %v2119_v22 = vmul.f32 %v5347_v13, %v2065_v27 }
 0x434   :  { %v2149_v49 = vadd.f32 %v2133_v2, %v2117_v57  ;;  %v2150_v26 = vadd.f32 %v2134_v37, %v2118_v63  ;;  %v2148_v23 = vadd.f32 %v2132_v10, %v2116_v30  ;;  %v5375_v37 = vpop.permute.xlu1 %2260 }
 0x435   :  { %v2151_v38 = vadd.f32 %v2135_v14, %v2119_v22  ;;  %v1719_v14 = vadd.f32 %v5216_v25, %v5229_v7 }
 0x436   :  { %v2165_v40 = vmul.f32 1.4142135, %v2149_v49  ;;  %v2166_v45 = vmul.f32 1.4142135, %v2150_v26  ;;  %v2164_v33 = vmul.f32 1.4142135, %v2148_v23 }
 0x437   :  { %v2167_v31 = vmul.f32 1.4142135, %v2151_v38 }
 0x438   :  { %vm2181_vm12 = vcmp.ge.f32.partialorder %v2165_v40, 0.0  ;;  %v2197_v12 = vmul.f32 0.2, %v2165_v40  ;;  %vm2182_vm13 = vcmp.ge.f32.partialorder %v2166_v45, 0.0  ;;  %v2198_v36 = vmul.f32 0.2, %v2166_v45  ;;  %v2026_v58 = vpop.f32.mrf.mxu3 }
 0x439   :  { %vm2180_vm14 = vcmp.ge.f32.partialorder %v2164_v33, 0.0  ;;  %v2196_v55 = vmul.f32 0.2, %v2164_v33  ;;  %v2066_v44 = vadd.f32 %v2026_v58, %v1892_v48  ;;  %vm2183_vm15 = vcmp.ge.f32.partialorder %v2167_v31, 0.0  ;;  %v2137_v58 = vld [vmem:[%s6368_s3 + $0x40] sm:$0xff] }
 0x43a   :  { %v2213_v61 = vsel %vm2181_vm12, %v2165_v40, %v2197_v12  ;;  %v2214_v42 = vsel %vm2182_vm13, %v2166_v45, %v2198_v36  ;;  %v2199_v41 = vmul.f32 0.2, %v2167_v31  ;;  %v1893_v45 = vadd.f32 %v5319_v52, %v1719_v14 }
 0x43b   :  { %v3693_v6 = vclamps-f32 %v2213_v61, 256.0  ;;  %v3694_v1 = vclamps-f32 %v2214_v42, 256.0  ;;  %v5373_v2 = vpop.f32.mrf.mxu1  ;;  %v2120_v24 = vmul.f32 %v5347_v13, %v2066_v44  ;;  %v2212_v57 = vsel %vm2180_vm14, %v2164_v33, %v2196_v55 }
 0x43c   :  { %v2215_v30 = vsel %vm2183_vm15, %v2167_v31, %v2199_v41  ;;  %v3692_v10 = vclamps-f32 %v2212_v57, 256.0 }
 0x43d   :  { %v5379_v63 = vmul.f32 %v3693_v6, %v5375_v37  ;;  %v5382_v27 = vmul.f32 %v3694_v1, %v5375_v37  ;;  %v3695_v49 = vclamps-f32 %v2215_v30, 256.0  ;;  %v2152_v26 = vadd.f32 %v2136_v28, %v2120_v24 }
 0x43e   :  { %v5387_v22 = vmul.f32 %v3692_v10, %v5375_v37  ;;  %v1720_v24 = vadd.f32 %v5234_v56, %v5241_v51 }
 0x43f   :  { %2398 = vrot.lane.b32.xlu1 %v5379_v63, %s4292_s28  ;;  %v2347_v15 = vrot.slane %v5379_v63, 1  ;;  %v2315_v23 = vrot.slane %v5379_v63, 7  ;;  %v2348_v40 = vrot.slane %v5382_v27, 1  ;;  %v5396_v38 = vmul.f32 %v3695_v49, %v5375_v37 }
 0x440   :  { %v2168_v25 = vmul.f32 1.4142135, %v2152_v26  ;;  %v2316_v7 = vrot.slane %v5382_v27, 7  ;;  %2396 = vrot.lane.b32.xlu2 %v5387_v22, %s4292_s28  ;;  %2570 = vrot.lane.b32.xlu0 %v5387_v22, %s4284_s23  ;;  %v2029_v48 = vpop.f32.mrf.mxu3  ;;  %v2346_v33 = vrot.slane %v5387_v22, 1  ;;  %v1894_v14 = vadd.f32 %v5324_v0, %v1720_v24  ;;  %v2138_v0 = vld [vmem:[%s6368_s3 + $0x48] sm:$0xff] }
 0x441   :  { %v5406_v12 = vsel %vm127_vm3, %v2347_v15, %v2348_v40  ;;  %v2067_v36 = vadd.f32 %v2029_v48, %v1893_v45  ;;  %v2349_v61 = vrot.slane %v5396_v38, 1  ;;  %v2317_v42 = vrot.slane %v5396_v38, 7 }
 0x442   :  { %vm2184_vm2 = vcmp.ge.f32.partialorder %v2168_v25, 0.0  ;;  %v2200_v52 = vmul.f32 0.2, %v2168_v25  ;;  %v5410_v31 = vsel %vm118_vm6, %v2315_v23, %v2316_v7  ;;  %v5434_v30 = vsel %vm127_vm3, %v2346_v33, %v2347_v15 }
 0x443   :  { %v5415_v55 = vpop.f32.mrf.mxu1  ;;  %v2121_v6 = vmul.f32 %v5347_v13, %v2067_v36  ;;  %v5422_v41 = vsel %vm127_vm3, %v2348_v40, %v2349_v61  ;;  %v5426_v28 = vsel %vm118_vm6, %v2316_v7, %v2317_v42  ;;  %v2314_v45 = vrot.slane %v5387_v22, 7 }
 0x444   :  { %v2216_v44 = vsel %vm2184_vm2, %v2168_v25, %v2200_v52 }
 0x445   :  { %v3696_v1 = vclamps-f32 %v2216_v44, 256.0  ;;  %v2153_v57 = vadd.f32 %v2137_v58, %v2121_v6  ;;  %v1721_v58 = vadd.f32 %v5246_v47, %v5259_v29  ;;  %v5469_v6 = vsel %vm118_vm6, %v2314_v45, %v2315_v23 }
 0x447   :  { %v5437_v10 = vmul.f32 %v3696_v1, %v5375_v37  ;;  %2618 = vrot.lane.b32.xlu1 %v5434_v30, %s4293_s4  ;;  %v2169_v49 = vmul.f32 1.4142135, %v2153_v57 }
 0x448   :  { %2572 = vrot.lane.b32.xlu2 %v5379_v63, %s4284_s23  ;;  %2714 = vrot.lane.b32.xlu0 %v5379_v63, %s4294_s10  ;;  %v2032_v56 = vpop.f32.mrf.mxu3 }
 0x449   :  { %v2350_v51 = vrot.slane %v5437_v10, 1  ;;  %v2318_v26 = vrot.slane %v5437_v10, 7  ;;  %vm2185_vm4 = vcmp.ge.f32.partialorder %v2169_v49, 0.0  ;;  %v2201_v15 = vmul.f32 0.2, %v2169_v49 }
 0x44a   :  { %v2068_v40 = vadd.f32 %v2032_v56, %v1894_v14  ;;  %v2139_v14 = vld [vmem:[%s6368_s3 + $0x50] sm:$0xff] }
 0x44b   :  { %v5452_v25 = vpop.f32.mrf.mxu1  ;;  %v5456_v7 = vsel %vm127_vm3, %v2349_v61, %v2350_v51  ;;  %v5460_v63 = vsel %vm118_vm6, %v2317_v42, %v2318_v26  ;;  %v2217_v48 = vsel %vm2185_vm4, %v2169_v49, %v2201_v15  ;;  %v1895_v42 = vadd.f32 %v5328_v4, %v1721_v58 }
 0x44c   :  { %v2122_v52 = vmul.f32 %v5347_v13, %v2068_v40  ;;  %v3697_v36 = vclamps-f32 %v2217_v48, 256.0 }
 0x44e   :  { %v2154_v44 = vadd.f32 %v2138_v0, %v2122_v52  ;;  %v5472_v61 = vmul.f32 %v3697_v36, %v5375_v37  ;;  %v1722_v52 = vadd.f32 %v5262_v16, %v5269_v11  ;;  %v5513_v11 = vperm.slane %v5344_v3, 1 }
 0x44f   :  { %2524 = vrot.lane.b32.xlu1 %v5469_v6, %s4295_s13 }
 0x450   :  { %v2170_v1 = vmul.f32 1.4142135, %v2154_v44  ;;  %2460 = vrot.lane.b32.xlu0 %v5434_v30, %s4283_s20  ;;  %2666 = vrot.lane.b32.xlu2 %v5469_v6, %s4286_s25  ;;  %v2035_v47 = vpop.f32.mrf.mxu3  ;;  %v2351_v29 = vrot.slane %v5472_v61, 1  ;;  %v2319_v23 = vrot.slane %v5472_v61, 7 }
 0x451   :  { %v2069_v57 = vadd.f32 %v2035_v47, %v1895_v42 }
 0x452   :  { %vm2186_vm5 = vcmp.ge.f32.partialorder %v2170_v1, 0.0  ;;  %v2202_v24 = vmul.f32 0.2, %v2170_v1  ;;  %v5488_v49 = vsel %vm127_vm3, %v2350_v51, %v2351_v29  ;;  %v5492_v56 = vsel %vm118_vm6, %v2318_v26, %v2319_v23 }
 0x453   :  { %v1882_v4 = vpop.f32.mrf.mxu1  ;;  %v2123_v40 = vmul.f32 %v5347_v13, %v2069_v57  ;;  %v1896_v51 = vadd.f32 %v5330_v32, %v1722_v52  ;;  %v2140_v32 = vld [vmem:[%s6368_s3 + $0x58] sm:$0xff]  ;;  %v1723_v57 = vadd.f32 %v5272_v34, %v5282_v50 }
 0x454   :  { %v2218_v15 = vsel %vm2186_vm5, %v2170_v1, %v2202_v24  ;;  %v5496_v0 = vadd.f32 %v1882_v4, %v5321_v60  ;;  %vm2810_vm5 = vcmask 64512  }
 0x455   :  { %v3698_v48 = vclamps-f32 %v2218_v15, 256.0  ;;  %v2155_v36 = vadd.f32 %v2139_v14, %v2123_v40 }
 0x457   :  { %v5501_v58 = vmul.f32 %v3698_v48, %v5375_v37  ;;  %2574 = vrot.lane.b32.xlu1 %v5382_v27, %s4284_s23  ;;  %v2171_v26 = vmul.f32 1.4142135, %v2155_v36  ;;  %v2141_v48 = vld [vmem:[%s6368_s3 + $0x60] sm:$0xff] }
 0x458   :  { %2400 = vrot.lane.b32.xlu0 %v5382_v27, %s4292_s28  ;;  %2716 = vrot.lane.b32.xlu2 %v5382_v27, %s4294_s10  ;;  %v2038_v60 = vpop.f32.mrf.mxu3 }
 0x459   :  { %v2352_v13 = vrot.slane %v5501_v58, 1  ;;  %v2320_v16 = vrot.slane %v5501_v58, 7  ;;  %vm2187_vm9 = vcmp.ge.f32.partialorder %v2171_v26, 0.0  ;;  %v2203_v44 = vmul.f32 0.2, %v2171_v26 }
 0x45a   :  { %v2070_v42 = vadd.f32 %v2038_v60, %v1896_v51  ;;  %v1724_v60 = vadd.f32 %v5284_v9, %v5290_v21 }
 0x45b   :  { %v5520_v1 = vsel %vm127_vm3, %v2351_v29, %v2352_v13  ;;  %v5524_v27 = vsel %vm118_vm6, %v2319_v23, %v2320_v16  ;;  %v2219_v47 = vsel %vm2187_vm9, %v2171_v26, %v2203_v44  ;;  %v1897_v29 = vadd.f32 %v5332_v39, %v1723_v57  ;;  %v5553_v26 = vpop.permute.xlu2 %2262 }
 0x45c   :  { %v2124_v24 = vmul.f32 %v5513_v11, %v2070_v42  ;;  %v3699_v3 = vclamps-f32 %v2219_v47, 256.0  ;;  %vm2843_vm9 = vcmask 195584  }
 0x45e   :  { %v2156_v14 = vadd.f32 %v2140_v32, %v2124_v24  ;;  %v5530_v4 = vmul.f32 %v3699_v3, %v5375_v37  ;;  %v2142_v3 = vld [vmem:[%s6368_s3 + $0x68] sm:$0xff] }
 0x45f   :  { %2762 = vrot.lane.b32.xlu1 %v5406_v12, %s4281_s16 }
 0x460   :  { %v2172_v15 = vmul.f32 1.4142135, %v2156_v14  ;;  %2462 = vrot.lane.b32.xlu2 %v5406_v12, %s4283_s20  ;;  %2620 = vrot.lane.b32.xlu0 %v5406_v12, %s4293_s4  ;;  %v2041_v23 = vpop.f32.mrf.mxu3  ;;  %v2353_v40 = vrot.slane %v5530_v4, 1  ;;  %v2321_v34 = vrot.slane %v5530_v4, 7 }
 0x461   :  { %v2071_v37 = vadd.f32 %v2041_v23, %v1897_v29  ;;  %v1725_v23 = vadd.f32 %v5292_v43, %v5299_v5 }
 0x462   :  { %vm2188_vm10 = vcmp.ge.f32.partialorder %v2172_v15, 0.0  ;;  %v2204_v50 = vmul.f32 0.2, %v2172_v15  ;;  %v5546_v39 = vsel %vm127_vm3, %v2352_v13, %v2353_v40  ;;  %v5550_v52 = vsel %vm118_vm6, %v2320_v16, %v2321_v34 }
 0x463   :  { %v2125_v36 = vmul.f32 %v5513_v11, %v2071_v37  ;;  %v1898_v13 = vadd.f32 %v5364_v8, %v1724_v60 }
 0x464   :  { %v2220_v12 = vsel %vm2188_vm10, %v2172_v15, %v2204_v50  ;;  %vm2909_vm10 = vcmask 457728  }
 0x465   :  { %v3700_v51 = vclamps-f32 %v2220_v12, 256.0  ;;  %v2157_v44 = vadd.f32 %v2141_v48, %v2125_v36 }
 0x467   :  { %v5558_v42 = vmul.f32 %v3700_v51, %v5553_v26  ;;  %2668 = vrot.lane.b32.xlu1 %v5410_v31, %s4286_s25  ;;  %v2173_v16 = vmul.f32 1.4142135, %v2157_v44  ;;  %v2143_v51 = vld [vmem:[%s6368_s3 + $0x70] sm:$0xff] }
 0x468   :  { %2526 = vrot.lane.b32.xlu0 %v5410_v31, %s4295_s13  ;;  %2402 = vrot.lane.b32.xlu2 %v5396_v38, %s4292_s28  ;;  %v2044_v32 = vpop.f32.mrf.mxu3 }
 0x469   :  { %v2354_v47 = vrot.slane %v5558_v42, 1  ;;  %v2322_v9 = vrot.slane %v5558_v42, 7  ;;  %vm2189_vm11 = vcmp.ge.f32.partialorder %v2173_v16, 0.0  ;;  %v2205_v21 = vmul.f32 0.2, %v2173_v16 }
 0x46a   :  { %v2072_v24 = vadd.f32 %v2044_v32, %v1898_v13 }
 0x46b   :  { %v5574_v8 = vsel %vm127_vm3, %v2353_v40, %v2354_v47  ;;  %v5578_v57 = vsel %vm118_vm6, %v2321_v34, %v2322_v9  ;;  %v2221_v14 = vsel %vm2189_vm11, %v2173_v16, %v2205_v21  ;;  %v1899_v40 = vadd.f32 %v5373_v2, %v1725_v23 }
 0x46c   :  { %v2126_v29 = vmul.f32 %v5513_v11, %v2072_v24  ;;  %v3701_v15 = vclamps-f32 %v2221_v14, 256.0  ;;  %v1726_v16 = vadd.f32 %v5302_v54, %v5305_v53 }
 0x46e   :  { %v2158_v50 = vadd.f32 %v2142_v3, %v2126_v29  ;;  %v5584_v37 = vmul.f32 %v3701_v15, %v5553_v26  ;;  %v2144_v29 = vld [vmem:[%s6368_s3 + $0x78] sm:$0xff] }
 0x46f   :  { %2718 = vrot.lane.b32.xlu1 %v5396_v38, %s4294_s10 }
 0x470   :  { %v2174_v48 = vmul.f32 1.4142135, %v2158_v50  ;;  %2576 = vrot.lane.b32.xlu0 %v5396_v38, %s4284_s23  ;;  %2622 = vrot.lane.b32.xlu2 %v5422_v41, %s4293_s4  ;;  %v2047_v34 = vpop.f32.mrf.mxu3  ;;  %v2355_v12 = vrot.slane %v5584_v37, 1  ;;  %v2323_v43 = vrot.slane %v5584_v37, 7 }
 0x471   :  { %v2073_v36 = vadd.f32 %v2047_v34, %v1899_v40  ;;  %v1727_v40 = vadd.f32 %v5311_v59, %v5316_v35 }
 0x472   :  { %vm2190_vm12 = vcmp.ge.f32.partialorder %v2174_v48, 0.0  ;;  %v2206_v5 = vmul.f32 0.2, %v2174_v48  ;;  %v5600_v2 = vsel %vm127_vm3, %v2354_v47, %v2355_v12  ;;  %v5604_v38 = vsel %vm118_vm6, %v2322_v9, %v2323_v43 }
 0x473   :  { %v2127_v44 = vmul.f32 %v5513_v11, %v2073_v36  ;;  %v1900_v47 = vadd.f32 %v5415_v55, %v1726_v16 }
 0x474   :  { %v2222_v60 = vsel %vm2190_vm12, %v2174_v48, %v2206_v5 }
 0x475   :  { %v3702_v13 = vclamps-f32 %v2222_v60, 256.0  ;;  %v2159_v32 = vadd.f32 %v2143_v51, %v2127_v44  ;;  %v2145_v60 = vld [vmem:[%s6368_s3 + $0x80] sm:$0xff] }
 0x477   :  { %v5610_v21 = vmul.f32 %v3702_v13, %v5553_v26  ;;  %2464 = vrot.lane.b32.xlu1 %v5422_v41, %s4283_s20  ;;  %v2175_v24 = vmul.f32 1.4142135, %v2159_v32 }
 0x478   :  { %2764 = vrot.lane.b32.xlu0 %v5422_v41, %s4281_s16  ;;  %2528 = vrot.lane.b32.xlu2 %v5426_v28, %s4295_s13  ;;  %v2050_v9 = vpop.f32.mrf.mxu3 }
 0x479   :  { %v2356_v3 = vrot.slane %v5610_v21, 1  ;;  %v2324_v54 = vrot.slane %v5610_v21, 7  ;;  %vm2191_vm13 = vcmp.ge.f32.partialorder %v2175_v24, 0.0  ;;  %v2207_v53 = vmul.f32 0.2, %v2175_v24 }
 0x47a   :  { %v2074_v14 = vadd.f32 %v2050_v9, %v1900_v47 }
 0x47b   :  { %v5626_v55 = vsel %vm127_vm3, %v2355_v12, %v2356_v3  ;;  %v5630_v41 = vsel %vm118_vm6, %v2323_v43, %v2324_v54  ;;  %v2223_v15 = vsel %vm2191_vm13, %v2175_v24, %v2207_v53  ;;  %v1901_v12 = vadd.f32 %v5452_v25, %v1727_v40 }
 0x47c   :  { %v2128_v23 = vmul.f32 %v5513_v11, %v2074_v14  ;;  %v3703_v50 = vclamps-f32 %v2223_v15, 256.0  ;;  %v1711_v15 = vpop.f32.mrf.mxu0 }
 0x47e   :  { %v2160_v48 = vadd.f32 %v2144_v29, %v2128_v23  ;;  %v5636_v34 = vmul.f32 %v3703_v50, %v5553_v26  ;;  %v2146_v23 = vld [vmem:[%s6368_s3 + $0x88] sm:$0xff] }
 0x47f   :  { %2404 = vrot.lane.b32.xlu1 %v5437_v10, %s4292_s28 }
 0x480   :  { %v2176_v5 = vmul.f32 1.4142135, %v2160_v48  ;;  %2670 = vrot.lane.b32.xlu0 %v5426_v28, %s4286_s25  ;;  %2578 = vrot.lane.b32.xlu2 %v5437_v10, %s4284_s23  ;;  %v2053_v43 = vpop.f32.mrf.mxu3  ;;  %v2357_v36 = vrot.slane %v5636_v34, 1  ;;  %v2325_v59 = vrot.slane %v5636_v34, 7 }
 0x481   :  { %v2075_v51 = vadd.f32 %v2053_v43, %v1901_v12  ;;  %v1885_v12 = vpop.f32.mrf.mxu1 }
 0x482   :  { %vm2192_vm14 = vcmp.ge.f32.partialorder %v2176_v5, 0.0  ;;  %v2208_v35 = vmul.f32 0.2, %v2176_v5  ;;  %v5652_v25 = vsel %vm127_vm3, %v2356_v3, %v2357_v36  ;;  %v5656_v44 = vsel %vm118_vm6, %v2324_v54, %v2325_v59 }
 0x483   :  { %v2129_v16 = vmul.f32 %v5513_v11, %v2075_v51 }
 0x484   :  { %v2224_v13 = vsel %vm2192_vm14, %v2176_v5, %v2208_v35 }
 0x485   :  { %v3704_v32 = vclamps-f32 %v2224_v13, 256.0  ;;  %v2161_v47 = vadd.f32 %v2145_v60, %v2129_v16 }
 0x487   :  { %v5660_v24 = vmul.f32 %v3704_v32, %v5553_v26  ;;  %2624 = vrot.lane.b32.xlu1 %v5456_v7, %s4293_s4  ;;  %v2177_v9 = vmul.f32 1.4142135, %v2161_v47  ;;  %v2147_v32 = vld [vmem:[%s6368_s3 + $0x90] sm:$0xff] }
 0x488   :  { %2720 = vrot.lane.b32.xlu0 %v5437_v10, %s4294_s10  ;;  %2766 = vrot.lane.b32.xlu2 %v5456_v7, %s4281_s16  ;;  %v2056_v3 = vpop.f32.mrf.mxu3 }
 0x489   :  { %v2358_v54 = vrot.slane %v5660_v24, 1  ;;  %v2326_v53 = vrot.slane %v5660_v24, 7  ;;  %vm2193_vm15 = vcmp.ge.f32.partialorder %v2177_v9, 0.0  ;;  %v2209_v14 = vmul.f32 0.2, %v2177_v9 }
 0x48a   :  { %v2076_v29 = vadd.f32 %v2056_v3, %v5496_v0  ;;  %v1729_v0 = vadd.f32 %v1711_v15, %v5326_v62 }
 0x48b   :  { %v5676_v10 = vsel %vm127_vm3, %v2357_v36, %v2358_v54  ;;  %v5680_v50 = vsel %vm118_vm6, %v2325_v59, %v2326_v53  ;;  %v2225_v40 = vsel %vm2193_vm15, %v2177_v9, %v2209_v14 }
 0x48c   :  { %v2130_v48 = vmul.f32 %v5513_v11, %v2076_v29  ;;  %v3705_v5 = vclamps-f32 %v2225_v40, 256.0  ;;  %v1903_v36 = vadd.f32 %v1885_v12, %v1729_v0 }
 0x48e   :  { %v2162_v43 = vadd.f32 %v2146_v23, %v2130_v48  ;;  %v5685_v35 = vmul.f32 %v3705_v5, %v5553_v26 }
 0x48f   :  { %2530 = vrot.lane.b32.xlu1 %v5460_v63, %s4295_s13 }
 0x490   :  { %v2178_v51 = vmul.f32 1.4142135, %v2162_v43  ;;  %2466 = vrot.lane.b32.xlu0 %v5456_v7, %s4283_s20  ;;  %2672 = vrot.lane.b32.xlu2 %v5460_v63, %s4286_s25  ;;  %v2059_v59 = vpop.f32.mrf.mxu3  ;;  %v2359_v60 = vrot.slane %v5685_v35, 1  ;;  %v2327_v62 = vrot.slane %v5685_v35, 7 }
 0x491   :  { %v2077_v16 = vadd.f32 %v2059_v59, %v1903_v36 }
 0x492   :  { %vm2194_vm2 = vcmp.ge.f32.partialorder %v2178_v51, 0.0  ;;  %v2210_v13 = vmul.f32 0.2, %v2178_v51  ;;  %v5700_v47 = vsel %vm127_vm3, %v2358_v54, %v2359_v60  ;;  %v5704_v7 = vsel %vm118_vm6, %v2326_v53, %v2327_v62 }
 0x493   :  { %v2131_v3 = vmul.f32 %v5513_v11, %v2077_v16 }
 0x494   :  { %v2226_v9 = vsel %vm2194_vm2, %v2178_v51, %v2210_v13 }
 0x495   :  { %v3706_v14 = vclamps-f32 %v2226_v9, 256.0  ;;  %v2163_v29 = vadd.f32 %v2147_v32, %v2131_v3 }
 0x497   :  { %v5708_v15 = vmul.f32 %v3706_v14, %v5553_v26  ;;  %2580 = vrot.lane.b32.xlu1 %v5472_v61, %s4284_s23  ;;  %v2179_v23 = vmul.f32 1.4142135, %v2163_v29 }
 0x498   :  { %2406 = vrot.lane.b32.xlu0 %v5472_v61, %s4292_s28  ;;  %2722 = vrot.lane.b32.xlu2 %v5472_v61, %s4294_s10 }
 0x499   :  { %v2360_v54 = vrot.slane %v5708_v15, 1  ;;  %v2328_v53 = vrot.slane %v5708_v15, 7  ;;  %vm2195_vm4 = vcmp.ge.f32.partialorder %v2179_v23, 0.0  ;;  %v2211_v11 = vmul.f32 0.2, %v2179_v23 }
 0x49a   :  { %v2397_v40 = vpop.permute.xlu2 %2396 }
 0x49b   :  { %v5720_v48 = vsel %vm127_vm3, %v2359_v60, %v2360_v54  ;;  %v5724_v12 = vsel %vm118_vm6, %v2327_v62, %v2328_v53  ;;  %v2227_v5 = vsel %vm2195_vm4, %v2179_v23, %v2211_v11 }
 0x49c   :  { %v3707_v0 = vclamps-f32 %v2227_v5, 256.0 }
 0x49e   :  { %v5727_v43 = vmul.f32 %v3707_v0, %v5553_v26 }
 0x49f   :  { %2768 = vrot.lane.b32.xlu1 %v5488_v49, %s4281_s16 }
 0x4a0   :  { %v2329_v61 = vrot.slane %v5727_v43, 7  ;;  %2468 = vrot.lane.b32.xlu2 %v5488_v49, %s4283_s20  ;;  %2626 = vrot.lane.b32.xlu0 %v5488_v49, %s4293_s4  ;;  %v2361_v36 = vrot.slane %v5727_v43, 1 }
 0x4a2   :  { %v2573_v51 = vpop.permute.xlu2 %2572  ;;  %v5741_v26 = vsel %vm127_vm3, %v2360_v54, %v2361_v36  ;;  %v5745_v59 = vsel %vm118_vm6, %v2328_v53, %v2329_v61 }
 0x4a7   :  { %2674 = vrot.lane.b32.xlu1 %v5492_v56, %s4286_s25 }
 0x4a8   :  { %2532 = vrot.lane.b32.xlu0 %v5492_v56, %s4295_s13  ;;  %2408 = vrot.lane.b32.xlu2 %v5501_v58, %s4292_s28 }
 0x4aa   :  { %v5753_v49 = vpop.permute.xlu2 %2666 }
 0x4af   :  { %2724 = vrot.lane.b32.xlu1 %v5501_v58, %s4294_s10 }
 0x4b0   :  { %2582 = vrot.lane.b32.xlu0 %v5501_v58, %s4284_s23  ;;  %2628 = vrot.lane.b32.xlu2 %v5520_v1, %s4293_s4 }
 0x4b1   :  { %v2399_v60 = vpop.permute.xlu1 %2398 }
 0x4b2   :  { %v5761_v62 = vpop.permute.xlu0 %2570  ;;  %v2717_v13 = vpop.permute.xlu2 %2716  ;;  %v2813_v58 = vsel %vm2810_vm5, %v5469_v6, %v2399_v60 }
 0x4b7   :  { %2470 = vrot.lane.b32.xlu1 %v5520_v1, %s4283_s20 }
 0x4b8   :  { %2770 = vrot.lane.b32.xlu0 %v5520_v1, %s4281_s16  ;;  %2534 = vrot.lane.b32.xlu2 %v5524_v27, %s4295_s13  ;;  %v5782_v1 = vsel %vm118_vm6, %v2329_v61, %v2314_v45  ;;  %vm2876_vm6 = vcmask 326656  }
 0x4b9   :  { %v5769_v16 = vpop.permute.xlu1 %2618  ;;  %v2812_v14 = vsel %vm2810_vm5, %v5782_v1, %v2397_v40 }
 0x4ba   :  { %v5773_v32 = vpop.permute.xlu0 %2714  ;;  %v2463_v9 = vpop.permute.xlu2 %2462 }
 0x4bb   :  { %v2829_v3 = vsel %vm240_vm1, %v2813_v58, %v2463_v9 }
 0x4bf   :  { %2410 = vrot.lane.b32.xlu1 %v5530_v4, %s4292_s28 }
 0x4c0   :  { %2676 = vrot.lane.b32.xlu0 %v5524_v27, %s4286_s25  ;;  %2584 = vrot.lane.b32.xlu2 %v5530_v4, %s4284_s23 }
 0x4c1   :  { %v2525_v6 = vpop.permute.xlu1 %2524 }
 0x4c2   :  { %v2461_v29 = vpop.permute.xlu0 %2460  ;;  %v5790_v23 = vpop.permute.xlu2 %2402 }
 0x4c3   :  { %v2828_v54 = vsel %vm240_vm1, %v2812_v14, %v2461_v29 }
 0x4c4   :  { %v2845_v53 = vsel %vm2843_vm9, %v2828_v54, %v2525_v6 }
 0x4c5   :  { %v2861_v45 = vsel %vm39_vm0, %v2845_v53, %v2573_v51 }
 0x4c7   :  { %2630 = vrot.lane.b32.xlu1 %v5546_v39, %s4293_s4 }
 0x4c8   :  { %2726 = vrot.lane.b32.xlu0 %v5530_v4, %s4294_s10  ;;  %2772 = vrot.lane.b32.xlu2 %v5546_v39, %s4281_s16 }
 0x4c9   :  { %v2575_v11 = vpop.permute.xlu1 %2574 }
 0x4ca   :  { %v2401_v40 = vpop.permute.xlu0 %2400  ;;  %v2623_v5 = vpop.permute.xlu2 %2622 }
 0x4cf   :  { %2536 = vrot.lane.b32.xlu1 %v5550_v52, %s4295_s13 }
 0x4d0   :  { %2472 = vrot.lane.b32.xlu0 %v5546_v39, %s4283_s20  ;;  %2678 = vrot.lane.b32.xlu2 %v5550_v52, %s4286_s25 }
 0x4d1   :  { %v5807_v0 = vpop.permute.xlu1 %2762 }
 0x4d2   :  { %v2621_v61 = vpop.permute.xlu0 %2620  ;;  %v2529_v4 = vpop.permute.xlu2 %2528 }
 0x4d3   :  { %v2878_v51 = vsel %vm2876_vm6, %v2861_v45, %v2621_v61 }
 0x4d7   :  { %2586 = vrot.lane.b32.xlu1 %v5558_v42, %s4284_s23 }
 0x4d8   :  { %2412 = vrot.lane.b32.xlu0 %v5558_v42, %s4292_s28  ;;  %2728 = vrot.lane.b32.xlu2 %v5558_v42, %s4294_s10 }
 0x4d9   :  { %v2669_v39 = vpop.permute.xlu1 %2668 }
 0x4da   :  { %v2894_v60 = vsel %vm249_vm7, %v2878_v51, %v2669_v39  ;;  %v2527_v58 = vpop.permute.xlu0 %2526  ;;  %v2579_v9 = vpop.permute.xlu2 %2578 }
 0x4db   :  { %v2911_v6 = vsel %vm2909_vm10, %v2894_v60, %v2717_v13  ;;  %v2846_v14 = vsel %vm2843_vm9, %v2829_v3, %v2527_v58  ;;  %v2814_v13 = vsel %vm2810_vm5, %v5410_v31, %v2401_v40 }
 0x4dc   :  { %v2862_v29 = vsel %vm39_vm0, %v2846_v14, %v2575_v11 }
 0x4dd   :  { %v2879_v54 = vsel %vm2876_vm6, %v2862_v29, %v2623_v5 }
 0x4df   :  { %2774 = vrot.lane.b32.xlu1 %v5574_v8, %s4281_s16 }
 0x4e0   :  { %2474 = vrot.lane.b32.xlu2 %v5574_v8, %s4283_s20  ;;  %2632 = vrot.lane.b32.xlu0 %v5574_v8, %s4293_s4 }
 0x4e1   :  { %v2719_v42 = vpop.permute.xlu1 %2718 }
 0x4e2   :  { %v2577_v53 = vpop.permute.xlu0 %2576  ;;  %v2767_v45 = vpop.permute.xlu2 %2766 }
 0x4e7   :  { %2680 = vrot.lane.b32.xlu1 %v5578_v57, %s4286_s25 }
 0x4e8   :  { %2538 = vrot.lane.b32.xlu0 %v5578_v57, %s4295_s13  ;;  %2414 = vrot.lane.b32.xlu2 %v5584_v37, %s4292_s28 }
 0x4e9   :  { %v2465_v3 = vpop.permute.xlu1 %2464 }
 0x4ea   :  { %v2830_v11 = vsel %vm240_vm1, %v2814_v13, %v2465_v3  ;;  %v2765_v5 = vpop.permute.xlu0 %2764  ;;  %v2673_v61 = vpop.permute.xlu2 %2672 }
 0x4eb   :  { %v2847_v8 = vsel %vm2843_vm9, %v2830_v11, %v2529_v4  ;;  %v5838_v51 = vsel %vm254_vm8, %v2911_v6, %v2765_v5 }
 0x4ec   :  { %v2863_v39 = vsel %vm39_vm0, %v2847_v8, %v2577_v53 }
 0x4ef   :  { %2730 = vrot.lane.b32.xlu1 %v5584_v37, %s4294_s10 }
 0x4f0   :  { %2588 = vrot.lane.b32.xlu0 %v5584_v37, %s4284_s23  ;;  %2634 = vrot.lane.b32.xlu2 %v5600_v2, %s4293_s4 }
 0x4f1   :  { %v2405_v31 = vpop.permute.xlu1 %2404 }
 0x4f2   :  { %v2671_v40 = vpop.permute.xlu0 %2670  ;;  %v2723_v60 = vpop.permute.xlu2 %2722  ;;  %v2816_v29 = vsel %vm2810_vm5, %v5460_v63, %v2405_v31  ;;  %v2815_v63 = vsel %vm2810_vm5, %v5426_v28, %v5790_v23  ;;  %v5890_v31 = vsel %vm127_vm3, %v2361_v36, %v2346_v33  ;;  %vm2967_vm3 = vcmask 588800  }
 0x4f3   :  { %v2895_v4 = vsel %vm249_vm7, %v2879_v54, %v2671_v40 }
 0x4f4   :  { %v2912_v58 = vsel %vm2909_vm10, %v2895_v4, %v2719_v42 }
 0x4f5   :  { %v5850_v6 = vsel %vm254_vm8, %v2912_v58, %v2767_v45 }
 0x4f7   :  { %2476 = vrot.lane.b32.xlu1 %v5600_v2, %s4283_s20 }
 0x4f8   :  { %2776 = vrot.lane.b32.xlu0 %v5600_v2, %s4281_s16  ;;  %2540 = vrot.lane.b32.xlu2 %v5604_v38, %s4295_s13 }
 0x4f9   :  { %v2625_v37 = vpop.permute.xlu1 %2624 }
 0x4fa   :  { %v2880_v14 = vsel %vm2876_vm6, %v2863_v39, %v2625_v37  ;;  %v2721_v54 = vpop.permute.xlu0 %2720  ;;  %v2469_v53 = vpop.permute.xlu2 %2468 }
 0x4fb   :  { %v2896_v42 = vsel %vm249_vm7, %v2880_v14, %v2673_v61  ;;  %v2832_v45 = vsel %vm240_vm1, %v2816_v29, %v2469_v53 }
 0x4fc   :  { %v2913_v13 = vsel %vm2909_vm10, %v2896_v42, %v2721_v54 }
 0x4ff   :  { %2636 = vrot.lane.b32.xlu1 %v5626_v55, %s4293_s4 }
 0x500   :  { %2682 = vrot.lane.b32.xlu0 %v5604_v38, %s4286_s25  ;;  %2778 = vrot.lane.b32.xlu2 %v5626_v55, %s4281_s16 }
 0x501   :  { %v2531_v2 = vpop.permute.xlu1 %2530 }
 0x502   :  { %v2467_v3 = vpop.permute.xlu0 %2466  ;;  %v5873_v11 = vpop.permute.xlu2 %2408 }
 0x503   :  { %v2831_v8 = vsel %vm240_vm1, %v2815_v63, %v2467_v3 }
 0x504   :  { %v2848_v5 = vsel %vm2843_vm9, %v2831_v8, %v2531_v2 }
 0x505   :  { %v2864_v61 = vsel %vm39_vm0, %v2848_v5, %v2579_v9 }
 0x507   :  { %2780 = vrot.lane.b32.xlu1 %v5652_v25, %s4281_s16 }
 0x508   :  { %2732 = vrot.lane.b32.xlu0 %v5610_v21, %s4294_s10  ;;  %2684 = vrot.lane.b32.xlu2 %v5630_v41, %s4286_s25 }
 0x509   :  { %v2581_v39 = vpop.permute.xlu1 %2580 }
 0x50a   :  { %v2407_v28 = vpop.permute.xlu0 %2406  ;;  %v2629_v23 = vpop.permute.xlu2 %2628 }
 0x50f   :  { %2458 = vrot.lane.b32.xlu1 %v5890_v31, %s4283_s20 }
 0x510   :  { %2394 = vrot.lane.b32.xlu0 %v5727_v43, %s4292_s28  ;;  %2522 = vrot.lane.b32.xlu2 %v5782_v1, %s4295_s13 }
 0x511   :  { %v2769_v9 = vpop.permute.xlu1 %2768 }
 0x512   :  { %v5899_v40 = vsel %vm254_vm8, %v2913_v13, %v2769_v9  ;;  %v2627_v4 = vpop.permute.xlu0 %2626  ;;  %v2535_v58 = vpop.permute.xlu2 %2534 }
 0x513   :  { %v2881_v37 = vsel %vm2876_vm6, %v2864_v61, %v2627_v4 }
 0x517   :  { %2542 = vrot.lane.b32.xlu1 %v5630_v41, %s4295_s13 }
 0x518   :  { %2478 = vrot.lane.b32.xlu0 %v5626_v55, %s4283_s20  ;;  %2590 = vrot.lane.b32.xlu2 %v5610_v21, %s4284_s23 }
 0x519   :  { %v2675_v17 = vpop.permute.xlu1 %2674 }
 0x51a   :  { %v2897_v33 = vsel %vm249_vm7, %v2881_v37, %v2675_v17  ;;  %v2533_v36 = vpop.permute.xlu0 %2532  ;;  %v2585_v14 = vpop.permute.xlu2 %2584 }
 0x51b   :  { %v2914_v29 = vsel %vm2909_vm10, %v2897_v33, %v2723_v60  ;;  %v2849_v54 = vsel %vm2843_vm9, %v2832_v45, %v2533_v36  ;;  %v2817_v60 = vsel %vm2810_vm5, %v5492_v56, %v2407_v28 }
 0x51c   :  { %v2865_v42 = vsel %vm39_vm0, %v2849_v54, %v2581_v39 }
 0x51d   :  { %v2882_v53 = vsel %vm2876_vm6, %v2865_v42, %v2629_v23 }
 0x51f   :  { %2686 = vrot.lane.b32.xlu1 %v5656_v44, %s4286_s25 }
 0x520   :  { %2638 = vrot.lane.b32.xlu0 %v5652_v25, %s4293_s4  ;;  %2734 = vrot.lane.b32.xlu2 %v5636_v34, %s4294_s10 }
 0x521   :  { %v2725_v55 = vpop.permute.xlu1 %2724 }
 0x522   :  { %v2583_v13 = vpop.permute.xlu0 %2582  ;;  %v2773_v2 = vpop.permute.xlu2 %2772 }
 0x527   :  { %2416 = vrot.lane.b32.xlu1 %v5610_v21, %s4292_s28 }
 0x528   :  { %2782 = vrot.lane.b32.xlu0 %v5676_v10, %s4281_s16  ;;  %2480 = vrot.lane.b32.xlu2 %v5652_v25, %s4283_s20 }
 0x529   :  { %v2471_v45 = vpop.permute.xlu1 %2470 }
 0x52a   :  { %v2833_v63 = vsel %vm240_vm1, %v2817_v60, %v2471_v45  ;;  %v2771_v8 = vpop.permute.xlu0 %2770  ;;  %v2679_v5 = vpop.permute.xlu2 %2678 }
 0x52b   :  { %v2850_v3 = vsel %vm2843_vm9, %v2833_v63, %v2535_v58  ;;  %v5930_v61 = vsel %vm254_vm8, %v2914_v29, %v2771_v8  ;;  %v2966_v8 = vld [vmem:[%s6368_s3 + $0x158] sm:$0xff] }
 0x52c   :  { %v2866_v21 = vsel %vm39_vm0, %v2850_v3, %v2583_v13  ;;  %3023 = vmatpush.msra.mxu0 %v2966_v8 }
 0x52f   :  { %2592 = vrot.lane.b32.xlu1 %v5636_v34, %s4284_s23 }
 0x530   :  { %2544 = vrot.lane.b32.xlu0 %v5656_v44, %s4295_s13  ;;  %2640 = vrot.lane.b32.xlu2 %v5676_v10, %s4293_s4 }
 0x531   :  { %v2411_v56 = vpop.permute.xlu1 %2410 }
 0x532   :  { %v2677_v25 = vpop.permute.xlu0 %2676  ;;  %v2729_v39 = vpop.permute.xlu2 %2728  ;;  %v2819_v37 = vsel %vm2810_vm5, %v5550_v52, %v2411_v56  ;;  %v2818_v52 = vsel %vm2810_vm5, %v5524_v27, %v5873_v11 }
 0x533   :  { %v2898_v28 = vsel %vm249_vm7, %v2882_v53, %v2677_v25 }
 0x534   :  { %v2915_v23 = vsel %vm2909_vm10, %v2898_v28, %v2725_v55 }
 0x535   :  { %v5942_v9 = vsel %vm254_vm8, %v2915_v23, %v2773_v2 }
 0x537   :  { %2736 = vrot.lane.b32.xlu1 %v5660_v24, %s4294_s10 }
 0x538   :  { %2688 = vrot.lane.b32.xlu0 %v5680_v50, %s4286_s25  ;;  %2784 = vrot.lane.b32.xlu2 %v5700_v47, %s4281_s16 }
 0x539   :  { %v2631_v4 = vpop.permute.xlu1 %2630 }
 0x53a   :  { %v2883_v58 = vsel %vm2876_vm6, %v2866_v21, %v2631_v4  ;;  %v2727_v17 = vpop.permute.xlu0 %2726  ;;  %v2475_v36 = vpop.permute.xlu2 %2474  ;;  %v2964_v4 = vld [vmem:[%s6368_s3 + $0x148] sm:$0xff] }
 0x53b   :  { %v2899_v33 = vsel %vm249_vm7, %v2883_v58, %v2679_v5  ;;  %v2835_v29 = vsel %vm240_vm1, %v2819_v37, %v2475_v36  ;;  %v2963_v58 = vld [vmem:[%s6368_s3 + $0x140] sm:$0xff] }
 0x53c   :  { %v2916_v54 = vsel %vm2909_vm10, %v2899_v33, %v2727_v17 }
 0x53f   :  { %2482 = vrot.lane.b32.xlu1 %v5676_v10, %s4283_s20 }
 0x540   :  { %2418 = vrot.lane.b32.xlu0 %v5636_v34, %s4292_s28  ;;  %2546 = vrot.lane.b32.xlu2 %v5680_v50, %s4295_s13 }
 0x541   :  { %v2537_v42 = vpop.permute.xlu1 %2536 }
 0x542   :  { %v2473_v53 = vpop.permute.xlu0 %2472  ;;  %v5965_v55 = vpop.permute.xlu2 %2414 }
 0x543   :  { %v2834_v13 = vsel %vm240_vm1, %v2818_v52, %v2473_v53 }
 0x544   :  { %v2851_v2 = vsel %vm2843_vm9, %v2834_v13, %v2537_v42 }
 0x545   :  { %v2867_v10 = vsel %vm39_vm0, %v2851_v2, %v2585_v14  ;;  %v2960_v2 = vld [vmem:[%s6368_s3 + $0x128] sm:$0xff] }
 0x547   :  { %2642 = vrot.lane.b32.xlu1 %v5700_v47, %s4293_s4 }
 0x548   :  { %2594 = vrot.lane.b32.xlu0 %v5660_v24, %s4284_s23  ;;  %2690 = vrot.lane.b32.xlu2 %v5704_v7, %s4286_s25 }
 0x549   :  { %v2587_v34 = vpop.permute.xlu1 %2586 }
 0x54a   :  { %v2413_v27 = vpop.permute.xlu0 %2412  ;;  %v2635_v11 = vpop.permute.xlu2 %2634 }
 0x54b   :  { %v2820_v33 = vsel %vm2810_vm5, %v5578_v57, %v2413_v27  ;;  %v2961_v57 = vld [vmem:[%s6368_s3 + $0x130] sm:$0xff] }
 0x54f   :  { %3082 = vrot.lane.b32.xlu1 %v4397_v20, %s4282_s19 }
 0x550   :  { %2738 = vrot.lane.b32.xlu0 %v5685_v35, %s4294_s10  ;;  %2786 = vrot.lane.b32.xlu2 %v5720_v48, %s4281_s16 }
 0x551   :  { %v2775_v14 = vpop.permute.xlu1 %2774 }
 0x552   :  { %v5983_v60 = vsel %vm254_vm8, %v2916_v54, %v2775_v14  ;;  %v2633_v45 = vpop.permute.xlu0 %2632  ;;  %v2541_v63 = vpop.permute.xlu2 %2540 }
 0x553   :  { %v2884_v3 = vsel %vm2876_vm6, %v2867_v10, %v2633_v45  ;;  %v2959_v10 = vld [vmem:[%s6368_s3 + $0x120] sm:$0xff] }
 0x557   :  { %2484 = vrot.lane.b32.xlu1 %v5700_v47, %s4283_s20 }
 0x558   :  { %2420 = vrot.lane.b32.xlu0 %v5660_v24, %s4292_s28  ;;  %2548 = vrot.lane.b32.xlu2 %v5704_v7, %s4295_s13  ;;  %v2965_v24 = vld [vmem:[%s6368_s3 + $0x150] sm:$0xff] }
 0x559   :  { %v2681_v20 = vpop.permute.xlu1 %2680  ;;  %3024 = vmatpush.msra.mxu0 %v2965_v24 }
 0x55a   :  { %v2900_v5 = vsel %vm249_vm7, %v2884_v3, %v2681_v20  ;;  %v2539_v21 = vpop.permute.xlu0 %2538  ;;  %v2779_v56 = vpop.permute.xlu2 %2778 }
 0x55b   :  { %v2917_v25 = vsel %vm2909_vm10, %v2900_v5, %v2729_v39  ;;  %v2852_v28 = vsel %vm2843_vm9, %v2835_v29, %v2539_v21  ;;  %3025 = vmatpush.msra.mxu0 %v2964_v4  ;;  %v2962_v29 = vld [vmem:[%s6368_s3 + $0x138] sm:$0xff] }
 0x55c   :  { %v2868_v23 = vsel %vm39_vm0, %v2852_v28, %v2587_v34  ;;  %v2958_v34 = vld [vmem:[%s6368_s3 + $0x118] sm:$0xff] }
 0x55d   :  { %v2885_v47 = vsel %vm2876_vm6, %v2868_v23, %v2635_v11  ;;  %3026 = vmatpush.msra.mxu0 %v2963_v58  ;;  %v4049_v58 = vld [vmem:[%s6369_s8] sm:$0xff]  }
 0x55f   :  { %2644 = vrot.lane.b32.xlu1 %v5720_v48, %s4293_s4  ;;  %3027 = vmatpush.msra.mxu0 %v2962_v29 }
 0x560   :  { %2596 = vrot.lane.b32.xlu0 %v5685_v35, %s4284_s23  ;;  %2692 = vrot.lane.b32.xlu2 %v5724_v12, %s4286_s25 }
 0x561   :  { %v2731_v39 = vpop.permute.xlu1 %2730  ;;  %3028 = vmatpush.msra.mxu0 %v2961_v57  ;;  %v4159_v57 = vld [vmem:[%s6369_s8 + $0x8] sm:$0xff]  }
 0x562   :  { %v2589_v37 = vpop.permute.xlu0 %2588  ;;  %v2685_v17 = vpop.permute.xlu2 %2684 }
 0x563   :  { %3029 = vmatpush.msra.mxu0 %v2960_v2 }
 0x565   :  { %3030 = vmatpush.msra.mxu0 %v2959_v10 }
 0x567   :  { %2550 = vrot.lane.b32.xlu1 %v5724_v12, %s4295_s13  ;;  %3031 = vmatpush.msra.mxu0 %v2958_v34 }
 0x568   :  { %2740 = vrot.lane.b32.xlu0 %v5708_v15, %s4294_s10  ;;  %2422 = vrot.lane.b32.xlu2 %v5685_v35, %s4292_s28 }
 0x569   :  { %v2477_v36 = vpop.permute.xlu1 %2476 }
 0x56a   :  { %v2836_v54 = vsel %vm240_vm1, %v2820_v33, %v2477_v36  ;;  %v2777_v52 = vpop.permute.xlu0 %2776  ;;  %v2523_v53 = vpop.permute.xlu2 %2522 }
 0x56b   :  { %v2853_v42 = vsel %vm2843_vm9, %v2836_v54, %v2541_v63  ;;  %v6032_v13 = vsel %vm254_vm8, %v2917_v25, %v2777_v52 }
 0x56c   :  { %v2869_v35 = vsel %vm39_vm0, %v2853_v42, %v2589_v37 }
 0x56f   :  { %2424 = vrot.lane.b32.xlu1 %v5708_v15, %s4292_s28 }
 0x570   :  { %2486 = vrot.lane.b32.xlu0 %v5720_v48, %s4283_s20  ;;  %2598 = vrot.lane.b32.xlu2 %v5708_v15, %s4284_s23  ;;  %v4296_v48 = vmov 0  }
 0x571   :  { %v2637_v27 = vpop.permute.xlu1 %2636  ;;  %4272 = vset.pattern.permute.xlu2 %v4296_v48 }
 0x572   :  { %v2886_v11 = vsel %vm2876_vm6, %v2869_v35, %v2637_v27  ;;  %v2683_v14 = vpop.permute.xlu0 %2682  ;;  %v2591_v45 = vpop.permute.xlu2 %2590 }
 0x573   :  { %v2902_v63 = vsel %vm249_vm7, %v2886_v11, %v2685_v17  ;;  %v2901_v3 = vsel %vm249_vm7, %v2885_v47, %v2683_v14  ;;  %v4055_v14 = vunpack.c.h.bf16 %v4159_v57 }
 0x574   :  { %v2918_v8 = vsel %vm2909_vm10, %v2901_v3, %v2731_v39 }
 0x575   :  { %v6055_v20 = vsel %vm254_vm8, %v2918_v8, %v2779_v56  ;;  %v4160_v8 = vld [vmem:[%s6369_s8 + $0x10] sm:$0xff]  }
 0x577   :  { %2788 = vrot.lane.b32.xlu1 %v5741_v26, %s4281_s16 }
 0x578   :  { %2646 = vrot.lane.b32.xlu0 %v5741_v26, %s4293_s4  ;;  %2742 = vrot.lane.b32.xlu2 %v5727_v43, %s4294_s10 }
 0x579   :  { %v2781_v15 = vpop.permute.xlu1 %2780 }
 0x57a   :  { %v2733_v5 = vpop.permute.xlu0 %2732  ;;  %v2735_v21 = vpop.permute.xlu2 %2734 }
 0x57b   :  { %v2919_v25 = vsel %vm2909_vm10, %v2902_v63, %v2733_v5 }
 0x57c   :  { %v6065_v28 = vsel %vm254_vm8, %v2919_v25, %v2781_v15  ;;  %v4058_v15 = vunpack.c.l.bf16 %v4160_v8 }
 0x57f   :  { %2694 = vrot.lane.b32.xlu1 %v5745_v59, %s4286_s25 }
 0x580   :  { %2790 = vrot.lane.b32.xlu0 %v5890_v31, %s4281_s16  ;;  %2488 = vrot.lane.b32.xlu2 %v5741_v26, %s4283_s20  ;;  %v4050_v26 = vunpack.c.l.bf16 %v4049_v58 }
 0x581   :  { %v2459_v56 = vpop.permute.xlu1 %2458 }
 0x582   :  { %v2395_v23 = vpop.permute.xlu0 %2394  ;;  %v2481_v47 = vpop.permute.xlu2 %2480 }
 0x583   :  { %v2811_v24 = vsel %vm2810_vm5, %v5745_v59, %v2395_v23 }
 0x584   :  { %v2827_v4 = vsel %vm240_vm1, %v2811_v24, %v2459_v56  ;;  %v2946_v56 = vmul.f32 %v4058_v15, %v5930_v61  ;;  %v4059_v24 = vunpack.c.h.bf16 %v4160_v8  ;;  %v4161_v61 = vld [vmem:[%s6369_s8 + $0x18] sm:$0xff]  }
 0x585   :  { %v2844_v39 = vsel %vm2843_vm9, %v2827_v4, %v2523_v53 }
 0x586   :  { %v2860_v37 = vsel %vm39_vm0, %v2844_v39, %v5761_v62 }
 0x587   :  { %2600 = vrot.lane.b32.xlu1 %v5727_v43, %s4284_s23  ;;  %v2877_v17 = vsel %vm2876_vm6, %v2860_v37, %v5769_v16  ;;  %v2821_v43 = vsel %vm2810_vm5, %v5604_v38, %v5965_v55  ;;  %v2947_v37 = vmul.f32 %v4059_v24, %v5942_v9 }
 0x588   :  { %v2893_v33 = vsel %vm249_vm7, %v2877_v17, %v5753_v49  ;;  %2648 = vrot.lane.b32.xlu2 %v5890_v31, %s4293_s4  ;;  %2552 = vrot.lane.b32.xlu0 %v5745_v59, %s4295_s13  ;;  %v4062_v17 = vunpack.c.l.bf16 %v4161_v61 }
 0x589   :  { %v2543_v36 = vpop.permute.xlu1 %2542  ;;  %v2910_v62 = vsel %vm2909_vm10, %v2893_v33, %v5773_v32  ;;  %v4051_v32 = vunpack.c.h.bf16 %v4049_v58 }
 0x58a   :  { %v2926_v16 = vsel %vm254_vm8, %v2910_v62, %v5807_v0  ;;  %v2479_v29 = vpop.permute.xlu0 %2478  ;;  %v2641_v54 = vpop.permute.xlu2 %2640  ;;  %v2948_v9 = vmul.f32 %v4062_v17, %v5983_v60  ;;  %v4162_v60 = vld [vmem:[%s6369_s8 + $0x20] sm:$0xff]  }
 0x58b   :  { %v2942_v49 = vmul.f32 %v4050_v26, %v2926_v16  ;;  %v2837_v31 = vsel %vm240_vm1, %v2821_v43, %v2479_v29  ;;  %v2943_v52 = vmul.f32 %v4051_v32, %v5838_v51  ;;  %v4054_v51 = vunpack.c.l.bf16 %v4159_v57  ;;  %v4166_v57 = vld [vmem:[%s6370_s6 + $0x8] sm:$0xff]  }
 0x58c   :  { %v2854_v42 = vsel %vm2843_vm9, %v2837_v31, %v2543_v36 }
 0x58d   :  { %3708 = vmatmul.msk.f32.vlgmr.msra.gmra.mxu0 %vm2967_vm3, %v2942_v49  ;;  %v2870_v59 = vsel %vm39_vm0, %v2854_v42, %v2591_v45  ;;  %v2944_v11 = vmul.f32 %v4054_v51, %v5850_v6  ;;  %v4063_v49 = vunpack.c.h.bf16 %v4161_v61  ;;  %v4067_v51 = vunpack.c.h.bf16 %v4162_v60 }
 0x58f   :  { %2744 = vrot.lane.b32.xlu1 %v5387_v22, %s4294_s10  ;;  %v2949_v32 = vmul.f32 %v4063_v49, %v6032_v13  ;;  %v4086_v13 = vunpack.c.l.bf16 %v4166_v57 }
 0x590   :  { %2792 = vrot.lane.b32.xlu2 %v5434_v30, %s4281_s16  ;;  %2696 = vrot.lane.b32.xlu0 %v5782_v1, %s4286_s25  ;;  %v6119_v30 = vld [vmem:[%s6364_s2 + $0xe8] sm:$0x7] }
 0x591   :  { %v2687_v38 = vpop.permute.xlu1 %2686 }
 0x592   :  { %v2639_v0 = vpop.permute.xlu0 %2638  ;;  %v2785_v55 = vpop.permute.xlu2 %2784 }
 0x593   :  { %v2887_v53 = vsel %vm2876_vm6, %v2870_v59, %v2639_v0 }
 0x594   :  { %v2903_v22 = vsel %vm249_vm7, %v2887_v53, %v2687_v38  ;;  %v4066_v38 = vunpack.c.l.bf16 %v4162_v60 }
 0x595   :  { %3709 = vmatmul.msk.f32.gmra.mxu0 %vm2967_vm3, %v2943_v52  ;;  %v6122_v1 = vsel %vm2909_vm10, %v2903_v22, %v2735_v21  ;;  %v4087_v22 = vunpack.c.h.bf16 %v4166_v57 }
 0x596   :  { %v2950_v53 = vmul.f32 %v4066_v38, %v6055_v20  ;;  %v4163_v20 = vld [vmem:[%s6369_s8 + $0x28] sm:$0xff]  }
 0x597   :  { %3262 = vrot.lane.b32.xlu1 %v4393_v18, %s4291_s24  ;;  %v3081_v18 = vld [vmem:[%s6368_s3 + $0x10] sm:$0xff]  ;;  %v4071_v8 = vunpack.c.h.bf16 %v4163_v20 }
 0x598   :  { %460 = vperm.xlu2 %4272, %v6119_v30   ;;  %3264 = vrot.lane.b32.xlu0 %v4395_v19, %s4291_s24 }
 0x599   :  { %v2417_v35 = vpop.permute.xlu1 %2416  ;;  %3101 = vmatpush.msrb.mxu2 %v3081_v18 }
 0x59a   :  { %v2822_v2 = vsel %vm2810_vm5, %v5630_v41, %v2417_v35  ;;  %v6131_v10 = vpop.permute.xlu0 %2782  ;;  %v2547_v34 = vpop.permute.xlu2 %2546  ;;  %v2945_v41 = vmul.f32 %v4055_v14, %v5899_v40 }
 0x59b   :  { %v2838_v27 = vsel %vm240_vm1, %v2822_v2, %v2481_v47  ;;  %3385 = vmatpush.msra.mxu2 %v4087_v22 }
 0x59d   :  { %3710 = vmatmul.msk.f32.gmra.mxu0 %vm2967_vm3, %v2944_v11  ;;  %3386 = vmatpush.msra.mxu2 %v4086_v13  ;;  %v4081_v11 = vld [vmem:[%s6370_s6] sm:$0xff]  }
 0x59e   :  { %v4083_v18 = vunpack.c.h.bf16 %v4081_v11  ;;  %v4082_v14 = vunpack.c.l.bf16 %v4081_v11 }
 0x5a0   :  { %3387 = vmatpush.msra.mxu2 %v4083_v18 }
 0x5a1   :  { %v2593_v19 = vpop.permute.xlu1 %2592 }
 0x5a2   :  { %v2545_v45 = vpop.permute.xlu0 %2544  ;;  %v2691_v63 = vpop.permute.xlu2 %2690  ;;  %3388 = vmatpush.msra.mxu2 %v4082_v14 }
 0x5a3   :  { %v2855_v3 = vsel %vm2843_vm9, %v2838_v27, %v2545_v45  ;;  %v2951_v27 = vmul.f32 %v4067_v51, %v6065_v28  ;;  %v2936_v45 = vsel %vm254_vm8, %v6122_v1, %v6131_v10  ;;  %v4164_v1 = vld [vmem:[%s6369_s8 + $0x30] sm:$0xff]  }
 0x5a4   :  { %v2871_v6 = vsel %vm39_vm0, %v2855_v3, %v2593_v19  ;;  %v4070_v19 = vunpack.c.l.bf16 %v4163_v20 }
 0x5a5   :  { %3711 = vmatmul.msk.f32.gmra.mxu0 %vm2967_vm3, %v2945_v41  ;;  %v2888_v48 = vsel %vm2876_vm6, %v2871_v6, %v2641_v54 }
 0x5a6   :  { %v2952_v3 = vmul.f32 %v4070_v19, %v2936_v45 }
 0x5a9   :  { %v2737_v5 = vpop.permute.xlu1 %2736 }
 0x5aa   :  { %v2689_v21 = vpop.permute.xlu0 %2688  ;;  %v6147_v25 = vpop.permute.xlu2 %2786 }
 0x5ab   :  { %v2904_v40 = vsel %vm249_vm7, %v2888_v48, %v2689_v21 }
 0x5ac   :  { %v2921_v23 = vsel %vm2909_vm10, %v2904_v40, %v2737_v5  ;;  %v4074_v40 = vunpack.c.l.bf16 %v4164_v1 }
 0x5ad   :  { %v6153_v47 = vsel %vm254_vm8, %v2921_v23, %v2785_v55  ;;  %3712 = vmatmul.msk.f32.gmra.mxu0 %vm2967_vm3, %v2946_v56 }
 0x5ae   :  { %v2953_v21 = vmul.f32 %v4071_v8, %v6153_v47 }
 0x5b1   :  { %v2483_v4 = vpop.permute.xlu1 %2482 }
 0x5b2   :  { %v2419_v39 = vpop.permute.xlu0 %2418  ;;  %v6156_v58 = vpop.permute.xlu2 %2548 }
 0x5b3   :  { %v2823_v26 = vsel %vm2810_vm5, %v5656_v44, %v2419_v39 }
 0x5b4   :  { %v2839_v33 = vsel %vm240_vm1, %v2823_v26, %v2483_v4 }
 0x5b5   :  { %3713 = vmatmul.msk.f32.gmra.mxu0 %vm2967_vm3, %v2947_v37  ;;  %v2856_v43 = vsel %vm2843_vm9, %v2839_v33, %v2547_v34 }
 0x5b9   :  { %v2643_v36 = vpop.permute.xlu1 %2642 }
 0x5ba   :  { %v2595_v62 = vpop.permute.xlu0 %2594  ;;  %v6167_v16 = vpop.permute.xlu2 %2692 }
 0x5bb   :  { %v2872_v29 = vsel %vm39_vm0, %v2856_v43, %v2595_v62 }
 0x5bc   :  { %v2889_v54 = vsel %vm2876_vm6, %v2872_v29, %v2643_v36  ;;  %v4075_v36 = vunpack.c.h.bf16 %v4164_v1 }
 0x5bd   :  { %3714 = vmatmul.msk.f32.gmra.mxu0 %vm2967_vm3, %v2948_v9  ;;  %v2905_v44 = vsel %vm249_vm7, %v2889_v54, %v2691_v63 }
 0x5c1   :  { %v3083_v31 = vpop.permute.xlu1 %3082 }
 0x5c2   :  { %3724 = vmatmul.msk.f32.vlgmr.msrb.gmra.mxu2 %vm2810_vm5, %v3083_v31  ;;  %v2739_v42 = vpop.permute.xlu0 %2738  ;;  %v2423_v59 = vpop.permute.xlu2 %2422 }
 0x5c3   :  { %v2922_v56 = vsel %vm2909_vm10, %v2905_v44, %v2739_v42  ;;  %v2825_v4 = vsel %vm2810_vm5, %v5704_v7, %v2423_v59 }
 0x5c5   :  { %3715 = vmatmul.msk.f32.gmra.mxu0 %vm2967_vm3, %v2949_v32 }
 0x5c9   :  { %v2485_v0 = vpop.permute.xlu1 %2484 }
 0x5ca   :  { %v2421_v55 = vpop.permute.xlu0 %2420  ;;  %v2599_v52 = vpop.permute.xlu2 %2598 }
 0x5cb   :  { %v2824_v48 = vsel %vm2810_vm5, %v5680_v50, %v2421_v55  ;;  %v2938_v50 = vsel %vm254_vm8, %v2922_v56, %v6147_v25 }
 0x5cc   :  { %v2840_v10 = vsel %vm240_vm1, %v2824_v48, %v2485_v0  ;;  %v2954_v26 = vmul.f32 %v4074_v40, %v2938_v50 }
 0x5cd   :  { %3716 = vmatmul.msk.f32.gmra.mxu0 %vm2967_vm3, %v2950_v53  ;;  %v2857_v23 = vsel %vm2843_vm9, %v2840_v10, %v6156_v58 }
 0x5d1   :  { %v2645_v35 = vpop.permute.xlu1 %2644 }
 0x5d2   :  { %v2597_v2 = vpop.permute.xlu0 %2596  ;;  %v2743_v34 = vpop.permute.xlu2 %2742 }
 0x5d3   :  { %v2873_v24 = vsel %vm39_vm0, %v2857_v23, %v2597_v2 }
 0x5d4   :  { %v2890_v17 = vsel %vm2876_vm6, %v2873_v24, %v2645_v35 }
 0x5d5   :  { %3717 = vmatmul.msk.f32.gmra.mxu0 %vm2967_vm3, %v2951_v27  ;;  %v2906_v25 = vsel %vm249_vm7, %v2890_v17, %v6167_v16  ;;  %v4165_v16 = vld [vmem:[%s6369_s8 + $0x38] sm:$0xff]   ;;  %v3147_v17 = vld [vmem:[%s6368_s3 + $0x100] sm:$0xff] }
 0x5d6   :  { %v4078_v32 = vunpack.c.l.bf16 %v4165_v16  ;;  %v4079_v35 = vunpack.c.h.bf16 %v4165_v16 }
 0x5d9   :  { %v2551_v63 = vpop.permute.xlu1 %2550 }
 0x5da   :  { %v2741_v28 = vpop.permute.xlu0 %2740  ;;  %v2489_v41 = vpop.permute.xlu2 %2488 }
 0x5db   :  { %v2923_v58 = vsel %vm2909_vm10, %v2906_v25, %v2741_v28  ;;  %v3149_v25 = vld [vmem:[%s6368_s3 + $0x110] sm:$0xff] }
 0x5dd   :  { %3718 = vmatmul.msk.f32.gmra.mxu0 %vm2967_vm3, %v2952_v3 }
 0x5e1   :  { %v2425_v6 = vpop.permute.xlu1 %2424 }
 0x5e2   :  { %v2487_v15 = vpop.permute.xlu0 %2486  ;;  %v2649_v5 = vpop.permute.xlu2 %2648  ;;  %v2826_v60 = vsel %vm2810_vm5, %v5724_v12, %v2425_v6 }
 0x5e3   :  { %v2841_v39 = vsel %vm240_vm1, %v2825_v4, %v2487_v15 }
 0x5e4   :  { %v2858_v33 = vsel %vm2843_vm9, %v2841_v39, %v2551_v63 }
 0x5e5   :  { %3719 = vmatmul.msk.f32.gmra.mxu0 %vm2967_vm3, %v2953_v21  ;;  %v2874_v62 = vsel %vm39_vm0, %v2858_v33, %v2599_v52  ;;  %v2842_v52 = vsel %vm240_vm1, %v2826_v60, %v2489_v41 }
 0x5e9   :  { %v2789_v47 = vpop.permute.xlu1 %2788 }
 0x5ea   :  { %v2647_v37 = vpop.permute.xlu0 %2646  ;;  %v2793_v61 = vpop.permute.xlu2 %2792  ;;  %v2939_v7 = vsel %vm254_vm8, %v2923_v58, %v2789_v47 }
 0x5eb   :  { %v2891_v9 = vsel %vm2876_vm6, %v2874_v62, %v2647_v37  ;;  %v2955_v49 = vmul.f32 %v4075_v36, %v2939_v7  ;;  %v3148_v37 = vld [vmem:[%s6368_s3 + $0x108] sm:$0xff] }
 0x5ed   :  { %3720 = vmatmul.msk.f32.gmra.mxu0 %vm2967_vm3, %v2954_v26 }
 0x5f1   :  { %v2695_v43 = vpop.permute.xlu1 %2694 }
 0x5f2   :  { %v2791_v29 = vpop.permute.xlu0 %2790  ;;  %v461_v54 = vpop.permute.xlu2 %460  ;;  %v2907_v44 = vsel %vm249_vm7, %v2891_v9, %v2695_v43  ;;  %v3146_v43 = vld [vmem:[%s6368_s3 + $0xf8] sm:$0xff] }
 0x5f3   :  { %v496_v31 = vadd.f32 %v4929_v46, %v461_v54  ;;  %v2924_v59 = vsel %vm2909_vm10, %v2907_v44, %v2743_v34  ;;  %v3145_v54 = vld [vmem:[%s6368_s3 + $0xf0] sm:$0xff] }
 0x5f4   :  { %v2940_v38 = vsel %vm254_vm8, %v2924_v59, %v2791_v29 }
 0x5f5   :  { %v3414_v42 = vclamps-f32 %v496_v31, 256.0  ;;  %3721 = vmatmul.msk.f32.gmra.mxu0 %vm2967_vm3, %v2955_v49  ;;  %v2956_v46 = vmul.f32 %v4078_v32, %v2940_v38 }
 0x5f7   :  { %3759 = vmatmul.msk.f32.vlgmr.msra.gmra.mxu2 %vm39_vm0, %v3414_v42 }
 0x5f9   :  { %v2601_v0 = vpop.permute.xlu1 %2600 }
 0x5fa   :  { %v2553_v55 = vpop.permute.xlu0 %2552 }
 0x5fb   :  { %v2859_v53 = vsel %vm2843_vm9, %v2842_v52, %v2553_v55 }
 0x5fc   :  { %v2875_v57 = vsel %vm39_vm0, %v2859_v53, %v2601_v0 }
 0x5fd   :  { %3722 = vmatmul.msk.f32.gmra.mxu0 %vm2967_vm3, %v2956_v46  ;;  %v2892_v51 = vsel %vm2876_vm6, %v2875_v57, %v2649_v5  ;;  %v3144_v46 = vld [vmem:[%s6368_s3 + $0xe8] sm:$0xff] }
 0x601   :  { %v2745_v22 = vpop.permute.xlu1 %2744 }
 0x602   :  { %v2697_v13 = vpop.permute.xlu0 %2696 }
 0x603   :  { %v2908_v12 = vsel %vm249_vm7, %v2892_v51, %v2697_v13 }
 0x604   :  { %v2925_v2 = vsel %vm2909_vm10, %v2908_v12, %v2745_v22 }
 0x605   :  { %v2941_v34 = vsel %vm254_vm8, %v2925_v2, %v2793_v61 }
 0x606   :  { %v2957_v27 = vmul.f32 %v4079_v35, %v2941_v34  ;;  %v3143_v34 = vld [vmem:[%s6368_s3 + $0xe0] sm:$0xff] }
 0x608   :  { %3723 = vmatmul.msk.f32.gmra.mxu0 %vm2967_vm3, %v2957_v27 }
 0x60a   :  { %v6243_v20 = vpop.f32.mrf.mxu0  ;;  %v6279_v53 = vpop.permute.xlu0 %3264 }
 0x612   :  { %v6245_v11 = vpop.f32.mrf.mxu0 }
 0x61a   :  { %v6247_v18 = vpop.f32.mrf.mxu0 }
 0x622   :  { %v6249_v14 = vpop.f32.mrf.mxu0 }
 0x62a   :  { %v6251_v19 = vpop.f32.mrf.mxu0 }
 0x632   :  { %v6253_v45 = vpop.f32.mrf.mxu0 }
 0x63a   :  { %v6255_v63 = vpop.f32.mrf.mxu0 }
 0x642   :  { %v6257_v28 = vpop.f32.mrf.mxu0 }
 0x645   :  { %v3103_v8 = vpop.f32.mrf.mxu2 }
 0x646   :  { %v3104_v6 = vadd.f32 1e-08, %v3103_v8 }
 0x648   :  { %4279 = vrsqrt.f32 %v3104_v6  ;;  %vm3112_vm1 = vweird.f32 %v3104_v6 }
 0x64a   :  { %v6259_v41 = vpop.f32.mrf.mxu0 }
 0x64e   :  { %v4280_v15 = vpop.eup %4279 }
 0x64f   :  { %v3107_v21 = vmul.f32 %v4280_v15, %v3104_v6  ;;  %vm3113_vm0 = vweird.f32 %v4280_v15 }
 0x650   :  { %vm3114_vm7 = vmor %vm3112_vm1, %vm3113_vm0 }
 0x651   :  { %v3108_v1 = vmul.f32 %v4280_v15, %v3107_v21 }
 0x652   :  { %v3060_v3 = vpop.f32.mrf.mxu0 }
 0x653   :  { %v3109_v56 = vmul.f32 0.5, %v3108_v1  ;;  %v3142_v1 = vld [vmem:[%s6368_s3 + $0xd8] sm:$0xff] }
 0x655   :  { %v3110_v40 = vsub.f32 1.5, %v3109_v56 }
 0x657   :  { %v3111_v50 = vmul.f32 %v4280_v15, %v3110_v40 }
 0x659   :  { %v3115_v24 = vsel %vm3114_vm7, %v4280_v15, %v3111_v50 }
 0x65a   :  { %v3063_v48 = vpop.f32.mrf.mxu0  ;;  %v3117_v4 = vperm.slane %v3115_v24, 1  ;;  %v6286_v27 = vperm.slane %v3115_v24, 0 }
 0x65c   :  { %v3128_v59 = vmul.f32 %v3117_v4, %v3063_v48  ;;  %v3127_v57 = vmul.f32 %v3117_v4, %v3060_v3  ;;  %v3126_v8 = vmul.f32 %v3117_v4, %v6259_v41  ;;  %v3125_v41 = vmul.f32 %v6286_v27, %v6257_v28 }
 0x65e   :  { %v3160_v51 = vadd.f32 %v3144_v46, %v3128_v59  ;;  %v3159_v48 = vadd.f32 %v3143_v34, %v3127_v57  ;;  %v3158_v40 = vadd.f32 %v3142_v1, %v3126_v8  ;;  %v3137_v46 = vld [vmem:[%s6368_s3 + $0xb0] sm:$0xff] }
 0x660   :  { %v3176_v15 = vmul.f32 1.4142135, %v3160_v51 }
 0x662   :  { %v3066_v5 = vpop.f32.mrf.mxu0  ;;  %v3208_v50 = vmul.f32 0.2, %v3176_v15  ;;  %vm3192_vm15 = vcmp.ge.f32.partialorder %v3176_v15, 0.0 }
 0x663   :  { %v3129_v29 = vmul.f32 %v3117_v4, %v3066_v5 }
 0x664   :  { %v3224_v28 = vsel %vm3192_vm15, %v3176_v15, %v3208_v50 }
 0x665   :  { %v3161_v32 = vadd.f32 %v3145_v54, %v3129_v29 }
 0x667   :  { %v3177_v35 = vmul.f32 1.4142135, %v3161_v32 }
 0x669   :  { %v3209_v5 = vmul.f32 0.2, %v3177_v35  ;;  %vm3193_vm14 = vcmp.ge.f32.partialorder %v3177_v35, 0.0 }
 0x66a   :  { %v3069_v10 = vpop.f32.mrf.mxu0 }
 0x66b   :  { %v3130_v58 = vmul.f32 %v3117_v4, %v3069_v10  ;;  %v3225_v24 = vsel %vm3193_vm14, %v3177_v35, %v3209_v5  ;;  %v4297_v5 = vmov 1  }
 0x66c   :  { %4273 = vset.pattern.permute.xlu0 %v4297_v5 }
 0x66d   :  { %v3162_v44 = vadd.f32 %v3146_v43, %v3130_v58  ;;  %3286 = vperm.xlu0 %4273, %v6119_v30  }
 0x66f   :  { %v3178_v60 = vmul.f32 1.4142135, %v3162_v44  ;;  %v3122_v44 = vmul.f32 %v6286_v27, %v6251_v19 }
 0x671   :  { %v3210_v12 = vmul.f32 0.2, %v3178_v60  ;;  %vm3194_vm13 = vcmp.ge.f32.partialorder %v3178_v60, 0.0 }
 0x672   :  { %v3072_v23 = vpop.f32.mrf.mxu0 }
 0x673   :  { %v3131_v61 = vmul.f32 %v3117_v4, %v3072_v23  ;;  %v3226_v21 = vsel %vm3194_vm13, %v3178_v60, %v3210_v12  ;;  %v3175_v23 = vmul.f32 1.4142135, %v3159_v48  ;;  %v3121_v60 = vmul.f32 %v6286_v27, %v6249_v14  ;;  %v3136_v12 = vld [vmem:[%s6368_s3 + $0xa8] sm:$0xff] }
 0x674   :  { %v3737_v10 = vclamps-f32 %v3226_v21, 256.0  ;;  %v3120_v14 = vmul.f32 %v6286_v27, %v6247_v18  ;;  %v3135_v18 = vld [vmem:[%s6368_s3 + $0xa0] sm:$0xff] }
 0x675   :  { %v3163_v36 = vadd.f32 %v3147_v17, %v3131_v61  ;;  %v3174_v61 = vmul.f32 1.4142135, %v3158_v40  ;;  %vm3191_vm2 = vcmp.ge.f32.partialorder %v3175_v23, 0.0  ;;  %v3118_v40 = vmul.f32 %v6286_v27, %v6243_v20 }
 0x676   :  { %v3152_v15 = vadd.f32 %v3136_v12, %v3120_v14 }
 0x677   :  { %v3179_v49 = vmul.f32 1.4142135, %v3163_v36  ;;  %v3123_v36 = vmul.f32 %v6286_v27, %v6253_v45  ;;  %vm3190_vm4 = vcmp.ge.f32.partialorder %v3174_v61, 0.0 }
 0x679   :  { %v3211_v38 = vmul.f32 0.2, %v3179_v49  ;;  %vm3195_vm12 = vcmp.ge.f32.partialorder %v3179_v49, 0.0 }
 0x67a   :  { %v3075_v47 = vpop.f32.mrf.mxu0 }
 0x67b   :  { %v3132_v39 = vmul.f32 %v3117_v4, %v3075_v47  ;;  %v3227_v2 = vsel %vm3195_vm12, %v3179_v49, %v3211_v38  ;;  %v3141_v47 = vld [vmem:[%s6368_s3 + $0xd0] sm:$0xff] }
 0x67c   :  { %v3738_v6 = vclamps-f32 %v3227_v2, 256.0  ;;  %v3157_v17 = vadd.f32 %v3141_v47, %v3125_v41  ;;  %v3263_v2 = vpop.permute.xlu1 %3262  ;;  %v3168_v41 = vmul.f32 1.4142135, %v3152_v15 }
 0x67d   :  { %v3164_v26 = vadd.f32 %v3148_v37, %v3132_v39  ;;  %v3280_v39 = vmul.f32 %v3737_v10, %v6279_v53  ;;  %v3124_v37 = vmul.f32 %v6286_v27, %v6255_v63 }
 0x67e   :  { %v3281_v56 = vmul.f32 %v3738_v6, %v6279_v53  ;;  %v3173_v63 = vmul.f32 1.4142135, %v3157_v17  ;;  %v3200_v30 = vmul.f32 0.2, %v3168_v41  ;;  %vm3184_vm1 = vcmp.ge.f32.partialorder %v3168_v41, 0.0 }
 0x67f   :  { %v3180_v62 = vmul.f32 1.4142135, %v3164_v26  ;;  %v3207_v26 = vmul.f32 0.2, %v3175_v23 }
 0x680   :  { %vm3189_vm9 = vcmp.ge.f32.partialorder %v3173_v63, 0.0 }
 0x681   :  { %v3212_v31 = vmul.f32 0.2, %v3180_v62  ;;  %vm3196_vm8 = vcmp.ge.f32.partialorder %v3180_v62, 0.0 }
 0x683   :  { %v3228_v0 = vsel %vm3196_vm8, %v3180_v62, %v3212_v31  ;;  %v3206_v62 = vmul.f32 0.2, %v3174_v61  ;;  %v3205_v31 = vmul.f32 0.2, %v3173_v63 }
 0x684   :  { %v3739_v22 = vclamps-f32 %v3228_v0, 256.0 }
 0x685   :  { %v3078_v33 = vpop.f32.mrf.mxu0  ;;  %v3222_v49 = vsel %vm3190_vm4, %v3174_v61, %v3206_v62  ;;  %v3221_v38 = vsel %vm3189_vm9, %v3173_v63, %v3205_v31  ;;  %v3390_v31 = vpop.f32.mrf.mxu2 }
 0x686   :  { %v3133_v7 = vmul.f32 %v3117_v4, %v3078_v33  ;;  %v3282_v3 = vmul.f32 %v3739_v22, %v6279_v53  ;;  %v3736_v4 = vclamps-f32 %v3225_v24, 256.0  ;;  %v3140_v33 = vld [vmem:[%s6368_s3 + $0xc8] sm:$0xff]  ;;  %v3733_v59 = vclamps-f32 %v3222_v49, 256.0 }
 0x687   :  { %v3156_v43 = vadd.f32 %v3140_v33, %v3124_v37  ;;  %v3732_v57 = vclamps-f32 %v3221_v38, 256.0  ;;  %v3153_v22 = vadd.f32 %v3137_v46, %v3121_v60 }
 0x688   :  { %v3165_v9 = vadd.f32 %v3149_v25, %v3133_v7  ;;  %v3735_v25 = vclamps-f32 %v3224_v28, 256.0  ;;  %v3279_v58 = vmul.f32 %v3736_v4, %v6279_v53  ;;  %v3223_v7 = vsel %vm3191_vm2, %v3175_v23, %v3207_v26  ;;  %v3134_v23 = vld [vmem:[%s6368_s3 + $0x98] sm:$0xff] }
 0x689   :  { %v3734_v29 = vclamps-f32 %v3223_v7, 256.0  ;;  %v3172_v45 = vmul.f32 1.4142135, %v3156_v43  ;;  %v3275_v34 = vmul.f32 %v3732_v57, %v3263_v2  ;;  %v3169_v6 = vmul.f32 1.4142135, %v3153_v22 }
 0x68a   :  { %v3181_v16 = vmul.f32 1.4142135, %v3165_v9  ;;  %v3139_v9 = vld [vmem:[%s6368_s3 + $0xc0] sm:$0xff]  ;;  %v3278_v54 = vmul.f32 %v3735_v25, %v6279_v53  ;;  %v3216_v26 = vsel %vm3184_vm1, %v3168_v41, %v3200_v30 }
 0x68b   :  { %v3277_v32 = vmul.f32 %v3734_v29, %v6279_v53  ;;  %v3204_v0 = vmul.f32 0.2, %v3172_v45  ;;  %vm3188_vm6 = vcmp.ge.f32.partialorder %v3172_v45, 0.0  ;;  %v3201_v10 = vmul.f32 0.2, %v3169_v6 }
 0x68c   :  { %vm3197_vm11 = vcmp.ge.f32.partialorder %v3181_v16, 0.0  ;;  %v3213_v42 = vmul.f32 0.2, %v3181_v16  ;;  %vm3185_vm0 = vcmp.ge.f32.partialorder %v3169_v6, 0.0  ;;  %v3727_v17 = vclamps-f32 %v3216_v26, 256.0 }
 0x68d   :  { %v3217_v47 = vsel %vm3185_vm0, %v3169_v6, %v3201_v10 }
 0x68e   :  { %v3229_v55 = vsel %vm3197_vm11, %v3181_v16, %v3213_v42  ;;  %v3155_v16 = vadd.f32 %v3139_v9, %v3123_v36  ;;  %v3138_v42 = vld [vmem:[%s6368_s3 + $0xb8] sm:$0xff]  ;;  %v3728_v61 = vclamps-f32 %v3217_v47, 256.0  ;;  %v3284_v9 = vld [vmem:[%s6368_s3 + $0x160] sm:$0x7] }
 0x68f   :  { %v3740_v52 = vclamps-f32 %v3229_v55, 256.0  ;;  %v3154_v55 = vadd.f32 %v3138_v42, %v3122_v44 }
 0x690   :  { %v3171_v19 = vmul.f32 1.4142135, %v3155_v16  ;;  %v3271_v28 = vmul.f32 %v3728_v61, %v3263_v2 }
 0x691   :  { %v3283_v13 = vmul.f32 %v3740_v52, %v6279_v53  ;;  %v3276_v52 = vmul.f32 %v3733_v59, %v6279_v53  ;;  %v3170_v35 = vmul.f32 1.4142135, %v3154_v55  ;;  %v3119_v53 = vmul.f32 %v6286_v27, %v6245_v11 }
 0x692   :  { %v3203_v51 = vmul.f32 0.2, %v3171_v19  ;;  %vm3187_vm10 = vcmp.ge.f32.partialorder %v3171_v19, 0.0 }
 0x693   :  { %3741 = vmatpush.xpose.msk.msra.mxu1 %vm2810_vm5, %v3283_v13  ;;  %v3220_v13 = vsel %vm3188_vm6, %v3172_v45, %v3204_v0  ;;  %v3202_v48 = vmul.f32 0.2, %v3170_v35  ;;  %vm3186_vm3 = vcmp.ge.f32.partialorder %v3170_v35, 0.0  ;;  %v3151_v11 = vadd.f32 %v3135_v18, %v3119_v53 }
 0x694   :  { %v3731_v8 = vclamps-f32 %v3220_v13, 256.0 }
 0x695   :  { %v3167_v4 = vmul.f32 1.4142135, %v3151_v11 }
 0x696   :  { %v3274_v21 = vmul.f32 %v3731_v8, %v3263_v2 }
 0x697   :  { %3742 = vmatpush.xpose.msk.msra.mxu1 %vm2810_vm5, %v3282_v3  ;;  %v3219_v3 = vsel %vm3187_vm10, %v3171_v19, %v3203_v51  ;;  %v3199_v20 = vmul.f32 0.2, %v3167_v4  ;;  %vm3183_vm7 = vcmp.ge.f32.partialorder %v3167_v4, 0.0 }
 0x698   :  { %v3730_v1 = vclamps-f32 %v3219_v3, 256.0 }
 0x699   :  { %v3215_v33 = vsel %vm3183_vm7, %v3167_v4, %v3199_v20 }
 0x69a   :  { %v3273_v50 = vmul.f32 %v3730_v1, %v3263_v2  ;;  %v3726_v36 = vclamps-f32 %v3215_v33, 256.0 }
 0x69b   :  { %3743 = vmatpush.xpose.msk.msra.mxu1 %vm2810_vm5, %v3281_v56  ;;  %v3218_v56 = vsel %vm3186_vm3, %v3170_v35, %v3202_v48 }
 0x69c   :  { %v3729_v24 = vclamps-f32 %v3218_v56, 256.0  ;;  %v3269_v7 = vmul.f32 %v3726_v36, %v3263_v2 }
 0x69e   :  { %v3272_v37 = vmul.f32 %v3729_v24, %v3263_v2 }
 0x69f   :  { %3744 = vmatpush.xpose.msk.msra.mxu1 %vm2810_vm5, %v3280_v39  ;;  %v3150_v39 = vadd.f32 %v3134_v23, %v3118_v40 }
 0x6a1   :  { %v3166_v27 = vmul.f32 1.4142135, %v3150_v39 }
 0x6a3   :  { %3745 = vmatpush.xpose.msk.msra.mxu1 %vm2810_vm5, %v3279_v58  ;;  %v3198_v25 = vmul.f32 0.2, %v3166_v27  ;;  %vm3182_vm8 = vcmp.ge.f32.partialorder %v3166_v27, 0.0  ;;  %v3270_v58 = vmul.f32 %v3727_v17, %v3263_v2 }
 0x6a5   :  { %v3214_v62 = vsel %vm3182_vm8, %v3166_v27, %v3198_v25 }
 0x6a6   :  { %v3725_v63 = vclamps-f32 %v3214_v62, 256.0 }
 0x6a7   :  { %3746 = vmatpush.xpose.msk.msra.mxu1 %vm2810_vm5, %v3278_v54 }
 0x6a8   :  { %v3268_v43 = vmul.f32 %v3725_v63, %v3263_v2 }
 0x6ab   :  { %3747 = vmatpush.xpose.msk.msra.mxu1 %vm2810_vm5, %v3277_v32 }
 0x6af   :  { %3748 = vmatpush.xpose.msk.msra.mxu1 %vm2810_vm5, %v3276_v52 }
 0x6b3   :  { %3749 = vmatpush.xpose.msk.msra.mxu1 %vm2810_vm5, %v3275_v34 }
 0x6b7   :  { %3750 = vmatpush.xpose.msk.msra.mxu1 %vm2810_vm5, %v3274_v21 }
 0x6bb   :  { %3751 = vmatpush.xpose.msk.msra.mxu1 %vm2810_vm5, %v3273_v50 }
 0x6bf   :  { %3752 = vmatpush.xpose.msk.msra.mxu1 %vm2810_vm5, %v3272_v37 }
 0x6c3   :  { %3753 = vmatpush.xpose.msk.msra.mxu1 %vm2810_vm5, %v3271_v28 }
 0x6c7   :  { %3754 = vmatpush.xpose.msk.msra.mxu1 %vm2810_vm5, %v3270_v58 }
 0x6cb   :  { %3755 = vmatpush.xpose.msk.msra.mxu1 %vm2810_vm5, %v3269_v7 }
 0x6cf   :  { %3756 = vmatpush.xpose.msk.msra.mxu1 %vm2810_vm5, %v3268_v43 }
 0x6d2   :  { %3757 = vmatmul.msk.f32.vlgmr.msra.gmra.mxu1 %vm2810_vm5, %v3284_v9 }
 0x6df   :  { %v3287_v29 = vpop.permute.xlu0 %3286 }
 0x74f   :  { %v3357_v54 = vpop.f32.mrf.mxu1 }
 0x750   :  { %v3358_v44 = vadd.f32 %v3357_v54, %v3287_v29 }
 0x752   :  { %v3758_v49 = vclamps-f32 %v3358_v44, 256.0 }
 0x754   :  { %v3393_v45 = vadd.f32 %v3758_v49, %v3390_v31 }
 0x756   :  { %3394 = vst [vmem:[%s6371_s9] sm:$0x7] %v3393_v45 }

</bundles_post_ra>
